<compile_context>
chip_gen: v6e
topology: v6e:2x2x1
jax: 0.10.0
libtpu: 0.0.40
codegen_flags: <defaults>
</compile_context>

<pallas_src>
import functools

import jax
import jax.numpy as jnp
from jax import lax
from jax.experimental import pallas as pl
from jax.experimental.pallas import tpu as pltpu


# ----------------------------------------------------------------------------
# Fused decoder kernel: grid = (batch_chunks, layer)
# ----------------------------------------------------------------------------
def _fused_decoder_kernel(
    inp_ref, pos_ref, kv_ref, smask_ref, ref0_ref, vr_ref, amask_ref,
    wqk_ref, wv_ref, wos_ref, wqc_ref, woc_ref,
    w1_ref, w2_ref, lng_ref, lnb_ref, normg_ref, normb_ref,
    bboxw_ref, bboxb_ref,
    inter_ref, slab_ref,
    x_sc, ref_sc,
    *, use_bbox_proj):
    layer = pl.program_id(1)
    n_layer = pl.num_programs(1)

    CB, Lq, C = ref_sc.shape
    D = x_sc.shape[-1]
    n_rep = vr_ref.shape[-1] // C          # == n_levels
    SLAB = slab_ref.shape[-1]
    pad_cols = SLAB - (1 + n_rep) * C
    scale = 1.0 / (float(D) ** 0.5)
    bf16 = jnp.bfloat16

    # ---- init running state at layer 0 (per batch chunk) -------------------
    @pl.when(layer == 0)
    def _():
        x_sc[...] = inp_ref[...].reshape(CB * Lq, D).astype(jnp.float32)
        ref_sc[...] = ref0_ref[...].astype(jnp.float32)

    # ---- sampling locations for this layer (pre-refinement reference) ------
    r = ref_sc[...]                                        # [CB, Lq, C] f32
    loc = jnp.tile(r, (1, 1, n_rep)) * vr_ref[...]         # [CB, Lq, n_rep*C]

    def layer_norm(v, idx):
        mu = jnp.mean(v, axis=-1, keepdims=True)
        var = jnp.mean(jnp.square(v - mu), axis=-1, keepdims=True)
        return ((v - mu) * lax.rsqrt(var + 1e-5)
                * lng_ref[idx].astype(jnp.float32)
                + lnb_ref[idx].astype(jnp.float32))

    def decoder_norm(v):
        mu = jnp.mean(v, axis=-1, keepdims=True)
        var = jnp.mean(jnp.square(v - mu), axis=-1, keepdims=True)
        return ((v - mu) * lax.rsqrt(var + 1e-5)
                * normg_ref[...].astype(jnp.float32)
                + normb_ref[...].astype(jnp.float32))

    def softmax(logits):
        m = jnp.max(logits, axis=-1, keepdims=True)
        p = jnp.exp(logits - m)
        return p * pl.reciprocal(jnp.sum(p, axis=-1, keepdims=True), approx=True)

    x = x_sc[...]                                          # [CB*Lq, D] f32 residual
    pos = pos_ref[...].reshape(CB * Lq, D).astype(jnp.float32)

    # ---- self attention (pos added to q/k, fused QK projection) ------------
    qk_in = (x + pos).astype(bf16)
    qk = jnp.dot(qk_in, wqk_ref[...], preferred_element_type=jnp.float32)
    q = qk[:, :D].astype(bf16).reshape(CB, Lq, D)
    k = qk[:, D:].astype(bf16).reshape(CB, Lq, D)
    v = jnp.dot(x.astype(bf16), wv_ref[...],
                preferred_element_type=jnp.float32).astype(bf16).reshape(CB, Lq, D)
    logits = jnp.einsum('bqd,bkd->bqk', q, k,
                        preferred_element_type=jnp.float32) * scale
    logits = logits + amask_ref[...]                       # precomputed AR mask (or zeros)
    attn = softmax(logits)
    sa_ctx = jnp.einsum('bqk,bkd->bqd', attn.astype(bf16), v,
                        preferred_element_type=jnp.float32)
    sa = jnp.dot(sa_ctx.reshape(CB * Lq, D).astype(bf16), wos_ref[...],
                 preferred_element_type=jnp.float32)
    x = layer_norm(x + sa, 0)

    # ---- cross attention over the flattened source -------------------------
    # K/V of the (layer-invariant) source are precomputed outside and resident
    # in VMEM for all layers (constant index_map).
    qc = jnp.dot(x.astype(bf16), wqc_ref[...],
                 preferred_element_type=jnp.float32).astype(bf16).reshape(CB, Lq, D)
    kc = kv_ref[..., :D]                                   # [CB, Sp, D] bf16
    vc = kv_ref[..., D:]
    logits_c = jnp.einsum('bqd,bkd->bqk', qc, kc,
                          preferred_element_type=jnp.float32) * scale
    logits_c = logits_c + smask_ref[...]                   # additive key-pad mask
    attn_c = softmax(logits_c)
    ca_ctx = jnp.einsum('bqk,bkd->bqd', attn_c.astype(bf16), vc,
                        preferred_element_type=jnp.float32)
    ca = jnp.dot(ca_ctx.reshape(CB * Lq, D).astype(bf16), woc_ref[...],
                 preferred_element_type=jnp.float32)
    x = layer_norm(x + ca, 1)

    # ---- feed forward -------------------------------------------------------
    h = jax.nn.relu(jnp.dot(x.astype(bf16), w1_ref[...],
                            preferred_element_type=jnp.float32))
    f = jnp.dot(h.astype(bf16), w2_ref[...], preferred_element_type=jnp.float32)
    x = layer_norm(x + f, 2)

    x_sc[...] = x                                          # carry to next layer

    # ---- decoder-level norm / bbox refinement / packed slab output ---------
    zeros_pad = jnp.zeros((CB, Lq, pad_cols), jnp.float32)
    if use_bbox_proj:
        inter_ref[0] = decoder_norm(x).reshape(CB, Lq, D).astype(inter_ref.dtype)
        # bbox head padded to 128 output columns -> full-lane MXU matmul.
        bbox = (jnp.dot(x, bboxw_ref[layer], preferred_element_type=jnp.float32)
                + bboxb_ref[layer])                        # [CB*Lq, 128]
        r0 = jnp.clip(r, 0.0, 1.0)
        inv = jnp.log(jnp.maximum(r0, 1e-5) / jnp.maximum(1.0 - r0, 1e-5))
        new_ref = jax.nn.sigmoid(bbox[:, :C].reshape(CB, Lq, C) + inv)
        ref_sc[...] = new_ref
        slab_ref[0] = jnp.concatenate([new_ref, loc, zeros_pad],
                                      axis=-1).astype(slab_ref.dtype)
    else:
        slab_ref[0] = jnp.concatenate([r, loc, zeros_pad],
                                      axis=-1).astype(slab_ref.dtype)

        @pl.when(layer == n_layer - 1)
        def _():
            inter_ref[0] = decoder_norm(x).reshape(CB, Lq, D).astype(inter_ref.dtype)

        @pl.when(layer != n_layer - 1)
        def _():
            inter_ref[0] = x.reshape(CB, Lq, D).astype(inter_ref.dtype)


# ----------------------------------------------------------------------------
# pallas_call wrapper (single call for the whole decoder)
# ----------------------------------------------------------------------------
def run_decoder(inp, pos, reference_point, source, source_mask,
                source_valid_ratio, params, *, n_layer, use_bbox_proj,
                autoregressive, batch_chunks=1):
    B, Lq, D = inp.shape
    C = reference_point.shape[-1]
    S = source.shape[1]
    n_levels = source_valid_ratio.shape[1]
    Dff = params["w1"].shape[-1]
    bf16 = jnp.bfloat16

    assert B % batch_chunks == 0
    CB = B // batch_chunks                      # batch rows folded per block
    SLAB = 128
    assert (1 + n_levels) * C <= SLAB

    # --- pad flattened source length to a multiple of 128, mask padded keys -
    Sp = ((S + 127) // 128) * 128
    pad_s = Sp - S
    src_pad = jnp.pad(source.astype(bf16), ((0, 0), (0, pad_s), (0, 0)))
    mask_pad = jnp.pad(source_mask, ((0, 0), (0, pad_s)), constant_values=True)
    smask_add = jnp.where(mask_pad, -1e9, 0.0).astype(jnp.float32)[:, None, :]

    # --- layer-invariant cross-attn K/V precomputed once (one XLA matmul) ---
    kv_cross = jnp.einsum('bsd,de->bse', src_pad, params["wkv_cross"],
                          preferred_element_type=jnp.float32).astype(bf16)

    if C == 4:
        vr_eff = jnp.concatenate([source_valid_ratio, source_valid_ratio], -1)
    else:
        vr_eff = source_valid_ratio
    vr_flat = vr_eff.reshape(B, 1, n_levels * C).astype(jnp.float32)
    ref0 = reference_point.astype(jnp.float32)

    # --- precomputed self-attn additive mask (zeros if not autoregressive) --
    if autoregressive:
        row = jnp.arange(Lq)[:, None]
        col = jnp.arange(Lq)[None, :]
        amask = jnp.where(col > row, -1e9, 0.0).astype(jnp.float32)
    else:
        amask = jnp.zeros((Lq, Lq), jnp.float32)

    # --- bbox head zero-padded to 128 output columns -------------------------
    bbox_w_pad = jnp.pad(params["bbox_w"],
                         ((0, 0), (0, 0), (0, SLAB - params["bbox_w"].shape[-1])))
    bbox_b_pad = jnp.pad(params["bbox_b"],
                         ((0, 0), (0, 0), (0, SLAB - params["bbox_b"].shape[-1])))

    kernel = functools.partial(_fused_decoder_kernel,
                               use_bbox_proj=use_bbox_proj)

    per_c = lambda c, l: (c, 0, 0)
    const2 = lambda c, l: (0, 0)
    const3 = lambda c, l: (0, 0, 0)
    out_map = lambda c, l: (l, c, 0, 0)

    out_shape = (
        jax.ShapeDtypeStruct((n_layer, B, Lq, D), jnp.bfloat16),   # out_norm
        jax.ShapeDtypeStruct((n_layer, B, Lq, SLAB), jnp.float32), # refs|locs slab
    )

    inter, slab = pl.pallas_call(
        kernel,
        out_shape=out_shape,
        grid_spec=pltpu.PrefetchScalarGridSpec(
            num_scalar_prefetch=0,
            grid=(batch_chunks, n_layer),
            in_specs=[
                pl.BlockSpec((CB, Lq, D), per_c),                # input
                pl.BlockSpec((CB, Lq, D), per_c),                # pos
                pl.BlockSpec((CB, Sp, 2 * D), per_c),            # cross K/V (bf16)
                pl.BlockSpec((CB, 1, Sp), per_c),                # additive key mask
                pl.BlockSpec((CB, Lq, C), per_c),                # initial ref pts
                pl.BlockSpec((CB, 1, n_levels * C), per_c),      # valid ratios (flat)
                pl.BlockSpec((Lq, Lq), const2),                  # self-attn add mask
                pl.BlockSpec((D, 2 * D), const2),                # fused Wq|Wk (self)
                pl.BlockSpec((D, D), const2),                    # Wv (self)
                pl.BlockSpec((D, D), const2),                    # Wo (self)
                pl.BlockSpec((D, D), const2),                    # Wq (cross)
                pl.BlockSpec((D, D), const2),                    # Wo (cross)
                pl.BlockSpec((D, Dff), const2),                  # FFN W1
                pl.BlockSpec((Dff, D), const2),                  # FFN W2
                pl.BlockSpec((3, D), const2),                    # sublayer LN gamma
                pl.BlockSpec((3, D), const2),                    # sublayer LN beta
                pl.BlockSpec((1, D), const2),                    # decoder norm gamma
                pl.BlockSpec((1, D), const2),                    # decoder norm beta
                pl.BlockSpec((n_layer, D, SLAB), const3),        # bbox W (all layers)
                pl.BlockSpec((n_layer, 1, SLAB), const3),        # bbox b (all layers)
            ],
            out_specs=[
                pl.BlockSpec((1, CB, Lq, D), out_map),
                pl.BlockSpec((1, CB, Lq, SLAB), out_map),
            ],
            scratch_shapes=[
                pltpu.VMEM((CB * Lq, D), jnp.float32),   # running `out`
                pltpu.VMEM((CB, Lq, C), jnp.float32),    # running reference point
            ],
        ),
        compiler_params=pltpu.CompilerParams(
            dimension_semantics=("parallel", "arbitrary"),
            vmem_limit_bytes=48 * 1024 * 1024,
        ),
    )(inp, pos, kv_cross, smask_add, ref0, vr_flat, amask,
      params["wqk_self"], params["wv_self"], params["wo_self"],
      params["wq_cross"], params["wo_cross"],
      params["w1"], params["w2"], params["ln_g"], params["ln_b"],
      params["norm_g"], params["norm_b"], bbox_w_pad, bbox_b_pad)

    refs = slab[..., :C]
    locs = slab[..., C:(1 + n_levels) * C].reshape(n_layer, B, Lq, n_levels, C)
    return inter, refs, locs


# ----------------------------------------------------------------------------
# Decoder (parameter container + thin orchestration)
# ----------------------------------------------------------------------------
class DeformableTransformerDecoderPallas:
    def __init__(self, dim, dff, n_layer, key, use_bbox_proj=True,
                 autoregressive=False):
        self.dim = dim
        self.n_layer = n_layer
        self.use_bbox_proj = use_bbox_proj
        self.autoregressive = autoregressive

        ks = jax.random.split(key, 9)
        s = 0.05

        def w(k, shape):
            return (jax.random.normal(k, shape, jnp.float32) * s).astype(jnp.bfloat16)

        # repeat() in the reference deepcopies the layer -> identical initial
        # weights per layer, so one shared parameter set is faithful here.
        self.params = {
            "wqk_self": w(ks[0], (dim, 2 * dim)),
            "wv_self": w(ks[1], (dim, dim)),
            "wo_self": w(ks[2], (dim, dim)),
            "wq_cross": w(ks[3], (dim, dim)),
            "wkv_cross": w(ks[4], (dim, 2 * dim)),
            "wo_cross": w(ks[5], (dim, dim)),
            "w1": w(ks[6], (dim, dff)),
            "w2": w(ks[7], (dff, dim)),
            "ln_g": jnp.ones((3, dim), jnp.float32),
            "ln_b": jnp.zeros((3, dim), jnp.float32),
            # decoder-level LayerNorm(s): PyTorch default init (gamma=1, beta=0)
            "norm_g": jnp.ones((1, dim), jnp.float32),
            "norm_b": jnp.zeros((1, dim), jnp.float32),
            # bbox projection heads (Linear(dim, 4)), distinct per layer
            "bbox_w": jax.random.normal(ks[8], (n_layer, dim, 4), jnp.float32) * s,
            "bbox_b": jnp.zeros((n_layer, 1, 4), jnp.float32),
        }

    def __call__(self, inp, pos, reference_point, source, source_shape,
                 level_start, source_mask, source_valid_ratio):
        # TODO(synk): source_shape / level_start are only consumed by true
        # deformable bilinear sampling (layer internals are opaque).
        del source_shape, level_start
        inter, refs, locs = run_decoder(
            inp, pos, reference_point, source, source_mask, source_valid_ratio,
            self.params, n_layer=self.n_layer,
            use_bbox_proj=self.use_bbox_proj,
            autoregressive=self.autoregressive)

        intermediate = [inter[i] for i in range(self.n_layer)]
        if self.use_bbox_proj:
            intermediate_reference_point = [
                jax.lax.stop_gradient(refs[i]) for i in range(self.n_layer)]  # .detach()
        else:
            intermediate_reference_point = [refs[i] for i in range(self.n_layer)]
        locations = [locs[i] for i in range(self.n_layer)]
        return intermediate, intermediate_reference_point, locations


# ----------------------------------------------------------------------------
# main
# ----------------------------------------------------------------------------
if __name__ == "__main__":
    key = jax.random.PRNGKey(0)
    B, Lq, D, Dff = 2, 16, 128, 256
    n_layer = 3
    lvl_shapes = [(8, 8), (4, 4)]
    n_levels = len(lvl_shapes)
    S = sum(h * w for h, w in lvl_shapes)

    ks = jax.random.split(key, 8)
    inp = jax.random.normal(ks[0], (B, Lq, D), jnp.float32)
    pos = jax.random.normal(ks[1], (B, Lq, D), jnp.float32)
    reference_point = jax.nn.sigmoid(jax.random.normal(ks[2], (B, Lq, 2), jnp.float32))
    source = jax.random.normal(ks[3], (B, S, D), jnp.float32)
    source_shape = jnp.array(lvl_shapes, jnp.int32)
    level_start = jnp.array([0, lvl_shapes[0][0] * lvl_shapes[0][1]], jnp.int32)
    source_mask = jnp.zeros((B, S), jnp.bool_)
    source_valid_ratio = jax.random.uniform(ks[4], (B, n_levels, 2), jnp.float32,
                                            minval=0.5, maxval=1.0)

    # bbox-refinement path (per-layer norms + iterative reference update)
    decoder = DeformableTransformerDecoderPallas(D, Dff, n_layer, ks[5],
                                                 use_bbox_proj=True,
                                                 autoregressive=False)
    inter, inter_ref, locs = decoder(inp, pos, reference_point, source,
                                     source_shape, level_start, source_mask,
                                     source_valid_ratio)
    jax.block_until_ready((inter, inter_ref, locs))

    # plain path (single final LayerNorm) + autoregressive self-attn mask
    decoder2 = DeformableTransformerDecoderPallas(D, Dff, n_layer, ks[6],
                                                  use_bbox_proj=False,
                                                  autoregressive=True)
    inter2, inter_ref2, locs2 = decoder2(inp, pos, reference_point, source,
                                         source_shape, level_start, source_mask,
                                         source_valid_ratio)
    jax.block_until_ready((inter2, inter_ref2, locs2))

    assert len(inter) == n_layer and inter[0].shape == (B, Lq, D)
    assert inter_ref[0].shape == (B, Lq, 2)
    assert locs[0].shape == (B, Lq, n_levels, 2)
    assert len(inter2) == n_layer and inter2[0].shape == (B, Lq, D)
    assert bool(jnp.all(jnp.isfinite(inter[-1].astype(jnp.float32))))
    assert bool(jnp.all(jnp.isfinite(inter2[-1].astype(jnp.float32))))
    assert bool(jnp.all(jnp.isfinite(inter_ref[-1]))) and bool(jnp.all(jnp.isfinite(locs[-1])))
    print("KERNEL_OK")
</pallas_src>

<mosaic_0001>
module attributes {stable_mosaic.version = 11 : i64} {
  func.func @_fused_decoder_kernel(%arg0: i32, %arg1: i32, %arg2: memref<2x16x128xf32, #tpu.memory_space<vmem>>, %arg3: memref<2x16x128xf32, #tpu.memory_space<vmem>>, %arg4: memref<2x128x256xbf16, #tpu.memory_space<vmem>>, %arg5: memref<2x1x128xf32, #tpu.memory_space<vmem>>, %arg6: memref<2x16x2xf32, #tpu.memory_space<vmem>>, %arg7: memref<2x1x4xf32, #tpu.memory_space<vmem>>, %arg8: memref<16x16xf32, #tpu.memory_space<vmem>>, %arg9: memref<128x256xbf16, #tpu.memory_space<vmem>>, %arg10: memref<128x128xbf16, #tpu.memory_space<vmem>>, %arg11: memref<128x128xbf16, #tpu.memory_space<vmem>>, %arg12: memref<128x128xbf16, #tpu.memory_space<vmem>>, %arg13: memref<128x128xbf16, #tpu.memory_space<vmem>>, %arg14: memref<128x256xbf16, #tpu.memory_space<vmem>>, %arg15: memref<256x128xbf16, #tpu.memory_space<vmem>>, %arg16: memref<3x128xf32, #tpu.memory_space<vmem>>, %arg17: memref<3x128xf32, #tpu.memory_space<vmem>>, %arg18: memref<1x128xf32, #tpu.memory_space<vmem>>, %arg19: memref<1x128xf32, #tpu.memory_space<vmem>>, %arg20: memref<3x128x128xf32, #tpu.memory_space<vmem>>, %arg21: memref<3x1x128xf32, #tpu.memory_space<vmem>>, %arg22: memref<1x2x16x128xbf16, #tpu.memory_space<vmem>>, %arg23: memref<1x2x16x128xf32, #tpu.memory_space<vmem>>, %arg24: memref<32x128xf32, #tpu.memory_space<vmem>>, %arg25: memref<2x16x2xf32, #tpu.memory_space<vmem>>) attributes {dimension_semantics = [#tpu.dimension_semantics<parallel>, #tpu.dimension_semantics<arbitrary>], iteration_bounds = array<i64: 1, 3>, scalar_prefetch = 0 : i64, scratch_operands = 2 : i64, tpu.core_type = #tpu.core_type<tc>, window_params = [{transform_indices = @transform_0, window_bounds = array<i64: 2, 16, 128>}, {transform_indices = @transform_1, window_bounds = array<i64: 2, 16, 128>}, {transform_indices = @transform_2, window_bounds = array<i64: 2, 128, 256>}, {transform_indices = @transform_3, window_bounds = array<i64: 2, 1, 128>}, {transform_indices = @transform_4, window_bounds = array<i64: 2, 16, 2>}, {transform_indices = @transform_5, window_bounds = array<i64: 2, 1, 4>}, {pipeline_mode = #tpu.pipeline_mode<synchronous>, transform_indices = @transform_6, window_bounds = array<i64: 16, 16>}, {pipeline_mode = #tpu.pipeline_mode<synchronous>, transform_indices = @transform_7, window_bounds = array<i64: 128, 256>}, {pipeline_mode = #tpu.pipeline_mode<synchronous>, transform_indices = @transform_8, window_bounds = array<i64: 128, 128>}, {pipeline_mode = #tpu.pipeline_mode<synchronous>, transform_indices = @transform_9, window_bounds = array<i64: 128, 128>}, {pipeline_mode = #tpu.pipeline_mode<synchronous>, transform_indices = @transform_10, window_bounds = array<i64: 128, 128>}, {pipeline_mode = #tpu.pipeline_mode<synchronous>, transform_indices = @transform_11, window_bounds = array<i64: 128, 128>}, {pipeline_mode = #tpu.pipeline_mode<synchronous>, transform_indices = @transform_12, window_bounds = array<i64: 128, 256>}, {pipeline_mode = #tpu.pipeline_mode<synchronous>, transform_indices = @transform_13, window_bounds = array<i64: 256, 128>}, {pipeline_mode = #tpu.pipeline_mode<synchronous>, transform_indices = @transform_14, window_bounds = array<i64: 3, 128>}, {pipeline_mode = #tpu.pipeline_mode<synchronous>, transform_indices = @transform_15, window_bounds = array<i64: 3, 128>}, {pipeline_mode = #tpu.pipeline_mode<synchronous>, transform_indices = @transform_16, window_bounds = array<i64: 1, 128>}, {pipeline_mode = #tpu.pipeline_mode<synchronous>, transform_indices = @transform_17, window_bounds = array<i64: 1, 128>}, {pipeline_mode = #tpu.pipeline_mode<synchronous>, transform_indices = @transform_18, window_bounds = array<i64: 3, 128, 128>}, {pipeline_mode = #tpu.pipeline_mode<synchronous>, transform_indices = @transform_19, window_bounds = array<i64: 3, 1, 128>}, {transform_indices = @transform_20, window_bounds = array<i64: 1, 2, 16, 128>}, {transform_indices = @transform_21, window_bounds = array<i64: 1, 2, 16, 128>}]} {
    %c0_i32 = arith.constant 0 : i32
    %0 = arith.cmpi eq, %arg1, %c0_i32 : i32
    %1 = arith.extui %0 : i1 to i32
    %c0_i32_0 = arith.constant 0 : i32
    %2 = arith.cmpi ne, %1, %c0_i32_0 : i32
    scf.if %2 {
      %c0_111 = arith.constant 0 : index
      %c0_112 = arith.constant 0 : index
      %c0_113 = arith.constant 0 : index
      %238 = vector.load %arg2[%c0_111, %c0_112, %c0_113] : memref<2x16x128xf32, #tpu.memory_space<vmem>>, vector<2x16x128xf32>
      %239 = vector.shape_cast %238 : vector<2x16x128xf32> to vector<32x128xf32>
      %c0_114 = arith.constant 0 : index
      %c0_115 = arith.constant 0 : index
      %240 = vector.load %arg24[%c0_114, %c0_115] : memref<32x128xf32, #tpu.memory_space<vmem>>, vector<32x128xf32>
      tpu.vector_store %arg24[%c0_114, %c0_115], %239 {strides = array<i32>} : memref<32x128xf32, #tpu.memory_space<vmem>>, vector<32x128xf32>,
      %c0_116 = arith.constant 0 : index
      %c0_117 = arith.constant 0 : index
      %c0_118 = arith.constant 0 : index
      %241 = vector.load %arg6[%c0_116, %c0_117, %c0_118] : memref<2x16x2xf32, #tpu.memory_space<vmem>>, vector<2x16x2xf32>
      %c0_119 = arith.constant 0 : index
      %c0_120 = arith.constant 0 : index
      %c0_121 = arith.constant 0 : index
      %242 = vector.load %arg25[%c0_119, %c0_120, %c0_121] : memref<2x16x2xf32, #tpu.memory_space<vmem>>, vector<2x16x2xf32>
      tpu.vector_store %arg25[%c0_119, %c0_120, %c0_121], %241 {strides = array<i32>} : memref<2x16x2xf32, #tpu.memory_space<vmem>>, vector<2x16x2xf32>,
    } else {
    }
    %c0 = arith.constant 0 : index
    %c0_1 = arith.constant 0 : index
    %c0_2 = arith.constant 0 : index
    %3 = vector.load %arg25[%c0, %c0_1, %c0_2] : memref<2x16x2xf32, #tpu.memory_space<vmem>>, vector<2x16x2xf32>
    %4 = tpu.concatenate %3, %3 in 2 : vector<2x16x2xf32>, vector<2x16x2xf32> -> vector<2x16x4xf32>
    %c0_3 = arith.constant 0 : index
    %c0_4 = arith.constant 0 : index
    %c0_5 = arith.constant 0 : index
    %5 = vector.load %arg7[%c0_3, %c0_4, %c0_5] : memref<2x1x4xf32, #tpu.memory_space<vmem>>, vector<2x1x4xf32>
    %6 = vector.broadcast %5 : vector<2x1x4xf32> to vector<2x16x4xf32>
    %7 = arith.mulf %4, %6 : vector<2x16x4xf32>
    %c0_6 = arith.constant 0 : index
    %c0_7 = arith.constant 0 : index
    %8 = vector.load %arg24[%c0_6, %c0_7] : memref<32x128xf32, #tpu.memory_space<vmem>>, vector<32x128xf32>
    %c0_8 = arith.constant 0 : index
    %c0_9 = arith.constant 0 : index
    %c0_10 = arith.constant 0 : index
    %9 = vector.load %arg3[%c0_8, %c0_9, %c0_10] : memref<2x16x128xf32, #tpu.memory_space<vmem>>, vector<2x16x128xf32>
    %10 = vector.shape_cast %9 : vector<2x16x128xf32> to vector<32x128xf32>
    %11 = arith.addf %8, %10 : vector<32x128xf32>
    %12 = arith.truncf %11 : vector<32x128xf32> to vector<32x128xbf16>
    %c0_11 = arith.constant 0 : index
    %c0_12 = arith.constant 0 : index
    %13 = vector.load %arg9[%c0_11, %c0_12] : memref<128x256xbf16, #tpu.memory_space<vmem>>, vector<128x256xbf16>
    %cst = arith.constant dense<0.000000e+00> : vector<32x256xf32>
    %14 = tpu.matmul %12, %13, %cst {dimension_numbers = #tpu.dot_dimension_numbers<[1], [0], [0], [1], [0, 0, 1, 1], [], []>} : vector<32x128xbf16>, vector<128x256xbf16>, vector<32x256xf32> -> vector<32x256xf32>
    %15 = vector.extract_strided_slice %14 {offsets = [0, 0], sizes = [32, 128], strides = [1, 1]} : vector<32x256xf32> to vector<32x128xf32>
    %16 = arith.truncf %15 : vector<32x128xf32> to vector<32x128xbf16>
    %17 = vector.shape_cast %16 : vector<32x128xbf16> to vector<2x16x128xbf16>
    %18 = vector.extract_strided_slice %14 {offsets = [0, 128], sizes = [32, 128], strides = [1, 1]} : vector<32x256xf32> to vector<32x128xf32>
    %19 = arith.truncf %18 : vector<32x128xf32> to vector<32x128xbf16>
    %20 = vector.shape_cast %19 : vector<32x128xbf16> to vector<2x16x128xbf16>
    %21 = arith.truncf %8 : vector<32x128xf32> to vector<32x128xbf16>
    %c0_13 = arith.constant 0 : index
    %c0_14 = arith.constant 0 : index
    %22 = vector.load %arg10[%c0_13, %c0_14] : memref<128x128xbf16, #tpu.memory_space<vmem>>, vector<128x128xbf16>
    %cst_15 = arith.constant dense<0.000000e+00> : vector<32x128xf32>
    %23 = tpu.matmul %21, %22, %cst_15 {dimension_numbers = #tpu.dot_dimension_numbers<[1], [0], [0], [1], [0, 0, 1, 1], [], []>} : vector<32x128xbf16>, vector<128x128xbf16>, vector<32x128xf32> -> vector<32x128xf32>
    %24 = arith.truncf %23 : vector<32x128xf32> to vector<32x128xbf16>
    %25 = vector.shape_cast %24 : vector<32x128xbf16> to vector<2x16x128xbf16>
    "tpu.trace_start"() <{level = 10 : i32, message = "bqd,bkd->bqk"}> : () -> ()
    %cst_16 = arith.constant dense<0.000000e+00> : vector<2x16x16xf32>
    %26 = tpu.matmul %17, %20, %cst_16 {dimension_numbers = #tpu.dot_dimension_numbers<[2], [2], [1], [1], [0, 0, 0, 1, 1, 1], [0], [0]>} : vector<2x16x128xbf16>, vector<2x16x128xbf16>, vector<2x16x16xf32> -> vector<2x16x16xf32>
    "tpu.trace_stop"() : () -> ()
    %cst_17 = arith.constant 0.0883883461 : f32
    %27 = vector.broadcast %cst_17 : f32 to vector<2x16x16xf32>
    %28 = arith.mulf %26, %27 : vector<2x16x16xf32>
    %c0_18 = arith.constant 0 : index
    %c0_19 = arith.constant 0 : index
    %29 = vector.load %arg8[%c0_18, %c0_19] : memref<16x16xf32, #tpu.memory_space<vmem>>, vector<16x16xf32>
    %30 = vector.shape_cast %29 : vector<16x16xf32> to vector<1x16x16xf32>
    %31 = vector.broadcast %30 : vector<1x16x16xf32> to vector<2x16x16xf32>
    %32 = arith.addf %28, %31 : vector<2x16x16xf32>
    %cst_20 = arith.constant dense<0xFF800000> : vector<2x16xf32>
    %33 = vector.multi_reduction <maximumf>, %32, %cst_20 [2] : vector<2x16x16xf32> to vector<2x16xf32>
    %34 = vector.shape_cast %33 : vector<2x16xf32> to vector<2x16x1xf32>
    %35 = vector.broadcast %34 : vector<2x16x1xf32> to vector<2x16x16xf32>
    %36 = arith.subf %32, %35 : vector<2x16x16xf32>
    %37 = math.exp %36 : vector<2x16x16xf32>
    %cst_21 = arith.constant dense<0.000000e+00> : vector<2x16xf32>
    %38 = vector.multi_reduction <add>, %37, %cst_21 [2] : vector<2x16x16xf32> to vector<2x16xf32>
    %39 = vector.shape_cast %38 : vector<2x16xf32> to vector<2x16x1xf32>
    %40 = tpu.reciprocal %39 {approx = true} : vector<2x16x1xf32> -> vector<2x16x1xf32>
    %41 = vector.broadcast %40 : vector<2x16x1xf32> to vector<2x16x16xf32>
    %42 = arith.mulf %37, %41 : vector<2x16x16xf32>
    %43 = arith.truncf %42 : vector<2x16x16xf32> to vector<2x16x16xbf16>
    "tpu.trace_start"() <{level = 10 : i32, message = "bqk,bkd->bqd"}> : () -> ()
    %cst_22 = arith.constant dense<0.000000e+00> : vector<2x16x128xf32>
    %44 = tpu.matmul %43, %25, %cst_22 {dimension_numbers = #tpu.dot_dimension_numbers<[2], [1], [1], [2], [0, 0, 0, 1, 1, 2], [0], [0]>} : vector<2x16x16xbf16>, vector<2x16x128xbf16>, vector<2x16x128xf32> -> vector<2x16x128xf32>
    "tpu.trace_stop"() : () -> ()
    %45 = vector.shape_cast %44 : vector<2x16x128xf32> to vector<32x128xf32>
    %46 = arith.truncf %45 : vector<32x128xf32> to vector<32x128xbf16>
    %c0_23 = arith.constant 0 : index
    %c0_24 = arith.constant 0 : index
    %47 = vector.load %arg11[%c0_23, %c0_24] : memref<128x128xbf16, #tpu.memory_space<vmem>>, vector<128x128xbf16>
    %cst_25 = arith.constant dense<0.000000e+00> : vector<32x128xf32>
    %48 = tpu.matmul %46, %47, %cst_25 {dimension_numbers = #tpu.dot_dimension_numbers<[1], [0], [0], [1], [0, 0, 1, 1], [], []>} : vector<32x128xbf16>, vector<128x128xbf16>, vector<32x128xf32> -> vector<32x128xf32>
    %49 = arith.addf %8, %48 : vector<32x128xf32>
    %cst_26 = arith.constant dense<0.000000e+00> : vector<32xf32>
    %50 = vector.multi_reduction <add>, %49, %cst_26 [1] : vector<32x128xf32> to vector<32xf32>
    %51 = vector.shape_cast %50 : vector<32xf32> to vector<32x1xf32>
    %cst_27 = arith.constant 1.280000e+02 : f32
    %52 = vector.broadcast %cst_27 : f32 to vector<32x1xf32>
    %53 = arith.divf %51, %52 : vector<32x1xf32>
    %54 = vector.broadcast %53 : vector<32x1xf32> to vector<32x128xf32>
    %55 = arith.subf %49, %54 : vector<32x128xf32>
    %56 = arith.mulf %55, %55 : vector<32x128xf32>
    %cst_28 = arith.constant dense<0.000000e+00> : vector<32xf32>
    %57 = vector.multi_reduction <add>, %56, %cst_28 [1] : vector<32x128xf32> to vector<32xf32>
    %58 = vector.shape_cast %57 : vector<32xf32> to vector<32x1xf32>
    %cst_29 = arith.constant 1.280000e+02 : f32
    %59 = vector.broadcast %cst_29 : f32 to vector<32x1xf32>
    %60 = arith.divf %58, %59 : vector<32x1xf32>
    %61 = vector.broadcast %53 : vector<32x1xf32> to vector<32x128xf32>
    %62 = arith.subf %49, %61 : vector<32x128xf32>
    %cst_30 = arith.constant 9.99999974E-6 : f32
    %63 = vector.broadcast %cst_30 : f32 to vector<32x1xf32>
    %64 = arith.addf %60, %63 : vector<32x1xf32>
    %65 = math.rsqrt %64 : vector<32x1xf32>
    %66 = vector.broadcast %65 : vector<32x1xf32> to vector<32x128xf32>
    %67 = arith.mulf %62, %66 : vector<32x128xf32>
    %c0_31 = arith.constant 0 : index
    %c0_32 = arith.constant 0 : index
    %68 = vector.load %arg16[%c0_31, %c0_32] : memref<3x128xf32, #tpu.memory_space<vmem>>, vector<1x128xf32>
    %69 = vector.shape_cast %68 : vector<1x128xf32> to vector<128xf32>
    %70 = vector.shape_cast %69 : vector<128xf32> to vector<1x128xf32>
    %71 = vector.broadcast %70 : vector<1x128xf32> to vector<32x128xf32>
    %72 = arith.mulf %67, %71 : vector<32x128xf32>
    %c0_33 = arith.constant 0 : index
    %c0_34 = arith.constant 0 : index
    %73 = vector.load %arg17[%c0_33, %c0_34] : memref<3x128xf32, #tpu.memory_space<vmem>>, vector<1x128xf32>
    %74 = vector.shape_cast %73 : vector<1x128xf32> to vector<128xf32>
    %75 = vector.shape_cast %74 : vector<128xf32> to vector<1x128xf32>
    %76 = vector.broadcast %75 : vector<1x128xf32> to vector<32x128xf32>
    %77 = arith.addf %72, %76 : vector<32x128xf32>
    %78 = arith.truncf %77 : vector<32x128xf32> to vector<32x128xbf16>
    %c0_35 = arith.constant 0 : index
    %c0_36 = arith.constant 0 : index
    %79 = vector.load %arg12[%c0_35, %c0_36] : memref<128x128xbf16, #tpu.memory_space<vmem>>, vector<128x128xbf16>
    %cst_37 = arith.constant dense<0.000000e+00> : vector<32x128xf32>
    %80 = tpu.matmul %78, %79, %cst_37 {dimension_numbers = #tpu.dot_dimension_numbers<[1], [0], [0], [1], [0, 0, 1, 1], [], []>} : vector<32x128xbf16>, vector<128x128xbf16>, vector<32x128xf32> -> vector<32x128xf32>
    %81 = arith.truncf %80 : vector<32x128xf32> to vector<32x128xbf16>
    %82 = vector.shape_cast %81 : vector<32x128xbf16> to vector<2x16x128xbf16>
    %c0_38 = arith.constant 0 : index
    %c0_39 = arith.constant 0 : index
    %c0_40 = arith.constant 0 : index
    %83 = vector.load %arg4[%c0_38, %c0_39, %c0_40] : memref<2x128x256xbf16, #tpu.memory_space<vmem>>, vector<2x128x128xbf16>
    %c0_41 = arith.constant 0 : index
    %c0_42 = arith.constant 0 : index
    %c128 = arith.constant 128 : index
    %84 = vector.load %arg4[%c0_41, %c0_42, %c128] : memref<2x128x256xbf16, #tpu.memory_space<vmem>>, vector<2x128x128xbf16>
    "tpu.trace_start"() <{level = 10 : i32, message = "bqd,bkd->bqk"}> : () -> ()
    %cst_43 = arith.constant dense<0.000000e+00> : vector<2x16x128xf32>
    %85 = tpu.matmul %82, %83, %cst_43 {dimension_numbers = #tpu.dot_dimension_numbers<[2], [2], [1], [1], [0, 0, 0, 1, 1, 1], [0], [0]>} : vector<2x16x128xbf16>, vector<2x128x128xbf16>, vector<2x16x128xf32> -> vector<2x16x128xf32>
    "tpu.trace_stop"() : () -> ()
    %cst_44 = arith.constant 0.0883883461 : f32
    %86 = vector.broadcast %cst_44 : f32 to vector<2x16x128xf32>
    %87 = arith.mulf %85, %86 : vector<2x16x128xf32>
    %c0_45 = arith.constant 0 : index
    %c0_46 = arith.constant 0 : index
    %c0_47 = arith.constant 0 : index
    %88 = vector.load %arg5[%c0_45, %c0_46, %c0_47] : memref<2x1x128xf32, #tpu.memory_space<vmem>>, vector<2x1x128xf32>
    %89 = vector.broadcast %88 : vector<2x1x128xf32> to vector<2x16x128xf32>
    %90 = arith.addf %87, %89 : vector<2x16x128xf32>
    %cst_48 = arith.constant dense<0xFF800000> : vector<2x16xf32>
    %91 = vector.multi_reduction <maximumf>, %90, %cst_48 [2] : vector<2x16x128xf32> to vector<2x16xf32>
    %92 = vector.shape_cast %91 : vector<2x16xf32> to vector<2x16x1xf32>
    %93 = vector.broadcast %92 : vector<2x16x1xf32> to vector<2x16x128xf32>
    %94 = arith.subf %90, %93 : vector<2x16x128xf32>
    %95 = math.exp %94 : vector<2x16x128xf32>
    %cst_49 = arith.constant dense<0.000000e+00> : vector<2x16xf32>
    %96 = vector.multi_reduction <add>, %95, %cst_49 [2] : vector<2x16x128xf32> to vector<2x16xf32>
    %97 = vector.shape_cast %96 : vector<2x16xf32> to vector<2x16x1xf32>
    %98 = tpu.reciprocal %97 {approx = true} : vector<2x16x1xf32> -> vector<2x16x1xf32>
    %99 = vector.broadcast %98 : vector<2x16x1xf32> to vector<2x16x128xf32>
    %100 = arith.mulf %95, %99 : vector<2x16x128xf32>
    %101 = arith.truncf %100 : vector<2x16x128xf32> to vector<2x16x128xbf16>
    "tpu.trace_start"() <{level = 10 : i32, message = "bqk,bkd->bqd"}> : () -> ()
    %cst_50 = arith.constant dense<0.000000e+00> : vector<2x16x128xf32>
    %102 = tpu.matmul %101, %84, %cst_50 {dimension_numbers = #tpu.dot_dimension_numbers<[2], [1], [1], [2], [0, 0, 0, 1, 1, 2], [0], [0]>} : vector<2x16x128xbf16>, vector<2x128x128xbf16>, vector<2x16x128xf32> -> vector<2x16x128xf32>
    "tpu.trace_stop"() : () -> ()
    %103 = vector.shape_cast %102 : vector<2x16x128xf32> to vector<32x128xf32>
    %104 = arith.truncf %103 : vector<32x128xf32> to vector<32x128xbf16>
    %c0_51 = arith.constant 0 : index
    %c0_52 = arith.constant 0 : index
    %105 = vector.load %arg13[%c0_51, %c0_52] : memref<128x128xbf16, #tpu.memory_space<vmem>>, vector<128x128xbf16>
    %cst_53 = arith.constant dense<0.000000e+00> : vector<32x128xf32>
    %106 = tpu.matmul %104, %105, %cst_53 {dimension_numbers = #tpu.dot_dimension_numbers<[1], [0], [0], [1], [0, 0, 1, 1], [], []>} : vector<32x128xbf16>, vector<128x128xbf16>, vector<32x128xf32> -> vector<32x128xf32>
    %107 = arith.addf %77, %106 : vector<32x128xf32>
    %cst_54 = arith.constant dense<0.000000e+00> : vector<32xf32>
    %108 = vector.multi_reduction <add>, %107, %cst_54 [1] : vector<32x128xf32> to vector<32xf32>
    %109 = vector.shape_cast %108 : vector<32xf32> to vector<32x1xf32>
    %cst_55 = arith.constant 1.280000e+02 : f32
    %110 = vector.broadcast %cst_55 : f32 to vector<32x1xf32>
    %111 = arith.divf %109, %110 : vector<32x1xf32>
    %112 = vector.broadcast %111 : vector<32x1xf32> to vector<32x128xf32>
    %113 = arith.subf %107, %112 : vector<32x128xf32>
    %114 = arith.mulf %113, %113 : vector<32x128xf32>
    %cst_56 = arith.constant dense<0.000000e+00> : vector<32xf32>
    %115 = vector.multi_reduction <add>, %114, %cst_56 [1] : vector<32x128xf32> to vector<32xf32>
    %116 = vector.shape_cast %115 : vector<32xf32> to vector<32x1xf32>
    %cst_57 = arith.constant 1.280000e+02 : f32
    %117 = vector.broadcast %cst_57 : f32 to vector<32x1xf32>
    %118 = arith.divf %116, %117 : vector<32x1xf32>
    %119 = vector.broadcast %111 : vector<32x1xf32> to vector<32x128xf32>
    %120 = arith.subf %107, %119 : vector<32x128xf32>
    %cst_58 = arith.constant 9.99999974E-6 : f32
    %121 = vector.broadcast %cst_58 : f32 to vector<32x1xf32>
    %122 = arith.addf %118, %121 : vector<32x1xf32>
    %123 = math.rsqrt %122 : vector<32x1xf32>
    %124 = vector.broadcast %123 : vector<32x1xf32> to vector<32x128xf32>
    %125 = arith.mulf %120, %124 : vector<32x128xf32>
    %c1 = arith.constant 1 : index
    %c0_59 = arith.constant 0 : index
    %126 = vector.load %arg16[%c1, %c0_59] : memref<3x128xf32, #tpu.memory_space<vmem>>, vector<1x128xf32>
    %127 = vector.shape_cast %126 : vector<1x128xf32> to vector<128xf32>
    %128 = vector.shape_cast %127 : vector<128xf32> to vector<1x128xf32>
    %129 = vector.broadcast %128 : vector<1x128xf32> to vector<32x128xf32>
    %130 = arith.mulf %125, %129 : vector<32x128xf32>
    %c1_60 = arith.constant 1 : index
    %c0_61 = arith.constant 0 : index
    %131 = vector.load %arg17[%c1_60, %c0_61] : memref<3x128xf32, #tpu.memory_space<vmem>>, vector<1x128xf32>
    %132 = vector.shape_cast %131 : vector<1x128xf32> to vector<128xf32>
    %133 = vector.shape_cast %132 : vector<128xf32> to vector<1x128xf32>
    %134 = vector.broadcast %133 : vector<1x128xf32> to vector<32x128xf32>
    %135 = arith.addf %130, %134 : vector<32x128xf32>
    %136 = arith.truncf %135 : vector<32x128xf32> to vector<32x128xbf16>
    %c0_62 = arith.constant 0 : index
    %c0_63 = arith.constant 0 : index
    %137 = vector.load %arg14[%c0_62, %c0_63] : memref<128x256xbf16, #tpu.memory_space<vmem>>, vector<128x256xbf16>
    %cst_64 = arith.constant dense<0.000000e+00> : vector<32x256xf32>
    %138 = tpu.matmul %136, %137, %cst_64 {dimension_numbers = #tpu.dot_dimension_numbers<[1], [0], [0], [1], [0, 0, 1, 1], [], []>} : vector<32x128xbf16>, vector<128x256xbf16>, vector<32x256xf32> -> vector<32x256xf32>
    %cst_65 = arith.constant 0.000000e+00 : f32
    %139 = vector.broadcast %cst_65 : f32 to vector<32x256xf32>
    %140 = arith.maximumf %138, %139 : vector<32x256xf32>
    %141 = arith.truncf %140 : vector<32x256xf32> to vector<32x256xbf16>
    %c0_66 = arith.constant 0 : index
    %c0_67 = arith.constant 0 : index
    %142 = vector.load %arg15[%c0_66, %c0_67] : memref<256x128xbf16, #tpu.memory_space<vmem>>, vector<256x128xbf16>
    %cst_68 = arith.constant dense<0.000000e+00> : vector<32x128xf32>
    %143 = tpu.matmul %141, %142, %cst_68 {dimension_numbers = #tpu.dot_dimension_numbers<[1], [0], [0], [1], [0, 0, 1, 1], [], []>} : vector<32x256xbf16>, vector<256x128xbf16>, vector<32x128xf32> -> vector<32x128xf32>
    %144 = arith.addf %135, %143 : vector<32x128xf32>
    %cst_69 = arith.constant dense<0.000000e+00> : vector<32xf32>
    %145 = vector.multi_reduction <add>, %144, %cst_69 [1] : vector<32x128xf32> to vector<32xf32>
    %146 = vector.shape_cast %145 : vector<32xf32> to vector<32x1xf32>
    %cst_70 = arith.constant 1.280000e+02 : f32
    %147 = vector.broadcast %cst_70 : f32 to vector<32x1xf32>
    %148 = arith.divf %146, %147 : vector<32x1xf32>
    %149 = vector.broadcast %148 : vector<32x1xf32> to vector<32x128xf32>
    %150 = arith.subf %144, %149 : vector<32x128xf32>
    %151 = arith.mulf %150, %150 : vector<32x128xf32>
    %cst_71 = arith.constant dense<0.000000e+00> : vector<32xf32>
    %152 = vector.multi_reduction <add>, %151, %cst_71 [1] : vector<32x128xf32> to vector<32xf32>
    %153 = vector.shape_cast %152 : vector<32xf32> to vector<32x1xf32>
    %cst_72 = arith.constant 1.280000e+02 : f32
    %154 = vector.broadcast %cst_72 : f32 to vector<32x1xf32>
    %155 = arith.divf %153, %154 : vector<32x1xf32>
    %156 = vector.broadcast %148 : vector<32x1xf32> to vector<32x128xf32>
    %157 = arith.subf %144, %156 : vector<32x128xf32>
    %cst_73 = arith.constant 9.99999974E-6 : f32
    %158 = vector.broadcast %cst_73 : f32 to vector<32x1xf32>
    %159 = arith.addf %155, %158 : vector<32x1xf32>
    %160 = math.rsqrt %159 : vector<32x1xf32>
    %161 = vector.broadcast %160 : vector<32x1xf32> to vector<32x128xf32>
    %162 = arith.mulf %157, %161 : vector<32x128xf32>
    %c2 = arith.constant 2 : index
    %c0_74 = arith.constant 0 : index
    %163 = vector.load %arg16[%c2, %c0_74] : memref<3x128xf32, #tpu.memory_space<vmem>>, vector<1x128xf32>
    %164 = vector.shape_cast %163 : vector<1x128xf32> to vector<128xf32>
    %165 = vector.shape_cast %164 : vector<128xf32> to vector<1x128xf32>
    %166 = vector.broadcast %165 : vector<1x128xf32> to vector<32x128xf32>
    %167 = arith.mulf %162, %166 : vector<32x128xf32>
    %c2_75 = arith.constant 2 : index
    %c0_76 = arith.constant 0 : index
    %168 = vector.load %arg17[%c2_75, %c0_76] : memref<3x128xf32, #tpu.memory_space<vmem>>, vector<1x128xf32>
    %169 = vector.shape_cast %168 : vector<1x128xf32> to vector<128xf32>
    %170 = vector.shape_cast %169 : vector<128xf32> to vector<1x128xf32>
    %171 = vector.broadcast %170 : vector<1x128xf32> to vector<32x128xf32>
    %172 = arith.addf %167, %171 : vector<32x128xf32>
    %c0_77 = arith.constant 0 : index
    %c0_78 = arith.constant 0 : index
    %173 = vector.load %arg24[%c0_77, %c0_78] : memref<32x128xf32, #tpu.memory_space<vmem>>, vector<32x128xf32>
    tpu.vector_store %arg24[%c0_77, %c0_78], %172 {strides = array<i32>} : memref<32x128xf32, #tpu.memory_space<vmem>>, vector<32x128xf32>,
    %cst_79 = arith.constant 0.000000e+00 : f32
    %174 = vector.broadcast %cst_79 : f32 to vector<2x16x122xf32>
    %cst_80 = arith.constant dense<0.000000e+00> : vector<32xf32>
    %175 = vector.multi_reduction <add>, %172, %cst_80 [1] : vector<32x128xf32> to vector<32xf32>
    %176 = vector.shape_cast %175 : vector<32xf32> to vector<32x1xf32>
    %cst_81 = arith.constant 1.280000e+02 : f32
    %177 = vector.broadcast %cst_81 : f32 to vector<32x1xf32>
    %178 = arith.divf %176, %177 : vector<32x1xf32>
    %179 = vector.broadcast %178 : vector<32x1xf32> to vector<32x128xf32>
    %180 = arith.subf %172, %179 : vector<32x128xf32>
    %181 = arith.mulf %180, %180 : vector<32x128xf32>
    %cst_82 = arith.constant dense<0.000000e+00> : vector<32xf32>
    %182 = vector.multi_reduction <add>, %181, %cst_82 [1] : vector<32x128xf32> to vector<32xf32>
    %183 = vector.shape_cast %182 : vector<32xf32> to vector<32x1xf32>
    %cst_83 = arith.constant 1.280000e+02 : f32
    %184 = vector.broadcast %cst_83 : f32 to vector<32x1xf32>
    %185 = arith.divf %183, %184 : vector<32x1xf32>
    %186 = vector.broadcast %178 : vector<32x1xf32> to vector<32x128xf32>
    %187 = arith.subf %172, %186 : vector<32x128xf32>
    %cst_84 = arith.constant 9.99999974E-6 : f32
    %188 = vector.broadcast %cst_84 : f32 to vector<32x1xf32>
    %189 = arith.addf %185, %188 : vector<32x1xf32>
    %190 = math.rsqrt %189 : vector<32x1xf32>
    %191 = vector.broadcast %190 : vector<32x1xf32> to vector<32x128xf32>
    %192 = arith.mulf %187, %191 : vector<32x128xf32>
    %c0_85 = arith.constant 0 : index
    %c0_86 = arith.constant 0 : index
    %193 = vector.load %arg18[%c0_85, %c0_86] : memref<1x128xf32, #tpu.memory_space<vmem>>, vector<1x128xf32>
    %194 = vector.broadcast %193 : vector<1x128xf32> to vector<32x128xf32>
    %195 = arith.mulf %192, %194 : vector<32x128xf32>
    %c0_87 = arith.constant 0 : index
    %c0_88 = arith.constant 0 : index
    %196 = vector.load %arg19[%c0_87, %c0_88] : memref<1x128xf32, #tpu.memory_space<vmem>>, vector<1x128xf32>
    %197 = vector.broadcast %196 : vector<1x128xf32> to vector<32x128xf32>
    %198 = arith.addf %195, %197 : vector<32x128xf32>
    %199 = vector.shape_cast %198 : vector<32x128xf32> to vector<2x16x128xf32>
    %200 = arith.truncf %199 : vector<2x16x128xf32> to vector<2x16x128xbf16>
    %c0_89 = arith.constant 0 : index
    %c0_90 = arith.constant 0 : index
    %c0_91 = arith.constant 0 : index
    %c0_92 = arith.constant 0 : index
    %201 = vector.load %arg22[%c0_89, %c0_90, %c0_91, %c0_92] : memref<1x2x16x128xbf16, #tpu.memory_space<vmem>>, vector<1x2x16x128xbf16>
    %202 = vector.shape_cast %201 : vector<1x2x16x128xbf16> to vector<2x16x128xbf16>
    %203 = vector.shape_cast %200 : vector<2x16x128xbf16> to vector<1x2x16x128xbf16>
    tpu.vector_store %arg22[%c0_89, %c0_90, %c0_91, %c0_92], %203 {strides = array<i32>} : memref<1x2x16x128xbf16, #tpu.memory_space<vmem>>, vector<1x2x16x128xbf16>,
    %204 = arith.index_cast %arg1 : i32 to index
    %c0_93 = arith.constant 0 : index
    %c0_94 = arith.constant 0 : index
    %205 = vector.load %arg20[%204, %c0_93, %c0_94] : memref<3x128x128xf32, #tpu.memory_space<vmem>>, vector<1x128x128xf32>
    %206 = vector.shape_cast %205 : vector<1x128x128xf32> to vector<128x128xf32>
    %cst_95 = arith.constant dense<0.000000e+00> : vector<32x128xf32>
    %207 = tpu.matmul %172, %206, %cst_95 {dimension_numbers = #tpu.dot_dimension_numbers<[1], [0], [0], [1], [0, 0, 1, 1], [], []>} : vector<32x128xf32>, vector<128x128xf32>, vector<32x128xf32> -> vector<32x128xf32>
    %208 = arith.index_cast %arg1 : i32 to index
    %c0_96 = arith.constant 0 : index
    %c0_97 = arith.constant 0 : index
    %209 = vector.load %arg21[%208, %c0_96, %c0_97] : memref<3x1x128xf32, #tpu.memory_space<vmem>>, vector<1x1x128xf32>
    %210 = vector.shape_cast %209 : vector<1x1x128xf32> to vector<1x128xf32>
    %211 = vector.broadcast %210 : vector<1x128xf32> to vector<32x128xf32>
    %212 = arith.addf %207, %211 : vector<32x128xf32>
    %cst_98 = arith.constant 0.000000e+00 : f32
    %cst_99 = arith.constant 1.000000e+00 : f32
    %213 = vector.broadcast %cst_98 : f32 to vector<2x16x2xf32>
    %214 = arith.maximumf %213, %3 : vector<2x16x2xf32>
    %215 = vector.broadcast %cst_99 : f32 to vector<2x16x2xf32>
    %216 = arith.minimumf %215, %214 : vector<2x16x2xf32>
    %cst_100 = arith.constant 9.99999974E-6 : f32
    %217 = vector.broadcast %cst_100 : f32 to vector<2x16x2xf32>
    %218 = arith.maximumf %216, %217 : vector<2x16x2xf32>
    %cst_101 = arith.constant 1.000000e+00 : f32
    %219 = vector.broadcast %cst_101 : f32 to vector<2x16x2xf32>
    %220 = arith.subf %219, %216 : vector<2x16x2xf32>
    %cst_102 = arith.constant 9.99999974E-6 : f32
    %221 = vector.broadcast %cst_102 : f32 to vector<2x16x2xf32>
    %222 = arith.maximumf %220, %221 : vector<2x16x2xf32>
    %223 = arith.divf %218, %222 : vector<2x16x2xf32>
    %224 = math.log %223 : vector<2x16x2xf32>
    %225 = vector.extract_strided_slice %212 {offsets = [0, 0], sizes = [32, 2], strides = [1, 1]} : vector<32x128xf32> to vector<32x2xf32>
    %226 = vector.shape_cast %225 : vector<32x2xf32> to vector<2x16x2xf32>
    %227 = arith.addf %226, %224 : vector<2x16x2xf32>
    %228 = arith.negf %227 : vector<2x16x2xf32>
    %229 = math.exp %228 : vector<2x16x2xf32>
    %cst_103 = arith.constant 1.000000e+00 : f32
    %230 = vector.broadcast %cst_103 : f32 to vector<2x16x2xf32>
    %231 = arith.addf %230, %229 : vector<2x16x2xf32>
    %232 = arith.divf %230, %231 : vector<2x16x2xf32>
    %c0_104 = arith.constant 0 : index
    %c0_105 = arith.constant 0 : index
    %c0_106 = arith.constant 0 : index
    %233 = vector.load %arg25[%c0_104, %c0_105, %c0_106] : memref<2x16x2xf32, #tpu.memory_space<vmem>>, vector<2x16x2xf32>
    tpu.vector_store %arg25[%c0_104, %c0_105, %c0_106], %232 {strides = array<i32>} : memref<2x16x2xf32, #tpu.memory_space<vmem>>, vector<2x16x2xf32>,
    %234 = tpu.concatenate %232, %7, %174 in 2 : vector<2x16x2xf32>, vector<2x16x4xf32>, vector<2x16x122xf32> -> vector<2x16x128xf32>
    %c0_107 = arith.constant 0 : index
    %c0_108 = arith.constant 0 : index
    %c0_109 = arith.constant 0 : index
    %c0_110 = arith.constant 0 : index
    %235 = vector.load %arg23[%c0_107, %c0_108, %c0_109, %c0_110] : memref<1x2x16x128xf32, #tpu.memory_space<vmem>>, vector<1x2x16x128xf32>
    %236 = vector.shape_cast %235 : vector<1x2x16x128xf32> to vector<2x16x128xf32>
    %237 = vector.shape_cast %234 : vector<2x16x128xf32> to vector<1x2x16x128xf32>
    tpu.vector_store %arg23[%c0_107, %c0_108, %c0_109, %c0_110], %237 {strides = array<i32>} : memref<1x2x16x128xf32, #tpu.memory_space<vmem>>, vector<1x2x16x128xf32>,
    return
  }
  func.func @transform_0(%arg0: i32, %arg1: i32) -> (i32, i32, i32) {
    %c0_i32 = arith.constant 0 : i32
    %c0_i32_0 = arith.constant 0 : i32
    %c0_i32_1 = arith.constant 0 : i32
    return %arg0, %c0_i32, %c0_i32_0 : i32, i32, i32
  }
  func.func @transform_1(%arg0: i32, %arg1: i32) -> (i32, i32, i32) {
    %c0_i32 = arith.constant 0 : i32
    %c0_i32_0 = arith.constant 0 : i32
    %c0_i32_1 = arith.constant 0 : i32
    return %arg0, %c0_i32, %c0_i32_0 : i32, i32, i32
  }
  func.func @transform_2(%arg0: i32, %arg1: i32) -> (i32, i32, i32) {
    %c0_i32 = arith.constant 0 : i32
    %c0_i32_0 = arith.constant 0 : i32
    %c0_i32_1 = arith.constant 0 : i32
    return %arg0, %c0_i32, %c0_i32_0 : i32, i32, i32
  }
  func.func @transform_3(%arg0: i32, %arg1: i32) -> (i32, i32, i32) {
    %c0_i32 = arith.constant 0 : i32
    %c0_i32_0 = arith.constant 0 : i32
    %c0_i32_1 = arith.constant 0 : i32
    return %arg0, %c0_i32, %c0_i32_0 : i32, i32, i32
  }
  func.func @transform_4(%arg0: i32, %arg1: i32) -> (i32, i32, i32) {
    %c0_i32 = arith.constant 0 : i32
    %c0_i32_0 = arith.constant 0 : i32
    %c0_i32_1 = arith.constant 0 : i32
    return %arg0, %c0_i32, %c0_i32_0 : i32, i32, i32
  }
  func.func @transform_5(%arg0: i32, %arg1: i32) -> (i32, i32, i32) {
    %c0_i32 = arith.constant 0 : i32
    %c0_i32_0 = arith.constant 0 : i32
    %c0_i32_1 = arith.constant 0 : i32
    return %arg0, %c0_i32, %c0_i32_0 : i32, i32, i32
  }
  func.func @transform_6(%arg0: i32, %arg1: i32) -> (i32, i32) {
    %c0_i32 = arith.constant 0 : i32
    %c0_i32_0 = arith.constant 0 : i32
    %c0_i32_1 = arith.constant 0 : i32
    return %c0_i32, %c0_i32_0 : i32, i32
  }
  func.func @transform_7(%arg0: i32, %arg1: i32) -> (i32, i32) {
    %c0_i32 = arith.constant 0 : i32
    %c0_i32_0 = arith.constant 0 : i32
    %c0_i32_1 = arith.constant 0 : i32
    return %c0_i32, %c0_i32_0 : i32, i32
  }
  func.func @transform_8(%arg0: i32, %arg1: i32) -> (i32, i32) {
    %c0_i32 = arith.constant 0 : i32
    %c0_i32_0 = arith.constant 0 : i32
    %c0_i32_1 = arith.constant 0 : i32
    return %c0_i32, %c0_i32_0 : i32, i32
  }
  func.func @transform_9(%arg0: i32, %arg1: i32) -> (i32, i32) {
    %c0_i32 = arith.constant 0 : i32
    %c0_i32_0 = arith.constant 0 : i32
    %c0_i32_1 = arith.constant 0 : i32
    return %c0_i32, %c0_i32_0 : i32, i32
  }
  func.func @transform_10(%arg0: i32, %arg1: i32) -> (i32, i32) {
    %c0_i32 = arith.constant 0 : i32
    %c0_i32_0 = arith.constant 0 : i32
    %c0_i32_1 = arith.constant 0 : i32
    return %c0_i32, %c0_i32_0 : i32, i32
  }
  func.func @transform_11(%arg0: i32, %arg1: i32) -> (i32, i32) {
    %c0_i32 = arith.constant 0 : i32
    %c0_i32_0 = arith.constant 0 : i32
    %c0_i32_1 = arith.constant 0 : i32
    return %c0_i32, %c0_i32_0 : i32, i32
  }
  func.func @transform_12(%arg0: i32, %arg1: i32) -> (i32, i32) {
    %c0_i32 = arith.constant 0 : i32
    %c0_i32_0 = arith.constant 0 : i32
    %c0_i32_1 = arith.constant 0 : i32
    return %c0_i32, %c0_i32_0 : i32, i32
  }
  func.func @transform_13(%arg0: i32, %arg1: i32) -> (i32, i32) {
    %c0_i32 = arith.constant 0 : i32
    %c0_i32_0 = arith.constant 0 : i32
    %c0_i32_1 = arith.constant 0 : i32
    return %c0_i32, %c0_i32_0 : i32, i32
  }
  func.func @transform_14(%arg0: i32, %arg1: i32) -> (i32, i32) {
    %c0_i32 = arith.constant 0 : i32
    %c0_i32_0 = arith.constant 0 : i32
    %c0_i32_1 = arith.constant 0 : i32
    return %c0_i32, %c0_i32_0 : i32, i32
  }
  func.func @transform_15(%arg0: i32, %arg1: i32) -> (i32, i32) {
    %c0_i32 = arith.constant 0 : i32
    %c0_i32_0 = arith.constant 0 : i32
    %c0_i32_1 = arith.constant 0 : i32
    return %c0_i32, %c0_i32_0 : i32, i32
  }
  func.func @transform_16(%arg0: i32, %arg1: i32) -> (i32, i32) {
    %c0_i32 = arith.constant 0 : i32
    %c0_i32_0 = arith.constant 0 : i32
    %c0_i32_1 = arith.constant 0 : i32
    return %c0_i32, %c0_i32_0 : i32, i32
  }
  func.func @transform_17(%arg0: i32, %arg1: i32) -> (i32, i32) {
    %c0_i32 = arith.constant 0 : i32
    %c0_i32_0 = arith.constant 0 : i32
    %c0_i32_1 = arith.constant 0 : i32
    return %c0_i32, %c0_i32_0 : i32, i32
  }
  func.func @transform_18(%arg0: i32, %arg1: i32) -> (i32, i32, i32) {
    %c0_i32 = arith.constant 0 : i32
    %c0_i32_0 = arith.constant 0 : i32
    %c0_i32_1 = arith.constant 0 : i32
    %c0_i32_2 = arith.constant 0 : i32
    return %c0_i32, %c0_i32_0, %c0_i32_1 : i32, i32, i32
  }
  func.func @transform_19(%arg0: i32, %arg1: i32) -> (i32, i32, i32) {
    %c0_i32 = arith.constant 0 : i32
    %c0_i32_0 = arith.constant 0 : i32
    %c0_i32_1 = arith.constant 0 : i32
    %c0_i32_2 = arith.constant 0 : i32
    return %c0_i32, %c0_i32_0, %c0_i32_1 : i32, i32, i32
  }
  func.func @transform_20(%arg0: i32, %arg1: i32) -> (i32, i32, i32, i32) {
    %c0_i32 = arith.constant 0 : i32
    %c0_i32_0 = arith.constant 0 : i32
    %c0_i32_1 = arith.constant 0 : i32
    return %arg1, %arg0, %c0_i32, %c0_i32_0 : i32, i32, i32, i32
  }
  func.func @transform_21(%arg0: i32, %arg1: i32) -> (i32, i32, i32, i32) {
    %c0_i32 = arith.constant 0 : i32
    %c0_i32_0 = arith.constant 0 : i32
    %c0_i32_1 = arith.constant 0 : i32
    return %arg1, %arg0, %c0_i32, %c0_i32_0 : i32, i32, i32, i32
  }
}

</mosaic_0001>

<bundles_post_ra>
// kernel: tpu_custom_call.1
= control target key start
LH: loop header
LB: loop body
LE: loop exit
PB: predicated region body
PF: predicated region fallthrough
CT: control target
= control target key end

     0   :  { %s5698_s0 = inlined_call_operand.vmem [shape: f32[2,16,128], index: 0, kind: input, shape index: {}]   ;;  %s5699_s1 = inlined_call_operand.hbm [shape: f32[2,16,128], index: 1, kind: input, shape index: {}]   ;;  %s5700_s2 = inlined_call_operand.hbm [shape: bf16[2,128,256], index: 2, kind: input, shape index: {}]   ;;  %s5701_s3 = inlined_call_operand.hbm [shape: f32[2,1,128], index: 3, kind: input, shape index: {}]   ;;  %s5702_s4 = inlined_call_operand.vmem [shape: f32[2,16,2], index: 4, kind: input, shape index: {}]   ;;  %s5703_s5 = inlined_call_operand.hbm [shape: f32[2,1,4], index: 5, kind: input, shape index: {}]   ;;  %s5704_s6 = inlined_call_operand.hbm [shape: f32[16,16], index: 6, kind: input, shape index: {}]   ;;  %s5705_s7 = inlined_call_operand.hbm [shape: bf16[128,256], index: 7, kind: input, shape index: {}]   ;;  %s5706_s8 = inlined_call_operand.hbm [shape: bf16[128,128], index: 8, kind: input, shape index: {}]   ;;  %s5707_s9 = inlined_call_operand.hbm [shape: bf16[128,128], index: 9, kind: input, shape index: {}]   ;;  %s5708_s10 = inlined_call_operand.hbm [shape: bf16[128,128], index: 10, kind: input, shape index: {}]   ;;  %s5709_s11 = inlined_call_operand.hbm [shape: bf16[128,128], index: 11, kind: input, shape index: {}]   ;;  %s5710_s12 = inlined_call_operand.hbm [shape: bf16[128,256], index: 12, kind: input, shape index: {}]   ;;  %s5711_s13 = inlined_call_operand.hbm [shape: bf16[256,128], index: 13, kind: input, shape index: {}]   ;;  %s5712_s14 = inlined_call_operand.vmem [shape: f32[3,128], index: 14, kind: input, shape index: {}]   ;;  %s5713_s15 = inlined_call_operand.vmem [shape: f32[3,128], index: 15, kind: input, shape index: {}]   ;;  %s5714_s16 = inlined_call_operand.vmem [shape: f32[1,128], index: 16, kind: input, shape index: {}]   ;;  %s5715_s17 = inlined_call_operand.vmem [shape: f32[1,128], index: 17, kind: input, shape index: {}]   ;;  %s5716_s18 = inlined_call_operand.hbm [shape: f32[3,128,128], index: 18, kind: input, shape index: {}]   ;;  %s5717_s19 = inlined_call_operand.vmem [shape: f32[3,1,128], index: 19, kind: input, shape index: {}]   ;;  %s5718_s20 = inlined_call_operand.hbm [shape: bf16[3,2,16,128], index: 20, kind: output, shape index: {0}]   ;;  %s5719_s21 = inlined_call_operand.hbm [shape: f32[3,2,16,128], index: 21, kind: output, shape index: {1}]  }
   0x1   :  { %5740 = sst [smem:[#allocation44_spill]] %s5698_s0 }
   0x2   :  { %5741 = sst [smem:[#allocation45_spill]] %s5699_s1 }
   0x3   :  { %5742 = sst [smem:[#allocation46_spill]] %s5700_s2 }
   0x4   :  { %5743 = sst [smem:[#allocation47_spill]] %s5701_s3 }
   0x5   :  { %5744 = sst [smem:[#allocation48_spill]] %s5702_s4 }
   0x6   :  { %5745 = sst [smem:[#allocation49_spill]] %s5703_s5 }
   0x7   :  { %5746 = sst [smem:[#allocation50_spill]] %s5705_s7 }
   0x8   :  { %5747 = sst [smem:[#allocation51_spill]] %s5707_s9 }
   0x9   :  { %5748 = sst [smem:[#allocation52_spill]] %s5709_s11 }
   0xa   :  { %5749 = sst [smem:[#allocation53_spill]] %s5714_s16 }
   0xb   :  { %5750 = sst [smem:[#allocation54_spill]] %s5715_s17 }
   0xc   :  { %5751 = sst [smem:[#allocation55_spill]] %s5718_s20 }
   0xd   :  { %27 = vsyncpa [#allocation5], 0 }
   0xe   :  { %28 = vsyncpa [#allocation8], 0 }
   0xf   :  { %29 = vsyncpa [#allocation11], 0 }
  0x10   :  { %30 = vsyncpa [#allocation14], 0 }
  0x11   :  { %31 = vsyncpa [#allocation17], 0 }
  0x12   :  { %32 = vsyncpa [#allocation20], 0 }
  0x13   :  { %33 = vsyncpa [#allocation23], 0 }
  0x14   :  { %34 = vsyncpa [#allocation6], 0 }
  0x15   :  { %36 = vsyncpa [#allocation6 + $0x1], 0 }
  0x16   :  { %37 = vsyncpa [#allocation27], 0 }
  0x17   :  { %39 = vsyncpa [#allocation27 + $0x1], 0  ;;  %s5077_s2 = smov 0   ;;  %s5079_s25 = smov 0  }
  0x18   :  { %s5081_s26 = smov 0   ;;  %s5083_s27 = smov 0  }
  0x19   :  { %s5085_s3 = smov 0   ;;  %s5087_s28 = smov 0  }
  0x1a LB: > { %5752 = sst [smem:[#allocation37_spill]] %s4916_s2  ;;  %s3485_s29 = sadd.s32 4294967295, %s4936_s28   ;;  %s4936_s28 = sphi %s5087_s28, %s45_s28   ;;  %s4932_s3 = sphi %s5085_s3, %s5792_s3   ;;  %s4928_s27 = sphi %s5083_s27, %s5791_s27   ;;  %s4924_s26 = sphi %s5081_s26, %s5790_s26   ;;  %s4920_s25 = sphi %s5079_s25, %s5794_s25   ;;  %s4916_s2 = sphi %s5077_s2, %s5793_s2  }
  0x1b   : > { %5753 = sst [smem:[#allocation38_spill]] %s4924_s26  ;;  %s3486_s0 = sadd.s32 4294967294, %s4936_s28  }
  0x1c   : > { %5754 = sst [smem:[#allocation39_spill]] %s4932_s3  ;;  %s54_s4 = sadd.s32 1, %s4932_s3 }
  0x1d   : > { %5755 = sst [smem:[#allocation40_spill]] %s4936_s28  ;;  %s516_s30 = sadd.s32 1, %s4924_s26 }
  0x1e   : > { %p55_p0 = scmp.ge.s32.totalorder %s54_s4, 3  ;;  %p526_p1 = scmp.ne.s32.totalorder %s4924_s26, %s4920_s25 }
  0x1f   : > { %p527_p2 = scmp.eq.s32.totalorder %s3485_s29, 2  ;;  %p532_p3 = scmp.ne.s32.totalorder %s4920_s25, %s4916_s2 }
  0x20   : > { %s5796_s4 = smov (%p55_p0, %s54_s4), 0  ;;  %p533_p5 = scmp.eq.s32.totalorder %s3486_s0, 2 }
  0x21   : > { %5756 = sst [smem:[#allocation41_spill]] %s5796_s4  ;;  %p5117_p4 = por %p527_p2, %p526_p1 }
  0x22   : > { %s511_s22 = ssub.s32 %s4932_s3, %s5796_s4  ;;  %p3487_p6 = scmp.ge.s32.totalorder %s4936_s28, 1 }
  0x23   : > { %p514_p7 = scmp.eq.s32.totalorder %s511_s22, 0  ;;  %p5124_p8 = por %p533_p5, %p532_p3 }
  0x24   : > { %p568_p9 = scmp.lt.s32.totalorder %s4936_s28, 4  ;;  %p5136_p11 = scmp.eq.s32.totalorder %s3485_s29, 0 }
  0x25   : > { %s5758_s23 = scalar_select %p5124_p8, 1, 0 }
  0x26   : > { %s5130_s1 = scalar_select %p514_p7, %s4924_s26, %s516_s30  }
  0x27   : > { %5759 = sst [smem:[#allocation42_spill]] %s5758_s23  ;;  %p5132_p10 = pnand %p3487_p6, %p568_p9 }
  0x28   : > { %5760 = sst [smem:[#allocation43_spill]] %s5130_s1  ;;  %s4938_s0 = smov [#allocation7]  }
  0x29   : > { %p4091_p12 = pneg %p5132_p10  ;;  %s611_s22 = sshll.u32 %s4938_s0, 4  ;;  %s612_s22 = int_to_ptr.vmem [resolvable:$true] %s611_s22 }
  0x2a   : > { %s4939_s30 = smov [#allocation10]   ;;  %s4475_s1 = scalar_lea.vmem %s612_s22, 4096 }
  0x2b   : > { %p5144_p13 = pnand %p5136_p11, %p4091_p12  ;;  %s653_s3 = sshll.u32 %s4939_s30, 4  ;;  %s654_s3 = int_to_ptr.vmem [resolvable:$true] %s653_s3 }
  0x2c   : > { %p4476_p1 = scmp.ne.s32.totalorder %s612_s22, %s4475_s1  ;;  %p4483_p5 = scmp.lt.s32.totalorder %s612_s22, %s612_s22 }
  0x2d   : > { %p5150_p0 = pneg %p5144_p13  ;;  %p4484_p6 = scmp.lt.s32.totalorder %s4475_s1, %s4475_s1 }
  0x2f   : > { %p4478_p2 = pnand %p4476_p1, %p5150_p0  ;;  %p4485_p7 = por %p4484_p6, %p4483_p5 }
  0x31   : > { %p4479_p3 = pneg %p4478_p2 }
  0x33   : > { %p4486_p9 = pnand %p4485_p7, %p4479_p3 }
  0x35   : > { %4489 = shalt.err (!%p4486_p9)
}
  0x36   : > { %s5730_s0 = smov 128   ;;  %s5732_s30 = smov 8  }
  0x37   : > { %s5765_s28 = sld [smem:[#allocation46_spill]]  ;;  %s4501_s20 = scalar_lea.vmem %s654_s3, 32 }
  0x38   : > { %p4502_p12 = scmp.ne.s32.totalorder %s654_s3, %s4501_s20  ;;  %p4509_p3 = scmp.lt.s32.totalorder %s654_s3, %s654_s3 }
  0x39   : > { %p4510_p5 = scmp.lt.s32.totalorder %s4501_s20, %s4501_s20 }
  0x3a   : > { %p4504_p1 = pnand %p4502_p12, %p5150_p0 }
  0x3b   : > { %p4511_p6 = por %p4510_p5, %p4509_p3 }
  0x3c   : > { %p4505_p2 = pneg %p4504_p1 }
  0x3d   : > { %4097 = dma.hbm_to_vmem [thread:$0]  (!%p5144_p13), %s5765_s28, 4096, %s612_s22, [#allocation8], %s5730_s0, %s5730_s0, %s5732_s30  }
  0x3e   : > { %p4512_p7 = pnand %p4511_p6, %p4505_p2 }
  0x40   : > { %4515 = shalt.err (!%p4512_p7)
}
  0x41   : > { %s5734_s1 = smov 16   ;;  %s5735_s17 = smov 1  }
  0x42   : > { %s5766_s23 = sld [smem:[#allocation49_spill]]  ;;  %s4944_s22 = smov [#allocation13]  }
  0x43   : > { %s679_s0 = sshll.u32 %s4944_s22, 4  ;;  %s680_s0 = int_to_ptr.vmem [resolvable:$true] %s679_s0 }
  0x44   : > { %s4527_s30 = scalar_lea.vmem %s680_s0, 2048  ;;  %p4535_p2 = scmp.lt.s32.totalorder %s680_s0, %s680_s0 }
  0x45   : > { %p4528_p9 = scmp.ne.s32.totalorder %s680_s0, %s4527_s30  ;;  %p4536_p3 = scmp.lt.s32.totalorder %s4527_s30, %s4527_s30 }
  0x47   : > { %p4530_p12 = pnand %p4528_p9, %p5150_p0  ;;  %p4537_p5 = por %p4536_p3, %p4535_p2 }
  0x48   : > { %4103 = dma.hbm_to_vmem [thread:$0]  (!%p5144_p13), %s5766_s23, 32, %s654_s3, [#allocation11], %s5734_s1, %s5734_s1, %s5735_s17  }
  0x49   : > { %p4531_p1 = pneg %p4530_p12 }
  0x4b   : > { %p4538_p6 = pnand %p4537_p5, %p4531_p1 }
  0x4d   : > { %4541 = shalt.err (!%p4538_p6)
}
  0x4e   : > { %s5767_s20 = smov 8   ;;  %s5768_s16 = smov 128  }
  0x4f   : > { %s5769_s7 = sld [smem:[#allocation50_spill]]  ;;  %s4945_s28 = smov [#allocation16]  }
  0x50   : > { %s705_s23 = sshll.u32 %s4945_s28, 4  ;;  %s4946_s22 = smov [#allocation19]   ;;  %s706_s23 = int_to_ptr.vmem [resolvable:$true] %s705_s23 }
  0x51   : > { %s731_s1 = sshll.u32 %s4946_s22, 4  ;;  %s4553_s30 = scalar_lea.vmem %s706_s23, 1024  ;;  %s732_s1 = int_to_ptr.vmem [resolvable:$true] %s731_s1 }
  0x52   : > { %p4554_p7 = scmp.ne.s32.totalorder %s706_s23, %s4553_s30  ;;  %p4561_p1 = scmp.lt.s32.totalorder %s706_s23, %s706_s23 }
  0x53   : > { %p4562_p2 = scmp.lt.s32.totalorder %s4553_s30, %s4553_s30 }
  0x54   : > { %p4556_p9 = pnand %p4554_p7, %p5150_p0 }
  0x55   : > { %4109 = dma.hbm_to_vmem [thread:$0]  (!%p5144_p13), %s5769_s7, 2048, %s680_s0, [#allocation14], %s5768_s16, %s5768_s16, %s5767_s20  }
  0x56   : > { %p4557_p12 = pneg %p4556_p9  ;;  %p4563_p3 = por %p4562_p2, %p4561_p1 }
  0x58   : > { %p4564_p5 = pnand %p4563_p3, %p4557_p12 }
  0x5a   : > { %4567 = shalt.err (!%p4564_p5)
}
  0x5b   : > { %s5736_s17 = smov 64   ;;  %s5738_s0 = smov 4  }
  0x5c   : > { %s5770_s9 = sld [smem:[#allocation51_spill]]  ;;  %s4579_s28 = scalar_lea.vmem %s732_s1, 1024 }
  0x5d   : > { %p4580_p6 = scmp.ne.s32.totalorder %s732_s1, %s4579_s28  ;;  %p4587_p1 = scmp.lt.s32.totalorder %s732_s1, %s732_s1 }
  0x5e   : > { %p4588_p12 = scmp.lt.s32.totalorder %s4579_s28, %s4579_s28 }
  0x5f   : > { %p4582_p7 = pnand %p4580_p6, %p5150_p0 }
  0x60   : > { %p4589_p2 = por %p4588_p12, %p4587_p1 }
  0x61   : > { %p4583_p9 = pneg %p4582_p7 }
  0x62   : > { %4115 = dma.hbm_to_vmem [thread:$0]  (!%p5144_p13), %s5770_s9, 1024, %s706_s23, [#allocation17], %s5736_s17, %s5736_s17, %s5738_s0  }
  0x63   : > { %p4590_p3 = pnand %p4589_p2, %p4583_p9 }
  0x65   : > { %4593 = shalt.err (!%p4590_p3)
}
  0x66   : > { %s5771_s11 = sld [smem:[#allocation52_spill]]  ;;  %s4949_s23 = smov [#allocation22]  }
  0x67   : > { %s757_s26 = sshll.u32 %s4949_s23, 4  ;;  %s758_s26 = int_to_ptr.vmem [resolvable:$true] %s757_s26 }
  0x68   : > { %s4605_s3 = scalar_lea.vmem %s758_s26, 2048  ;;  %p4613_p9 = scmp.lt.s32.totalorder %s758_s26, %s758_s26 }
  0x69   : > { %p4606_p5 = scmp.ne.s32.totalorder %s758_s26, %s4605_s3  ;;  %p4614_p1 = scmp.lt.s32.totalorder %s4605_s3, %s4605_s3 }
  0x6b   : > { %p4608_p6 = pnand %p4606_p5, %p5150_p0  ;;  %p4615_p12 = por %p4614_p1, %p4613_p9 }
  0x6c   : > { %4121 = dma.hbm_to_vmem [thread:$0]  (!%p5144_p13), %s5771_s11, 1024, %s732_s1, [#allocation20], %s5736_s17, %s5736_s17, %s5738_s0  }
  0x6d   : > { %p4609_p7 = pneg %p4608_p6 }
  0x6f   : > { %p4616_p2 = pnand %p4615_p12, %p4609_p7 }
  0x71   : > { %4619 = shalt.err (!%p4616_p2)
}
  0x72   : > { %4127 = dma.hbm_to_vmem [thread:$0]  (!%p5144_p13), %s5711_s13, 2048, %s758_s26, [#allocation23], %s5736_s17, %s5736_s17, %s5738_s0  }
  0x73   : > { %s4950_s22 = smov [#allocation4]   ;;  %s4951_s23 = smov [#allocation9]  }
  0x74   : > { %s594_s30 = sshll.u32 %s4950_s22, 4  ;;  %s627_s7 = sshll.u32 %s4951_s23, 4  ;;  %s595_s30 = int_to_ptr.vmem [resolvable:$true] %s594_s30  ;;  %s628_s7 = int_to_ptr.vmem [resolvable:$true] %s627_s7 }
  0x75   : > { %s4631_s9 = scalar_lea.vmem %s595_s30, 512  ;;  %p4639_p7 = scmp.lt.s32.totalorder %s595_s30, %s595_s30 }
  0x76   : > { %p4632_p3 = scmp.ne.s32.totalorder %s595_s30, %s4631_s9  ;;  %p4640_p9 = scmp.lt.s32.totalorder %s4631_s9, %s4631_s9 }
  0x78   : > { %p4634_p5 = pnand %p4632_p3, %p5150_p0  ;;  %p4641_p1 = por %p4640_p9, %p4639_p7 }
  0x7a   : > { %p4635_p6 = pneg %p4634_p5 }
  0x7c   : > { %p4642_p12 = pnand %p4641_p1, %p4635_p6 }
  0x7e   : > { %4645 = shalt.err (!%p4642_p12)
}
  0x7f   : > { %s5772_s28 = sld [smem:[#allocation45_spill]]  ;;  %s4657_s1 = scalar_lea.vmem %s628_s7, 32 }
  0x80   : > { %p4658_p2 = scmp.ne.s32.totalorder %s628_s7, %s4657_s1  ;;  %p4665_p8 = scmp.lt.s32.totalorder %s628_s7, %s628_s7 }
  0x81   : > { %p4666_p7 = scmp.lt.s32.totalorder %s4657_s1, %s4657_s1 }
  0x82   : > { %p4660_p3 = pnand %p4658_p2, %p5150_p0 }
  0x83   : > { %p4667_p6 = por %p4666_p7, %p4665_p8 }
  0x84   : > { %p4661_p5 = pneg %p4660_p3 }
  0x85   : > { %4094 = dma.hbm_to_vmem [thread:$0]  (!%p5144_p13), %s5772_s28, 512, %s595_s30, [#allocation5], %s5768_s16, %s5768_s16, %s5767_s20  }
  0x86   : > { %p4668_p9 = pnand %p4667_p6, %p4661_p5 }
  0x88   : > { %4671 = shalt.err (!%p4668_p9)
}
  0x89   : > { %s5773_s9 = smov 1   ;;  %s5774_s22 = smov 16  }
  0x8a   : > { %s5775_s3 = sld [smem:[#allocation47_spill]]  ;;  %s4952_s30 = smov [#allocation12]  }
  0x8b   : > { %s666_s28 = sshll.u32 %s4952_s30, 4  ;;  %s4953_s17 = smov [#allocation15]   ;;  %s667_s28 = int_to_ptr.vmem [resolvable:$true] %s666_s28 }
  0x8c   : > { %s692_s0 = sshll.u32 %s4953_s17, 4  ;;  %s4683_s11 = scalar_lea.vmem %s667_s28, 256  ;;  %s693_s0 = int_to_ptr.vmem [resolvable:$true] %s692_s0 }
  0x8d   : > { %p4684_p1 = scmp.ne.s32.totalorder %s667_s28, %s4683_s11  ;;  %p4691_p2 = scmp.lt.s32.totalorder %s667_s28, %s667_s28 }
  0x8e   : > { %p4692_p3 = scmp.lt.s32.totalorder %s4683_s11, %s4683_s11 }
  0x8f   : > { %p4686_p8 = pnand %p4684_p1, %p5150_p0 }
  0x90   : > { %4100 = dma.hbm_to_vmem [thread:$0]  (!%p5144_p13), %s5775_s3, 32, %s628_s7, [#allocation8], %s5774_s22, %s5774_s22, %s5773_s9  }
  0x91   : > { %p4687_p12 = pneg %p4686_p8  ;;  %p4693_p5 = por %p4692_p3, %p4691_p2 }
  0x93   : > { %p4694_p7 = pnand %p4693_p5, %p4687_p12 }
  0x95   : > { %4697 = shalt.err (!%p4694_p7)
}
  0x96   : > { %4106 = dma.hbm_to_vmem [thread:$0]  (!%p5144_p13), %s5704_s6, 256, %s667_s28, [#allocation11], %s5768_s16, %s5768_s16, %s5767_s20  }
  0x97   : > { %s4709_s17 = scalar_lea.vmem %s693_s0, 1024  ;;  %p4717_p8 = scmp.lt.s32.totalorder %s693_s0, %s693_s0 }
  0x98   : > { %p4710_p6 = scmp.ne.s32.totalorder %s693_s0, %s4709_s17  ;;  %p4718_p2 = scmp.lt.s32.totalorder %s4709_s17, %s4709_s17 }
  0x9a   : > { %p4712_p9 = pnand %p4710_p6, %p5150_p0  ;;  %p4719_p12 = por %p4718_p2, %p4717_p8 }
  0x9c   : > { %p4713_p1 = pneg %p4712_p9 }
  0x9e   : > { %p4720_p3 = pnand %p4719_p12, %p4713_p1 }
  0xa0   : > { %4723 = shalt.err (!%p4720_p3)
}
  0xa1   : > { %s5776_s11 = smov 4   ;;  %s5777_s9 = smov 64  }
  0xa2   : > { %4112 = dma.hbm_to_vmem [thread:$0]  (!%p5144_p13), %s5706_s8, 1024, %s693_s0, [#allocation14], %s5777_s9, %s5777_s9, %s5776_s11  }
  0xa3   : > { %s4954_s26 = smov [#allocation18]   ;;  %s4955_s30 = smov [#allocation21]  }
  0xa4   : > { %s718_s3 = sshll.u32 %s4954_s26, 4  ;;  %s744_s28 = sshll.u32 %s4955_s30, 4  ;;  %s719_s3 = int_to_ptr.vmem [resolvable:$true] %s718_s3  ;;  %s745_s28 = int_to_ptr.vmem [resolvable:$true] %s744_s28 }
  0xa5   : > { %s4735_s7 = scalar_lea.vmem %s719_s3, 1024  ;;  %p4743_p9 = scmp.lt.s32.totalorder %s719_s3, %s719_s3 }
  0xa6   : > { %p4736_p5 = scmp.ne.s32.totalorder %s719_s3, %s4735_s7  ;;  %p4744_p1 = scmp.lt.s32.totalorder %s4735_s7, %s4735_s7 }
  0xa8   : > { %p4738_p7 = pnand %p4736_p5, %p5150_p0  ;;  %p4745_p8 = por %p4744_p1, %p4743_p9 }
  0xaa   : > { %p4739_p6 = pneg %p4738_p7 }
  0xac   : > { %p4746_p2 = pnand %p4745_p8, %p4739_p6 }
  0xae   : > { %4749 = shalt.err (!%p4746_p2)
}
  0xaf   : > { %4118 = dma.hbm_to_vmem [thread:$0]  (!%p5144_p13), %s5708_s10, 1024, %s719_s3, [#allocation17], %s5777_s9, %s5777_s9, %s5776_s11  }
  0xb0   : > { %s4761_s17 = scalar_lea.vmem %s745_s28, 2048  ;;  %p4769_p7 = scmp.lt.s32.totalorder %s745_s28, %s745_s28 }
  0xb1   : > { %p4762_p12 = scmp.ne.s32.totalorder %s745_s28, %s4761_s17  ;;  %p4770_p9 = scmp.lt.s32.totalorder %s4761_s17, %s4761_s17 }
  0xb3   : > { %p4764_p3 = pnand %p4762_p12, %p5150_p0  ;;  %p4771_p6 = por %p4770_p9, %p4769_p7 }
  0xb5   : > { %p4765_p5 = pneg %p4764_p3 }
  0xb7   : > { %p4772_p1 = pnand %p4771_p6, %p4765_p5 }
  0xb9   : > { %4775 = shalt.err (!%p4772_p1)
}
  0xba   : > { %4124 = dma.hbm_to_vmem [thread:$0]  (!%p5144_p13), %s5710_s12, 2048, %s745_s28, [#allocation20], %s5768_s16, %s5768_s16, %s5767_s20  }
  0xbb   : > { %s4956_s11 = smov [#allocation24]  }
  0xbc   : > { %s782_s9 = sshll.u32 %s4956_s11, 4  ;;  %s783_s9 = int_to_ptr.vmem [resolvable:$true] %s782_s9 }
  0xbd   : > { %s4787_s26 = scalar_lea.vmem %s783_s9, 6144  ;;  %p4795_p3 = scmp.lt.s32.totalorder %s783_s9, %s783_s9 }
  0xbe   : > { %p4788_p8 = scmp.ne.s32.totalorder %s783_s9, %s4787_s26  ;;  %p4796_p5 = scmp.lt.s32.totalorder %s4787_s26, %s4787_s26 }
  0xc0   : > { %p4790_p2 = pnand %p4788_p8, %p5150_p0  ;;  %p4797_p7 = por %p4796_p5, %p4795_p3 }
  0xc2   : > { %p4791_p12 = pneg %p4790_p2 }
  0xc4   : > { %p4798_p9 = pnand %p4797_p7, %p4791_p12 }
  0xc6   : > { %4801 = shalt.err (!%p4798_p9)
}
  0xc7   : > { %4130 = dma.hbm_to_vmem [thread:$0]  (!%p5144_p13), %s5716_s18, 6144, %s783_s9, [#allocation23], %s5768_s16, %s5768_s16, %s5767_s20  }
  0xc8   : > { %801 = sbr.rel (%p5132_p10) target bundleno = 4183 (0x1057), region = 100 }
  0xcd   : > { %4879 = dma.done.wait (%p5136_p11), [#allocation5], 512  }
  0xce   : > { %4881 = vsyncadd (%p5136_p11), [#allocation5], 4294966784 }
  0xcf   : > { %4883 = dma.done.wait (%p5136_p11), [#allocation8], 4128  }
  0xd0   : > { %4885 = vsyncadd (%p5136_p11), [#allocation8], 4294963168 }
  0xd1   : > { %4887 = dma.done.wait (%p5136_p11), [#allocation11], 288  }
  0xd2   : > { %4889 = vsyncadd (%p5136_p11), [#allocation11], 4294967008 }
  0xd3   : > { %4891 = dma.done.wait (%p5136_p11), [#allocation14], 3072  }
  0xd4   : > { %4893 = vsyncadd (%p5136_p11), [#allocation14], 4294964224 }
  0xd5   : > { %4895 = dma.done.wait (%p5136_p11), [#allocation17], 2048  }
  0xd6   : > { %4897 = vsyncadd (%p5136_p11), [#allocation17], 4294965248 }
  0xd7   : > { %4899 = dma.done.wait (%p5136_p11), [#allocation20], 3072  }
  0xd8   : > { %4901 = vsyncadd (%p5136_p11), [#allocation20], 4294964224 }
  0xd9   : > { %4903 = dma.done.wait (%p5136_p11), [#allocation23], 8192  }
  0xda   : > { %4905 = vsyncadd (%p5136_p11), [#allocation23], 4294959104  ;;  %s5315_s16 = sand.u32 1, %s4920_s25   ;;  %p3519_p10 = scmp.ne.s32.totalorder %s4928_s27, 0 }
  0xdb   : > { %s3517_s4 = sshll.u32 %s5315_s16, 4  ;;  %s3518_s24 = sshll.u32 %s5315_s16, 5 }
  0xdc   : > { %s5319_s29 = scalar_lea.vmem [#allocation25], %s3517_s4  ;;  %s5321_s20 = scalar_lea.vmem [#allocation26], %s3518_s24 }
  0xdd   : > { %945 = sbr.rel (%p3519_p10) target bundleno = 232 (0xe8), region = 156  ;;  %s5778_s0 = sld [smem:[#allocation44_spill]] (!%p3519_p10) }
  0xde   : > { %s5779_s3 = sld [smem:[#allocation48_spill]] (!%p3519_p10) }
  0xe2   : > { %vm958_vm0 = vcmask 15360  }
  0xe3   : > { %v946_v0 = vld [vmem:[%s5778_s0] sm:$0xff]  ;;  %v947_v1 = vld [vmem:[%s5778_s0 + $0x8] sm:$0xff]  ;;  %v948_v2 = vld [vmem:[%s5778_s0 + $0x10] sm:$0xff] }
  0xe4   : > { %950 = vst [vmem:[#allocation2 + $0x10] sm:$0xff] %v946_v0  ;;  %951 = vst [vmem:[#allocation2] sm:$0xff] %v947_v1  ;;  %v949_v3 = vld [vmem:[%s5778_s0 + $0x18] sm:$0xff]  ;;  %s5780_s30 = smov %s5779_s3  ;;  %v954_v4 = vld [vmem:[%s5779_s3] sm:$0xff] }
  0xe5   : > { %952 = vst [vmem:[#allocation2 + $0x18] sm:$0xff] %v948_v2  ;;  %v955_v5 = vld [vmem:[%s5780_s30 + $0x8] sm:$0xff]  ;;  %953 = vst [vmem:[#allocation2 + $0x8] sm:$0xff] %v949_v3  ;;  %v956_v6 = vld [vmem:[%s5780_s30 + $0x10] sm:$0xff] }
  0xe6   : > { %959 = vst.msk [vmem:[#allocation3] sm:$0xff] %vm958_vm0, %v954_v4  ;;  %960 = vst.msk [vmem:[#allocation3 + $0x8] sm:$0xff] %vm958_vm0, %v955_v5  ;;  %v957_v7 = vld [vmem:[%s5780_s30 + $0x18] sm:$0xff] }
  0xe7   : > { %961 = vst.msk [vmem:[#allocation3 + $0x10] sm:$0xff] %vm958_vm0, %v956_v6  ;;  %962 = vst.msk [vmem:[#allocation3 + $0x18] sm:$0xff] %vm958_vm0, %v957_v7 }
  0xe8 PF: > { %v4240_v8 = vld [vmem:[#allocation13 + $0x74] ss:$8 sps:$4 sm:$0xff]   ;;  %v4242_v9 = vld [vmem:[#allocation13 + $0x70] ss:$8 sps:$4 sm:$0xff]   ;;  %v4957_v10 = vmov 0   ;;  %v4266_v23 = vld [vmem:[#allocation15 + $0x28] sm:$0xff]   ;;  %s2991_s9 = scalar_lea.vmem %s5717_s19, %s4928_s27 }
  0xe9   : > { %1148 = vmatprep.mubr.bf16.mxu0 %v4957_v10  ;;  %1116 = vmatprep.subr.bf16.mxu0 %v4240_v8  ;;  %v4243_v11 = vld [vmem:[#allocation13 + $0x64] ss:$8 sps:$4 sm:$0xff]   ;;  %v4245_v12 = vld [vmem:[#allocation13 + $0x60] ss:$8 sps:$4 sm:$0xff]   ;;  %v4246_v13 = vld [vmem:[#allocation13 + $0x54] ss:$8 sps:$4 sm:$0xff]  }
  0xea   : > { %1117 = vmatpush1.bf16.msra.mxu0 %v4242_v9  ;;  %v4248_v14 = vld [vmem:[#allocation13 + $0x50] ss:$8 sps:$4 sm:$0xff]   ;;  %v4249_v15 = vld [vmem:[#allocation13 + $0x44] ss:$8 sps:$4 sm:$0xff]   ;;  %v4251_v16 = vld [vmem:[#allocation13 + $0x40] ss:$8 sps:$4 sm:$0xff]  }
  0xeb   : > { %1118 = vmatprep.subr.bf16.mxu0 %v4243_v11  ;;  %v4252_v17 = vld [vmem:[#allocation13 + $0x34] ss:$8 sps:$4 sm:$0xff]   ;;  %v4254_v18 = vld [vmem:[#allocation13 + $0x30] ss:$8 sps:$4 sm:$0xff]   ;;  %v4255_v21 = vld [vmem:[#allocation13 + $0x24] ss:$8 sps:$4 sm:$0xff]  }
  0xec   : > { %v4264_v19 = vld [vmem:[#allocation15 + $0x38] sm:$0xff]   ;;  %v4265_v20 = vld [vmem:[#allocation15 + $0x30] sm:$0xff]   ;;  %v4257_v22 = vld [vmem:[#allocation13 + $0x20] ss:$8 sps:$4 sm:$0xff]   ;;  %v4958_v49 = vmov 0.0   ;;  %vm4959_vm1 = vmmov 0  }
  0xed   : > { %3813 = vmatprep.subr.bf16.mxu1 %v4264_v19  ;;  %v4258_v24 = vld [vmem:[#allocation13 + $0x14] ss:$8 sps:$4 sm:$0xff]   ;;  %v4267_v25 = vld [vmem:[#allocation15 + $0x20] sm:$0xff]   ;;  %v4260_v26 = vld [vmem:[#allocation13 + $0x10] ss:$8 sps:$4 sm:$0xff]   ;;  %vm1382_vm2 = vcmask 130048  }
  0xee   : > { %1119 = vmatpush1.bf16.msra.mxu0 %v4245_v12  ;;  %3814 = vmatpush3.bf16.msra.mxu1 %v4264_v19  ;;  %v5349_v27 = vld [vmem:[#allocation2 + $0x10] sm:$0xff]  ;;  %v5351_v28 = vld [vmem:[#allocation2] sm:$0xff]  ;;  %v1011_v30 = vld [vmem:[#allocation4 + $0x8] sm:$0xff]  ;;  %s3650_s24 = sshll.u32 %s4928_s27, 7  ;;  %s4960_s22 = smov 2   ;;  %vm983_vm3 = vcmask 15360  }
  0xef   : > { %1120 = vmatprep.subr.bf16.mxu0 %v4246_v13  ;;  %3815 = vmatprep.subr.bf16.mxu1 %v4265_v20  ;;  %v1010_v29 = vld [vmem:[#allocation4] sm:$0xff]  ;;  %v4268_v32 = vld [vmem:[#allocation15 + $0x18] sm:$0xff]   ;;  %v4263_v33 = vld [vmem:[#allocation13] ss:$8 sps:$4 sm:$0xff]   ;;  %v1015_v35 = vadd.f32 %v1011_v30, %v5351_v28  ;;  %v1173_v47 = vpack.c.bf16 %v5351_v28, %v5349_v27  ;;  %s5503_s28 = scalar_lea.vmem [#allocation24], %s3650_s24  ;;  %vm3172_vm4 = vcmask 48128  }
  0xf0   : > { %v4261_v31 = vld [vmem:[#allocation13 + $0x4] ss:$8 sps:$4 sm:$0xff]   ;;  %v1014_v34 = vadd.f32 %v1010_v29, %v5349_v27  ;;  %v4269_v36 = vld [vmem:[#allocation15 + $0x10] sm:$0xff]   ;;  %v1012_v39 = vld [vmem:[#allocation4 + $0x10] sm:$0xff]  ;;  %s3669_s26 = sshll.u32 %s4928_s27, 9  ;;  %s3222_s3 = sshll.u32 %s5321_s20, 4  ;;  %s5601_s3 = int_to_ptr.vmem [resolvable:$true] %s3222_s3 }
  0xf1   : > { %v5355_v37 = vld [vmem:[#allocation2 + $0x18] sm:$0xff]  ;;  %v5357_v38 = vld [vmem:[#allocation2 + $0x8] sm:$0xff]  ;;  %3829 = vmatprep.mubr.bf16.mxu1 %v1173_v47  ;;  %s5781_s1 = sld [smem:[#allocation53_spill]]  ;;  %s3187_s17 = scalar_lea.sflag [#allocation27], %s5315_s16 }
  0xf2   : > { %1121 = vmatpush1.bf16.msra.mxu0 %v4248_v14  ;;  %3816 = vmatpush3.bf16.msra.mxu1 %v4265_v20  ;;  %v1013_v40 = vld [vmem:[#allocation4 + $0x18] sm:$0xff]  ;;  %v1018_v41 = vpack.c.bf16 %v1015_v35, %v1014_v34  ;;  %v1016_v42 = vadd.f32 %v1012_v39, %v5355_v37  ;;  %v1174_v48 = vpack.c.bf16 %v5357_v38, %v5355_v37  ;;  %v1376_v5 = vld [vmem:[#allocation12] sm:$0xff]  ;;  %v1377_v11 = vld [vmem:[#allocation12 + $0x8] sm:$0xff]  ;;  %s4961_s23 = smov [#allocation26]  }
  0xf3   : > { %1122 = vmatprep.subr.bf16.mxu0 %v4249_v15  ;;  %3817 = vmatprep.subr.bf16.mxu1 %v4266_v23  ;;  %v1017_v43 = vadd.f32 %v1013_v40, %v5357_v38  ;;  %v4270_v45 = vld [vmem:[#allocation15 + $0x8] sm:$0xff]   ;;  %v4271_v46 = vld [vmem:[#allocation15] sm:$0xff]   ;;  %s4806_s11 = sshll.u32 %s4961_s23, 4  ;;  %s4807_s11 = int_to_ptr.vmem [resolvable:$false] %s4806_s11 }
  0xf4   : > { %p4809_p6 = scmp.lt.s32.totalorder %s5601_s3, %s4807_s11 }
  0xf5   : > { %v1019_v44 = vpack.c.bf16 %v1017_v43, %v1016_v42 }
  0xf6   : > { %1123 = vmatpush1.bf16.msra.mxu0 %v4251_v16  ;;  %3818 = vmatpush3.bf16.msra.mxu1 %v4266_v23 }
  0xf7   : > { %1124 = vmatprep.subr.bf16.mxu0 %v4252_v17  ;;  %3819 = vmatprep.subr.bf16.mxu1 %v4267_v25 }
  0xfa   : > { %1125 = vmatpush1.bf16.msra.mxu0 %v4254_v18  ;;  %3820 = vmatpush3.bf16.msra.mxu1 %v4267_v25 }
  0xfb   : > { %1126 = vmatprep.subr.bf16.mxu0 %v4255_v21  ;;  %3821 = vmatprep.subr.bf16.mxu1 %v4268_v32 }
  0xfe   : > { %1127 = vmatpush1.bf16.msra.mxu0 %v4257_v22  ;;  %3822 = vmatpush3.bf16.msra.mxu1 %v4268_v32 }
  0xff   : > { %1128 = vmatprep.subr.bf16.mxu0 %v4258_v24  ;;  %3823 = vmatprep.subr.bf16.mxu1 %v4269_v36 }
 0x102   : > { %1129 = vmatpush1.bf16.msra.mxu0 %v4260_v26  ;;  %3824 = vmatpush3.bf16.msra.mxu1 %v4269_v36 }
 0x103   : > { %1130 = vmatprep.subr.bf16.mxu0 %v4261_v31  ;;  %3825 = vmatprep.subr.bf16.mxu1 %v4270_v45 }
 0x106   : > { %1131 = vmatpush1.bf16.msra.mxu0 %v4263_v33  ;;  %3826 = vmatpush3.bf16.msra.mxu1 %v4270_v45 }
 0x107   : > { %3827 = vmatprep.subr.bf16.mxu1 %v4271_v46  ;;  %3839 = vmatprep.subr.bf16.mxu0 %v4958_v49 }
 0x109   : > { %1149 = vmatmul.mubr.bf16.vlgmr.msra.gmra.mxu0 %v1018_v41 }
 0x10a   : > { %1158 = vmatprep.mubr.bf16.mxu0 %v4957_v10  ;;  %3828 = vmatpush3.bf16.msra.mxu1 %v4271_v46 }
 0x10b   : > { %3833 = vmatprep.subr.bf16.mxu1 %v4958_v49 }
 0x10d   : > { %3830 = vmatmul.mubr.bf16.vlgmr.msra.gmra.mxu1 %v1174_v48 }
 0x10e   : > { %3835 = vmatprep.mubr.msk.bf16.mxu1 %vm4959_vm1, %v4958_v49 }
 0x111   : > { %1159 = vmatmul.mubr.bf16.gmra.mxu0 %v1019_v44 }
 0x112   : > { %3841 = vmatprep.mubr.msk.bf16.mxu0 %vm4959_vm1, %v4958_v49 }
 0x1c9   : > { %v1150_v50 = vpop.f32.mrf.mxu0 }
 0x1cb   : > { %v1152_v51 = vpop.f32.mrf.mxu0 }
 0x1cd   : > { %v1154_v52 = vpop.f32.mrf.mxu0  ;;  %v3831_v62 = vpop.f32.mrf.mxu1 }
 0x1ce   : > { %v1169_v58 = vpack.c.bf16 %v1154_v52, %v1150_v50  ;;  %v4272_v52 = vld [vmem:[#allocation16 + $0x38] sm:$0xff]  }
 0x1cf   : > { %v1156_v53 = vpop.f32.mrf.mxu0  ;;  %v1273_v63 = vpop.f32.mrf.mxu1 }
 0x1d0   : > { %v1171_v54 = vpack.c.bf16 %v1156_v53, %v1152_v51 }
 0x1d1   : > { %v1160_v55 = vpop.f32.mrf.mxu0  ;;  %v3832_v0 = vpop.f32.mrf.mxu1 }
 0x1d2   : > { %3834 = vmatpush3.bf16.xpose.msra.mxu1 %v1171_v54  ;;  %v1289_v1 = vpack.c.bf16 %v3832_v0, %v3831_v62  ;;  %v4273_v62 = vld [vmem:[#allocation16 + $0x30] sm:$0xff]   ;;  %v4274_v0 = vld [vmem:[#allocation16 + $0x28] sm:$0xff]  }
 0x1d3   : > { %v1162_v56 = vpop.f32.mrf.mxu0  ;;  %3845 = vmatprep.subr.bf16.mxu1 %v4958_v49  ;;  %v1276_v2 = vpop.f32.mrf.mxu1 }
 0x1d4   : > { %v1288_v3 = vpack.c.bf16 %v1276_v2, %v1273_v63 }
 0x1d5   : > { %v1164_v57 = vpop.f32.mrf.mxu0 }
 0x1d6   : > { %v1170_v61 = vpack.c.bf16 %v1164_v57, %v1160_v55 }
 0x1d7   : > { %v1166_v59 = vpop.f32.mrf.mxu0 }
 0x1d8   : > { %v1172_v60 = vpack.c.bf16 %v1166_v59, %v1162_v56 }
 0x1d9   : > { %3836 = vmatmul.mubr.bf16.vlgmr.msra.gmra.mxu1 %v1169_v58 }
 0x1da   : > { %3840 = vmatpush3.bf16.xpose.msra.mxu0 %v1172_v60  ;;  %3847 = vmatprep.mubr.msk.bf16.mxu1 %vm4959_vm1, %v4958_v49 }
 0x1db   : > { %3851 = vmatprep.subr.bf16.mxu0 %v4958_v49  ;;  %3846 = vmatpush3.bf16.msra.mxu1 %v1288_v3 }
 0x1dc   : > { %3857 = vmatprep.subr.bf16.mxu1 %v4272_v52 }
 0x1e1   : > { %3842 = vmatmul.mubr.bf16.vlgmr.msra.gmra.mxu0 %v1170_v61 }
 0x1e2   : > { %3853 = vmatprep.mubr.msk.bf16.mxu0 %vm4959_vm1, %v4958_v49  ;;  %3852 = vmatpush3.bf16.msra.mxu0 %v1289_v1 }
 0x299   : > { %v1324_v4 = vpop.f32.mrf.mxu1 }
 0x29a   : > { %v1372_v6 = vmul.f32 0.088388346, %v1324_v4 }
 0x29b   : > { %v3837_v7 = vpop.f32.mrf.mxu1 }
 0x29c   : > { %v1378_v8 = vadd.f32 %v1376_v5, %v1372_v6  ;;  %v4276_v6 = vld [vmem:[#allocation16 + $0x18] sm:$0xff]   ;;  %v4277_v7 = vld [vmem:[#allocation16 + $0x10] sm:$0xff]  }
 0x29d   : > { %v1327_v9 = vpop.f32.mrf.mxu1 }
 0x29e   : > { %v1373_v12 = vmul.f32 0.088388346, %v1327_v9  ;;  %v1383_v13 = vsel %vm1382_vm2, %v1378_v8, -inf  ;;  %v4279_v9 = vld [vmem:[#allocation16] sm:$0xff]  }
 0x29f   : > { %1384 = vmax.xlane.f32.xlu0 %v1383_v13  ;;  %v3838_v14 = vpop.f32.mrf.mxu1 }
 0x2a0   : > { %v1379_v15 = vadd.f32 %v1377_v11, %v1373_v12 }
 0x2a1   : > { %v1365_v16 = vpop.f32.mrf.mxu0 }
 0x2a2   : > { %v1374_v17 = vmul.f32 0.088388346, %v1365_v16  ;;  %v1386_v18 = vsel %vm1382_vm2, %v1379_v15, -inf }
 0x2a3   : > { %1387 = vmax.xlane.f32.xlu0 %v1386_v18  ;;  %v3843_v19 = vpop.f32.mrf.mxu0 }
 0x2a4   : > { %v1380_v20 = vadd.f32 %v1376_v5, %v1374_v17  ;;  %v4275_v5 = vld [vmem:[#allocation16 + $0x20] sm:$0xff]  }
 0x2a5   : > { %v1368_v21 = vpop.f32.mrf.mxu0 }
 0x2a6   : > { %v1375_v22 = vmul.f32 0.088388346, %v1368_v21  ;;  %v1389_v23 = vsel %vm1382_vm2, %v1380_v20, -inf }
 0x2a7   : > { %1390 = vmax.xlane.f32.xlu1 %v1389_v23  ;;  %v3844_v24 = vpop.f32.mrf.mxu0 }
 0x2a8   : > { %v1381_v25 = vadd.f32 %v1377_v11, %v1375_v22 }
 0x2aa   : > { %v1392_v26 = vsel %vm1382_vm2, %v1381_v25, -inf }
 0x2ab   : > { %1393 = vmax.xlane.f32.xlu1 %v1392_v26 }
 0x328   : > { %v1385_v29 = vpop.xlane.xlu0 %1384 }
 0x329   : > { %v1395_v30 = vsub.f32 %v1378_v8, %v1385_v29  ;;  %v4278_v8 = vld [vmem:[#allocation16 + $0x8] sm:$0xff]  }
 0x32b   : > { %v1399_v31 = vmul.f32 1.442695, %v1395_v30 }
 0x32c   : > { %v1388_v32 = vpop.xlane.xlu0 %1387 }
 0x32d   : > { %4368 = vpow2.f32 %v1399_v31  ;;  %v1396_v33 = vsub.f32 %v1379_v15, %v1388_v32 }
 0x32f   : > { %v1401_v34 = vmul.f32 1.442695, %v1396_v33 }
 0x330   : > { %v1391_v35 = vpop.xlane.xlu1 %1390 }
 0x331   : > { %4370 = vpow2.f32 %v1401_v34  ;;  %v1397_v36 = vsub.f32 %v1380_v20, %v1391_v35 }
 0x333   : > { %v1403_v39 = vmul.f32 1.442695, %v1397_v36 }
 0x334   : > { %v1394_v40 = vpop.xlane.xlu1 %1393 }
 0x335   : > { %4372 = vpow2.f32 %v1403_v39  ;;  %v1398_v41 = vsub.f32 %v1381_v25, %v1394_v40 }
 0x337   : > { %v1405_v42 = vmul.f32 1.442695, %v1398_v41 }
 0x339   : > { %4374 = vpow2.f32 %v1405_v42 }
 0x33a   : > { %v4369_v43 = vpop.eup %4368 }
 0x33b   : > { %v1407_v44 = vsel %vm1382_vm2, %v4369_v43, 0.0 }
 0x33c   : > { %1408 = vadd.xlane.f32.xlu0 %v1407_v44 }
 0x33e   : > { %v4371_v45 = vpop.eup %4370 }
 0x33f   : > { %v1410_v46 = vsel %vm1382_vm2, %v4371_v45, 0.0 }
 0x340   : > { %1411 = vadd.xlane.f32.xlu1 %v1410_v46  ;;  %v4281_v46 = vld [vmem:[#allocation18 + $0x30] sm:$0xff]  }
 0x342   : > { %v4373_v47 = vpop.eup %4372 }
 0x343   : > { %v1413_v48 = vsel %vm1382_vm2, %v4373_v47, 0.0 }
 0x344   : > { %1414 = vadd.xlane.f32.xlu0 %v1413_v48  ;;  %v4283_v48 = vld [vmem:[#allocation18 + $0x20] sm:$0xff]  }
 0x346   : > { %v4375_v50 = vpop.eup %4374 }
 0x347   : > { %v1416_v51 = vsel %vm1382_vm2, %v4375_v50, 0.0 }
 0x348   : > { %1417 = vadd.xlane.f32.xlu1 %v1416_v51  ;;  %v4285_v51 = vld [vmem:[#allocation18 + $0x10] sm:$0xff]  }
 0x3c5   : > { %v1409_v53 = vpop.xlane.xlu0 %1408 }
 0x3c6   : > { %4376 = vrcp.f32 %v1409_v53  ;;  %v4287_v53 = vld [vmem:[#allocation18] sm:$0xff]  }
 0x3c9   : > { %v1412_v54 = vpop.xlane.xlu1 %1411 }
 0x3ca   : > { %4378 = vrcp.f32 %v1412_v54  ;;  %v4289_v54 = vld [vmem:[#allocation7 + $0x70] ss:$8 sps:$4 sm:$0xff]  }
 0x3cd   : > { %v1415_v55 = vpop.xlane.xlu0 %1414 }
 0x3ce   : > { %4380 = vrcp.f32 %v1415_v55  ;;  %v4291_v55 = vld [vmem:[#allocation7 + $0x60] ss:$8 sps:$4 sm:$0xff]  }
 0x3d1   : > { %v1418_v56 = vpop.xlane.xlu1 %1417 }
 0x3d2   : > { %4382 = vrcp.f32 %v1418_v56  ;;  %v4293_v56 = vld [vmem:[#allocation7 + $0x50] ss:$8 sps:$4 sm:$0xff]  }
 0x3d3   : > { %v4377_v57 = vpop.eup %4376 }
 0x3d4   : > { %v1423_v59 = vmul.f32 %v4377_v57, %v4369_v43  ;;  %v4295_v57 = vld [vmem:[#allocation7 + $0x40] ss:$8 sps:$4 sm:$0xff]  }
 0x3d7   : > { %v4379_v58 = vpop.eup %4378 }
 0x3d8   : > { %v1424_v60 = vmul.f32 %v4379_v58, %v4371_v45  ;;  %v4280_v45 = vld [vmem:[#allocation18 + $0x38] sm:$0xff]  }
 0x3d9   : > { %3877 = vmatprep.subr.bf16.mxu0 %v4280_v45  ;;  %v4297_v58 = vld [vmem:[#allocation7 + $0x30] ss:$8 sps:$4 sm:$0xff]  }
 0x3da   : > { %v1427_v61 = vpack.c.bf16 %v1424_v60, %v1423_v59  ;;  %v4299_v59 = vld [vmem:[#allocation7 + $0x20] ss:$8 sps:$4 sm:$0xff]   ;;  %v4301_v60 = vld [vmem:[#allocation7 + $0x10] ss:$8 sps:$4 sm:$0xff]  }
 0x3db   : > { %v4381_v63 = vpop.eup %4380 }
 0x3dc   : > { %3848 = vmatmul.mubr.msk.bf16.vlgmr.msra.gmra.mxu1 %vm1382_vm2, %v1427_v61  ;;  %v1425_v2 = vmul.f32 %v4381_v63, %v4373_v47  ;;  %v4282_v47 = vld [vmem:[#allocation18 + $0x28] sm:$0xff]  }
 0x3dd   : > { %3858 = vmatpush3.bf16.msra.mxu1 %v4272_v52  ;;  %v4286_v52 = vld [vmem:[#allocation18 + $0x8] sm:$0xff]  }
 0x3de   : > { %3859 = vmatprep.subr.bf16.mxu1 %v4273_v62 }
 0x3df   : > { %v4383_v1 = vpop.eup %4382 }
 0x3e0   : > { %v1426_v3 = vmul.f32 %v4383_v1, %v4375_v50  ;;  %v4284_v50 = vld [vmem:[#allocation18 + $0x18] sm:$0xff]  }
 0x3e1   : > { %3860 = vmatpush3.bf16.msra.mxu1 %v4273_v62 }
 0x3e2   : > { %v1428_v4 = vpack.c.bf16 %v1426_v3, %v1425_v2  ;;  %3861 = vmatprep.subr.bf16.mxu1 %v4274_v0 }
 0x3e4   : > { %3854 = vmatmul.mubr.msk.bf16.vlgmr.msra.gmra.mxu0 %vm1382_vm2, %v1428_v4 }
 0x3e5   : > { %3862 = vmatpush3.bf16.msra.mxu1 %v4274_v0  ;;  %3878 = vmatpush3.bf16.msra.mxu0 %v4280_v45 }
 0x3e6   : > { %3863 = vmatprep.subr.bf16.mxu1 %v4275_v5  ;;  %3879 = vmatprep.subr.bf16.mxu0 %v4281_v46 }
 0x3e9   : > { %3864 = vmatpush3.bf16.msra.mxu1 %v4275_v5  ;;  %3880 = vmatpush3.bf16.msra.mxu0 %v4281_v46 }
 0x3ea   : > { %3865 = vmatprep.subr.bf16.mxu1 %v4276_v6  ;;  %3881 = vmatprep.subr.bf16.mxu0 %v4282_v47 }
 0x3ed   : > { %3866 = vmatpush3.bf16.msra.mxu1 %v4276_v6  ;;  %3882 = vmatpush3.bf16.msra.mxu0 %v4282_v47 }
 0x3ee   : > { %3867 = vmatprep.subr.bf16.mxu1 %v4277_v7  ;;  %3883 = vmatprep.subr.bf16.mxu0 %v4283_v48 }
 0x3f1   : > { %3868 = vmatpush3.bf16.msra.mxu1 %v4277_v7  ;;  %3884 = vmatpush3.bf16.msra.mxu0 %v4283_v48  ;;  %v3582_v48 = vld [vmem:[#allocation9] ss:$0 sm:$0xff] }
 0x3f2   : > { %3869 = vmatprep.subr.bf16.mxu1 %v4278_v8  ;;  %3885 = vmatprep.subr.bf16.mxu0 %v4284_v50 }
 0x3f5   : > { %3870 = vmatpush3.bf16.msra.mxu1 %v4278_v8  ;;  %3886 = vmatpush3.bf16.msra.mxu0 %v4284_v50 }
 0x3f6   : > { %3871 = vmatprep.subr.bf16.mxu1 %v4279_v9  ;;  %3887 = vmatprep.subr.bf16.mxu0 %v4285_v51 }
 0x3f9   : > { %3872 = vmatpush3.bf16.msra.mxu1 %v4279_v9  ;;  %3888 = vmatpush3.bf16.msra.mxu0 %v4285_v51 }
 0x3fa   : > { %3897 = vmatprep.subr.bf16.mxu1 %v4958_v49  ;;  %3889 = vmatprep.subr.bf16.mxu0 %v4286_v52 }
 0x3fd   : > { %3890 = vmatpush3.bf16.msra.mxu0 %v4286_v52 }
 0x3fe   : > { %3891 = vmatprep.subr.bf16.mxu0 %v4287_v53 }
 0x401   : > { %3892 = vmatpush3.bf16.msra.mxu0 %v4287_v53 }
 0x402   : > { %3917 = vmatprep.subr.bf16.mxu0 %v4958_v49 }
 0x49c   : > { %v1466_v11 = vpop.f32.mrf.mxu1 }
 0x49e   : > { %v3849_v12 = vpop.f32.mrf.mxu1 }
 0x49f   : > { %v3556_v12 = vld [vmem:[%s5712_s14] ss:$0 sm:$0xff] }
 0x4a0   : > { %v1469_v13 = vpop.f32.mrf.mxu1 }
 0x4a1   : > { %v1517_v14 = vpack.c.bf16 %v1469_v13, %v1466_v11 }
 0x4a2   : > { %v3850_v15 = vpop.f32.mrf.mxu1 }
 0x4a3   : > { %3873 = vmatprep.mubr.bf16.mxu1 %v1517_v14 }
 0x4a4   : > { %v1510_v16 = vpop.f32.mrf.mxu0 }
 0x4a6   : > { %v3855_v17 = vpop.f32.mrf.mxu0 }
 0x4a8   : > { %v1513_v18 = vpop.f32.mrf.mxu0 }
 0x4a9   : > { %v1518_v19 = vpack.c.bf16 %v1513_v18, %v1510_v16  ;;  %v3557_v18 = vld [vmem:[%s5713_s15] ss:$0 sm:$0xff] }
 0x4aa   : > { %v3856_v20 = vpop.f32.mrf.mxu0 }
 0x4ab   : > { %3874 = vmatmul.mubr.bf16.vlgmr.msra.gmra.mxu1 %v1518_v19 }
 0x4ac   : > { %3913 = vmatprep.mubr.msk.bf16.mxu1 %vm4959_vm1, %v4958_v49  ;;  %3898 = vmatpush3.bf16.xpose.msra.mxu1 %v4289_v54 }
 0x4ad   : > { %3899 = vmatprep.subr.bf16.mxu1 %v4958_v49 }
 0x4b4   : > { %3900 = vmatpush3.bf16.xpose.msra.mxu1 %v4291_v55 }
 0x4b5   : > { %3901 = vmatprep.subr.bf16.mxu1 %v4958_v49 }
 0x4bc   : > { %3902 = vmatpush3.bf16.xpose.msra.mxu1 %v4293_v56 }
 0x4bd   : > { %3903 = vmatprep.subr.bf16.mxu1 %v4958_v49 }
 0x4c4   : > { %3904 = vmatpush3.bf16.xpose.msra.mxu1 %v4295_v57  ;;  %v3583_v57 = vld [vmem:[#allocation9 + $0x1] ss:$0 sm:$0xff] }
 0x4c5   : > { %3905 = vmatprep.subr.bf16.mxu1 %v4958_v49 }
 0x4cc   : > { %3906 = vmatpush3.bf16.xpose.msra.mxu1 %v4297_v58 }
 0x4cd   : > { %3907 = vmatprep.subr.bf16.mxu1 %v4958_v49 }
 0x4d4   : > { %3908 = vmatpush3.bf16.xpose.msra.mxu1 %v4299_v59 }
 0x4d5   : > { %3909 = vmatprep.subr.bf16.mxu1 %v4958_v49 }
 0x4dc   : > { %3910 = vmatpush3.bf16.xpose.msra.mxu1 %v4301_v60 }
 0x4dd   : > { %3911 = vmatprep.subr.bf16.mxu1 %v4958_v49 }
 0x56b   : > { %v3875_v21 = vpop.f32.mrf.mxu1 }
 0x56c   : > { %v1634_v26 = vadd.f32 %v3875_v21, %v5355_v37 }
 0x56d   : > { %v1617_v22 = vpop.f32.mrf.mxu1 }
 0x56e   : > { %v1632_v23 = vadd.f32 %v1617_v22, %v5349_v27 }
 0x56f   : > { %v3876_v24 = vpop.f32.mrf.mxu1 }
 0x570   : > { %1636 = vadd.xlane.f32.xlu0 %v1632_v23  ;;  %v1635_v30 = vadd.f32 %v3876_v24, %v5357_v38 }
 0x571   : > { %v1620_v25 = vpop.f32.mrf.mxu1 }
 0x572   : > { %v1633_v29 = vadd.f32 %v1620_v25, %v5351_v28 }
 0x574   : > { %1640 = vadd.xlane.f32.xlu0 %v1634_v26  ;;  %1638 = vadd.xlane.f32.xlu1 %v1633_v29 }
 0x578   : > { %1642 = vadd.xlane.f32.xlu1 %v1635_v30 }
 0x5f9   : > { %v1637_v31 = vpop.xlane.xlu0 %1636 }
 0x5fa   : > { %v1645_v32 = vmul.f32 0.0078125, %v1637_v31  ;;  %v4288_v31 = vld [vmem:[#allocation7 + $0xf0] ss:$8 sps:$4 sm:$0xff]  }
 0x5fc   : > { %v5395_v33 = vsub.f32 %v1632_v23, %v1645_v32 }
 0x5fd   : > { %v1641_v34 = vpop.xlane.xlu0 %1640  ;;  %v1639_v35 = vpop.xlane.xlu1 %1638 }
 0x5fe   : > { %v1647_v36 = vmul.f32 0.0078125, %v1641_v34  ;;  %v1646_v27 = vmul.f32 0.0078125, %v1639_v35  ;;  %v1653_v39 = vmul.f32 %v5395_v33, %v5395_v33  ;;  %v4292_v34 = vld [vmem:[#allocation7 + $0xd0] ss:$8 sps:$4 sm:$0xff]   ;;  %v4294_v35 = vld [vmem:[#allocation7 + $0xc0] ss:$8 sps:$4 sm:$0xff]  }
 0x600   : > { %v5399_v40 = vsub.f32 %v1634_v26, %v1647_v36  ;;  %v5401_v37 = vsub.f32 %v1633_v29, %v1646_v27  ;;  %1657 = vadd.xlane.f32.xlu0 %v1653_v39  ;;  %v4296_v36 = vld [vmem:[#allocation7 + $0xb0] ss:$8 sps:$4 sm:$0xff]   ;;  %v4298_v27 = vld [vmem:[#allocation7 + $0xa0] ss:$8 sps:$4 sm:$0xff]  }
 0x601   : > { %v1643_v28 = vpop.xlane.xlu1 %1642  ;;  %v4300_v39 = vld [vmem:[#allocation7 + $0x90] ss:$8 sps:$4 sm:$0xff]  }
 0x602   : > { %v1648_v41 = vmul.f32 0.0078125, %v1643_v28  ;;  %v1655_v38 = vmul.f32 %v5399_v40, %v5399_v40  ;;  %v1654_v42 = vmul.f32 %v5401_v37, %v5401_v37 }
 0x604   : > { %v5407_v43 = vsub.f32 %v1635_v30, %v1648_v41  ;;  %1661 = vadd.xlane.f32.xlu0 %v1655_v38  ;;  %1659 = vadd.xlane.f32.xlu1 %v1654_v42 }
 0x606   : > { %v1656_v44 = vmul.f32 %v5407_v43, %v5407_v43 }
 0x608   : > { %1663 = vadd.xlane.f32.xlu1 %v1656_v44 }
 0x689   : > { %v1658_v61 = vpop.xlane.xlu0 %1657 }
 0x68a   : > { %v1665_v62 = vmul.f32 0.0078125, %v1658_v61 }
 0x68c   : > { %v1669_v63 = vadd.f32 1e-05, %v1665_v62 }
 0x68d   : > { %v1662_v0 = vpop.xlane.xlu0 %1661  ;;  %v1660_v1 = vpop.xlane.xlu1 %1659 }
 0x68e   : > { %4384 = vrsqrt.f32 %v1669_v63  ;;  %v1667_v2 = vmul.f32 0.0078125, %v1662_v0  ;;  %v1666_v3 = vmul.f32 0.0078125, %v1660_v1  ;;  %v4304_v0 = vld [vmem:[#allocation7 + $0x74] ss:$8 sps:$4 sm:$0xff]  }
 0x68f   : > { %v4306_v1 = vld [vmem:[#allocation7 + $0xf4] ss:$8 sps:$4 sm:$0xff]  }
 0x690   : > { %v1671_v4 = vadd.f32 1e-05, %v1667_v2  ;;  %v1670_v5 = vadd.f32 1e-05, %v1666_v3  ;;  %v4305_v2 = vld [vmem:[#allocation7 + $0x64] ss:$8 sps:$4 sm:$0xff]  }
 0x691   : > { %v1664_v6 = vpop.xlane.xlu1 %1663  ;;  %v4308_v3 = vld [vmem:[#allocation7 + $0xe4] ss:$8 sps:$4 sm:$0xff]  }
 0x692   : > { %4386 = vrsqrt.f32 %v1671_v4  ;;  %v1668_v7 = vmul.f32 0.0078125, %v1664_v6  ;;  %v4307_v4 = vld [vmem:[#allocation7 + $0x54] ss:$8 sps:$4 sm:$0xff]  }
 0x693   : > { %4388 = vrsqrt.f32 %v1670_v5 }
 0x694   : > { %v1672_v8 = vadd.f32 1e-05, %v1668_v7 }
 0x696   : > { %4390 = vrsqrt.f32 %v1672_v8 }
 0x69b   : > { %v4385_v9 = vpop.eup %4384 }
 0x69c   : > { %v1677_v11 = vmul.f32 %v4385_v9, %v5395_v33  ;;  %v4290_v33 = vld [vmem:[#allocation7 + $0xe0] ss:$8 sps:$4 sm:$0xff]  }
 0x69e   : > { %v1686_v17 = vmul.f32 %v3556_v12, %v1677_v11 }
 0x69f   : > { %v4387_v13 = vpop.eup %4386 }
 0x6a0   : > { %v4389_v14 = vpop.eup %4388  ;;  %v1679_v15 = vmul.f32 %v4387_v13, %v5399_v40  ;;  %v5429_v23 = vadd.f32 %v3557_v18, %v1686_v17  ;;  %v4302_v40 = vld [vmem:[#allocation7 + $0x80] ss:$8 sps:$4 sm:$0xff]  }
 0x6a1   : > { %v1678_v16 = vmul.f32 %v4389_v14, %v5401_v37  ;;  %v4303_v37 = vld [vmem:[#allocation7] ss:$8 sps:$4 sm:$0xff]  }
 0x6a2   : > { %v1688_v22 = vmul.f32 %v3556_v12, %v1679_v15  ;;  %3912 = vmatpush3.bf16.xpose.msra.mxu1 %v4303_v37 }
 0x6a3   : > { %v4391_v19 = vpop.eup %4390  ;;  %v1687_v20 = vmul.f32 %v3556_v12, %v1678_v16  ;;  %3937 = vmatprep.subr.bf16.mxu1 %v4958_v49 }
 0x6a4   : > { %v1680_v21 = vmul.f32 %v4391_v19, %v5407_v43  ;;  %v5435_v29 = vadd.f32 %v3557_v18, %v1688_v22  ;;  %v4309_v22 = vld [vmem:[#allocation7 + $0x44] ss:$8 sps:$4 sm:$0xff]  }
 0x6a5   : > { %v5431_v24 = vadd.f32 %v3557_v18, %v1687_v20 }
 0x6a6   : > { %v1689_v25 = vmul.f32 %v3556_v12, %v1680_v21 }
 0x6a7   : > { %v1699_v26 = vpack.c.bf16 %v5431_v24, %v5429_v23 }
 0x6a8   : > { %v5437_v30 = vadd.f32 %v3557_v18, %v1689_v25  ;;  %v4310_v25 = vld [vmem:[#allocation7 + $0xd4] ss:$8 sps:$4 sm:$0xff]  }
 0x6a9   : > { %3893 = vmatprep.mubr.bf16.mxu0 %v1699_v26  ;;  %v4311_v26 = vld [vmem:[#allocation7 + $0x34] ss:$8 sps:$4 sm:$0xff]  }
 0x6aa   : > { %v1700_v32 = vpack.c.bf16 %v5437_v30, %v5435_v29 }
 0x6ac   : > { %3894 = vmatmul.mubr.bf16.vlgmr.msra.gmra.mxu0 %v1700_v32  ;;  %v4313_v32 = vld [vmem:[#allocation7 + $0x24] ss:$8 sps:$4 sm:$0xff]  }
 0x6ad   : > { %3918 = vmatpush3.bf16.xpose.msra.mxu0 %v4288_v31  ;;  %3933 = vmatprep.mubr.msk.bf16.mxu0 %vm4959_vm1, %v4958_v49  ;;  %v4312_v31 = vld [vmem:[#allocation7 + $0xc4] ss:$8 sps:$4 sm:$0xff]  }
 0x6ae   : > { %3919 = vmatprep.subr.bf16.mxu0 %v4958_v49 }
 0x6b5   : > { %3920 = vmatpush3.bf16.xpose.msra.mxu0 %v4290_v33  ;;  %v4314_v33 = vld [vmem:[#allocation7 + $0xb4] ss:$8 sps:$4 sm:$0xff]  }
 0x6b6   : > { %3921 = vmatprep.subr.bf16.mxu0 %v4958_v49 }
 0x6bd   : > { %3922 = vmatpush3.bf16.xpose.msra.mxu0 %v4292_v34  ;;  %v4315_v34 = vld [vmem:[#allocation7 + $0x14] ss:$8 sps:$4 sm:$0xff]  }
 0x6be   : > { %3923 = vmatprep.subr.bf16.mxu0 %v4958_v49 }
 0x6c5   : > { %3924 = vmatpush3.bf16.xpose.msra.mxu0 %v4294_v35  ;;  %v4316_v35 = vld [vmem:[#allocation7 + $0xa4] ss:$8 sps:$4 sm:$0xff]  }
 0x6c6   : > { %3925 = vmatprep.subr.bf16.mxu0 %v4958_v49 }
 0x6cd   : > { %3926 = vmatpush3.bf16.xpose.msra.mxu0 %v4296_v36  ;;  %v4317_v36 = vld [vmem:[#allocation7 + $0x4] ss:$8 sps:$4 sm:$0xff]  }
 0x6ce   : > { %3927 = vmatprep.subr.bf16.mxu0 %v4958_v49 }
 0x6d5   : > { %3928 = vmatpush3.bf16.xpose.msra.mxu0 %v4298_v27  ;;  %v4318_v27 = vld [vmem:[#allocation7 + $0x94] ss:$8 sps:$4 sm:$0xff]  }
 0x6d6   : > { %3929 = vmatprep.subr.bf16.mxu0 %v4958_v49 }
 0x6dd   : > { %3930 = vmatpush3.bf16.xpose.msra.mxu0 %v4300_v39  ;;  %v4319_v39 = vld [vmem:[#allocation7 + $0x84] ss:$8 sps:$4 sm:$0xff]  }
 0x6de   : > { %3931 = vmatprep.subr.bf16.mxu0 %v4958_v49 }
 0x6e5   : > { %3932 = vmatpush3.bf16.xpose.msra.mxu0 %v4302_v40  ;;  %v4320_v40 = vld [vmem:[#allocation19 + $0x38] sm:$0xff]  }
 0x6e6   : > { %3957 = vmatprep.subr.bf16.mxu0 %v4958_v49 }
 0x76c   : > { %v3895_v28 = vpop.f32.mrf.mxu0 }
 0x76e   : > { %v1799_v41 = vpop.f32.mrf.mxu0 }
 0x770   : > { %v3896_v38 = vpop.f32.mrf.mxu0 }
 0x771   : > { %v1815_v42 = vpack.c.bf16 %v3896_v38, %v3895_v28 }
 0x772   : > { %v1802_v43 = vpop.f32.mrf.mxu0 }
 0x773   : > { %v1814_v44 = vpack.c.bf16 %v1802_v43, %v1799_v41  ;;  %3934 = vmatmul.mubr.bf16.vlgmr.msra.gmra.mxu0 %v1815_v42 }
 0x774   : > { %3973 = vmatprep.mubr.msk.bf16.mxu0 %vm4959_vm1, %v4958_v49  ;;  %3958 = vmatpush3.bf16.msra.mxu0 %v4306_v1 }
 0x775   : > { %3914 = vmatmul.mubr.bf16.vlgmr.msra.gmra.mxu1 %v1814_v44  ;;  %3959 = vmatprep.subr.bf16.mxu0 %v4958_v49 }
 0x776   : > { %3953 = vmatprep.mubr.msk.bf16.mxu1 %vm4959_vm1, %v4958_v49  ;;  %3938 = vmatpush3.bf16.msra.mxu1 %v4304_v0 }
 0x777   : > { %3939 = vmatprep.subr.bf16.mxu1 %v4958_v49 }
 0x778   : > { %3960 = vmatpush3.bf16.msra.mxu0 %v4308_v3 }
 0x779   : > { %3961 = vmatprep.subr.bf16.mxu0 %v4958_v49 }
 0x77a   : > { %3940 = vmatpush3.bf16.msra.mxu1 %v4305_v2 }
 0x77b   : > { %3941 = vmatprep.subr.bf16.mxu1 %v4958_v49 }
 0x77c   : > { %3962 = vmatpush3.bf16.msra.mxu0 %v4310_v25 }
 0x77d   : > { %3963 = vmatprep.subr.bf16.mxu0 %v4958_v49 }
 0x77e   : > { %3942 = vmatpush3.bf16.msra.mxu1 %v4307_v4 }
 0x77f   : > { %3943 = vmatprep.subr.bf16.mxu1 %v4958_v49 }
 0x780   : > { %3964 = vmatpush3.bf16.msra.mxu0 %v4312_v31 }
 0x781   : > { %3965 = vmatprep.subr.bf16.mxu0 %v4958_v49 }
 0x782   : > { %3944 = vmatpush3.bf16.msra.mxu1 %v4309_v22 }
 0x783   : > { %3945 = vmatprep.subr.bf16.mxu1 %v4958_v49 }
 0x784   : > { %3966 = vmatpush3.bf16.msra.mxu0 %v4314_v33 }
 0x785   : > { %3967 = vmatprep.subr.bf16.mxu0 %v4958_v49 }
 0x786   : > { %3946 = vmatpush3.bf16.msra.mxu1 %v4311_v26 }
 0x787   : > { %3947 = vmatprep.subr.bf16.mxu1 %v4958_v49 }
 0x788   : > { %3968 = vmatpush3.bf16.msra.mxu0 %v4316_v35  ;;  %v4331_v35 = vld [vmem:[#allocation21 + $0x60] ss:$8 sps:$4 sm:$0xff]  }
 0x789   : > { %3969 = vmatprep.subr.bf16.mxu0 %v4958_v49 }
 0x78a   : > { %3948 = vmatpush3.bf16.msra.mxu1 %v4313_v32 }
 0x78b   : > { %3949 = vmatprep.subr.bf16.mxu1 %v4958_v49 }
 0x78c   : > { %3970 = vmatpush3.bf16.msra.mxu0 %v4318_v27  ;;  %v4334_v27 = vld [vmem:[#allocation21 + $0x50] ss:$8 sps:$4 sm:$0xff]  }
 0x78d   : > { %3971 = vmatprep.subr.bf16.mxu0 %v4958_v49 }
 0x78e   : > { %3950 = vmatpush3.bf16.msra.mxu1 %v4315_v34  ;;  %v4333_v34 = vld [vmem:[#allocation21 + $0x64] ss:$8 sps:$4 sm:$0xff]  }
 0x78f   : > { %3951 = vmatprep.subr.bf16.mxu1 %v4958_v49 }
 0x790   : > { %3972 = vmatpush3.bf16.msra.mxu0 %v4319_v39  ;;  %v4339_v39 = vld [vmem:[#allocation21 + $0x44] ss:$8 sps:$4 sm:$0xff]  }
 0x792   : > { %3952 = vmatpush3.bf16.msra.mxu1 %v4317_v36  ;;  %v4336_v36 = vld [vmem:[#allocation21 + $0x54] ss:$8 sps:$4 sm:$0xff]  }
 0x793   : > { %3977 = vmatprep.subr.bf16.mxu1 %v4320_v40 }
 0x833   : > { %v2051_v45 = vpop.f32.mrf.mxu0 }
 0x834   : > { %v2060_v53 = vmul.f32 0.088388346, %v2051_v45 }
 0x835   : > { %v1962_v46 = vpop.f32.mrf.mxu1  ;;  %v3935_v47 = vpop.f32.mrf.mxu0 }
 0x836   : > { %v2058_v50 = vmul.f32 0.088388346, %v1962_v46  ;;  %v2078_v61 = vadd.f32 %v3583_v57, %v2060_v53  ;;  %v4322_v53 = vld [vmem:[#allocation19 + $0x28] sm:$0xff]  }
 0x837   : > { %v3915_v51 = vpop.f32.mrf.mxu1  ;;  %v2054_v52 = vpop.f32.mrf.mxu0 }
 0x838   : > { %v2076_v54 = vadd.f32 %v3582_v48, %v2058_v50  ;;  %v2061_v60 = vmul.f32 0.088388346, %v2054_v52 }
 0x839   : > { %v1965_v55 = vpop.f32.mrf.mxu1  ;;  %v3936_v56 = vpop.f32.mrf.mxu0 }
 0x83a   : > { %v2059_v58 = vmul.f32 0.088388346, %v1965_v55  ;;  %2080 = vmax.xlane.f32.xlu0 %v2076_v54  ;;  %v2079_v63 = vadd.f32 %v3583_v57, %v2061_v60  ;;  %v4324_v55 = vld [vmem:[#allocation19 + $0x18] sm:$0xff]   ;;  %v4325_v56 = vld [vmem:[#allocation19 + $0x10] sm:$0xff]   ;;  %v4326_v57 = vld [vmem:[#allocation19 + $0x8] sm:$0xff]  }
 0x83b   : > { %v3916_v59 = vpop.f32.mrf.mxu1 }
 0x83c   : > { %v2077_v62 = vadd.f32 %v3582_v48, %v2059_v58  ;;  %v4321_v48 = vld [vmem:[#allocation19 + $0x30] sm:$0xff]   ;;  %v4327_v58 = vld [vmem:[#allocation19] sm:$0xff]  }
 0x83e   : > { %2084 = vmax.xlane.f32.xlu0 %v2078_v61  ;;  %2082 = vmax.xlane.f32.xlu1 %v2077_v62 }
 0x842   : > { %2086 = vmax.xlane.f32.xlu1 %v2079_v63 }
 0x8c3   : > { %v2081_v5 = vpop.xlane.xlu0 %2080 }
 0x8c4   : > { %v2088_v6 = vsub.f32 %v2076_v54, %v2081_v5  ;;  %v4323_v54 = vld [vmem:[#allocation19 + $0x20] sm:$0xff]  }
 0x8c6   : > { %v2092_v7 = vmul.f32 1.442695, %v2088_v6 }
 0x8c7   : > { %v2085_v8 = vpop.xlane.xlu0 %2084  ;;  %v2083_v9 = vpop.xlane.xlu1 %2082 }
 0x8c8   : > { %4392 = vpow2.f32 %v2092_v7  ;;  %v2090_v11 = vsub.f32 %v2078_v61, %v2085_v8  ;;  %v2089_v12 = vsub.f32 %v2077_v62, %v2083_v9 }
 0x8ca   : > { %v2096_v13 = vmul.f32 1.442695, %v2090_v11  ;;  %v2094_v14 = vmul.f32 1.442695, %v2089_v12 }
 0x8cb   : > { %v2087_v15 = vpop.xlane.xlu1 %2086 }
 0x8cc   : > { %4394 = vpow2.f32 %v2096_v13  ;;  %v2091_v16 = vsub.f32 %v2079_v63, %v2087_v15  ;;  %v4330_v15 = vld [vmem:[#allocation21 + $0x74] ss:$8 sps:$4 sm:$0xff]  }
 0x8cd   : > { %4396 = vpow2.f32 %v2094_v14  ;;  %v4328_v14 = vld [vmem:[#allocation21 + $0x70] ss:$8 sps:$4 sm:$0xff]   ;;  %2575 = vmatprep.subr.bf16.mxu0 %v4330_v15 }
 0x8ce   : > { %v2098_v17 = vmul.f32 1.442695, %v2091_v16 }
 0x8d0   : > { %4398 = vpow2.f32 %v2098_v17 }
 0x8d5   : > { %v4393_v18 = vpop.eup %4392 }
 0x8d6   : > { %2100 = vadd.xlane.f32.xlu0 %v4393_v18 }
 0x8d9   : > { %v4395_v19 = vpop.eup %4394 }
 0x8da   : > { %v4397_v20 = vpop.eup %4396  ;;  %2104 = vadd.xlane.f32.xlu0 %v4395_v19 }
 0x8db   : > { %2102 = vadd.xlane.f32.xlu1 %v4397_v20 }
 0x8dd   : > { %v4399_v21 = vpop.eup %4398 }
 0x8df   : > { %2106 = vadd.xlane.f32.xlu1 %v4399_v21 }
 0x95f   : > { %v2101_v37 = vpop.xlane.xlu0 %2100 }
 0x960   : > { %4400 = vrcp.f32 %v2101_v37  ;;  %v4340_v37 = vld [vmem:[#allocation21 + $0x30] ss:$8 sps:$4 sm:$0xff]  }
 0x963   : > { %v2105_v28 = vpop.xlane.xlu0 %2104 }
 0x964   : > { %v2103_v41 = vpop.xlane.xlu1 %2102 }
 0x965   : > { %4402 = vrcp.f32 %v2103_v41  ;;  %v4345_v41 = vld [vmem:[#allocation21 + $0x24] ss:$8 sps:$4 sm:$0xff]  }
 0x966   : > { %4404 = vrcp.f32 %v2105_v28  ;;  %v4342_v28 = vld [vmem:[#allocation21 + $0x34] ss:$8 sps:$4 sm:$0xff]  }
 0x968   : > { %v2107_v38 = vpop.xlane.xlu1 %2106 }
 0x969   : > { %4406 = vrcp.f32 %v2107_v38  ;;  %v4343_v38 = vld [vmem:[#allocation21 + $0x20] ss:$8 sps:$4 sm:$0xff]  }
 0x96d   : > { %v4401_v42 = vpop.eup %4400 }
 0x96e   : > { %v2112_v44 = vmul.f32 %v4401_v42, %v4393_v18  ;;  %v4348_v42 = vld [vmem:[#allocation21 + $0x14] ss:$8 sps:$4 sm:$0xff]  }
 0x972   : > { %v4403_v43 = vpop.eup %4402 }
 0x973   : > { %v2113_v45 = vmul.f32 %v4403_v43, %v4397_v20  ;;  %v4405_v46 = vpop.eup %4404  ;;  %v4346_v43 = vld [vmem:[#allocation21 + $0x10] ss:$8 sps:$4 sm:$0xff]  }
 0x974   : > { %v2114_v50 = vmul.f32 %v4405_v46, %v4395_v19  ;;  %v4352_v46 = vld [vmem:[#allocation22 + $0x78] sm:$0xff]  }
 0x975   : > { %v2116_v47 = vpack.c.bf16 %v2113_v45, %v2112_v44  ;;  %v4351_v44 = vld [vmem:[#allocation21 + $0x4] ss:$8 sps:$4 sm:$0xff]   ;;  %v4349_v45 = vld [vmem:[#allocation21] ss:$8 sps:$4 sm:$0xff]  }
 0x976   : > { %v4407_v49 = vpop.eup %4406 }
 0x977   : > { %3954 = vmatmul.mubr.bf16.vlgmr.msra.gmra.mxu1 %v2116_v47  ;;  %v2115_v51 = vmul.f32 %v4407_v49, %v4399_v21  ;;  %v4353_v47 = vld [vmem:[#allocation22 + $0x38] sm:$0xff]   ;;  %v4355_v49 = vld [vmem:[#allocation22 + $0x30] sm:$0xff]  }
 0x978   : > { %3978 = vmatpush3.bf16.msra.mxu1 %v4320_v40  ;;  %v4337_v40 = vld [vmem:[#allocation21 + $0x40] ss:$8 sps:$4 sm:$0xff]  }
 0x979   : > { %v2117_v52 = vpack.c.bf16 %v2115_v51, %v2114_v50  ;;  %3979 = vmatprep.subr.bf16.mxu1 %v4321_v48  ;;  %v4356_v50 = vld [vmem:[#allocation22 + $0x68] sm:$0xff]  }
 0x97a   : > { %v4357_v51 = vld [vmem:[#allocation22 + $0x28] sm:$0xff]  }
 0x97b   : > { %3974 = vmatmul.mubr.bf16.vlgmr.msra.gmra.mxu0 %v2117_v52  ;;  %v4358_v52 = vld [vmem:[#allocation22 + $0x60] sm:$0xff]  }
 0x97c   : > { %3980 = vmatpush3.bf16.msra.mxu1 %v4321_v48  ;;  %2607 = vmatprep.mubr.bf16.mxu0 %v4957_v10  ;;  %v4354_v48 = vld [vmem:[#allocation22 + $0x70] sm:$0xff]  }
 0x97d   : > { %3981 = vmatprep.subr.bf16.mxu1 %v4322_v53  ;;  %2576 = vmatpush1.bf16.msra.mxu0 %v4328_v14 }
 0x97e   : > { %2577 = vmatprep.subr.bf16.mxu0 %v4333_v34 }
 0x980   : > { %3982 = vmatpush3.bf16.msra.mxu1 %v4322_v53  ;;  %v4359_v53 = vld [vmem:[#allocation22 + $0x20] sm:$0xff]  }
 0x981   : > { %3983 = vmatprep.subr.bf16.mxu1 %v4323_v54  ;;  %2578 = vmatpush1.bf16.msra.mxu0 %v4331_v35 }
 0x982   : > { %2579 = vmatprep.subr.bf16.mxu0 %v4336_v36 }
 0x984   : > { %3984 = vmatpush3.bf16.msra.mxu1 %v4323_v54  ;;  %v4360_v54 = vld [vmem:[#allocation22 + $0x58] sm:$0xff]  }
 0x985   : > { %3985 = vmatprep.subr.bf16.mxu1 %v4324_v55  ;;  %2580 = vmatpush1.bf16.msra.mxu0 %v4334_v27 }
 0x986   : > { %2581 = vmatprep.subr.bf16.mxu0 %v4339_v39 }
 0x988   : > { %3986 = vmatpush3.bf16.msra.mxu1 %v4324_v55  ;;  %v4361_v55 = vld [vmem:[#allocation22 + $0x18] sm:$0xff]  }
 0x989   : > { %3987 = vmatprep.subr.bf16.mxu1 %v4325_v56  ;;  %2582 = vmatpush1.bf16.msra.mxu0 %v4337_v40 }
 0x98a   : > { %2583 = vmatprep.subr.bf16.mxu0 %v4342_v28 }
 0x98c   : > { %3988 = vmatpush3.bf16.msra.mxu1 %v4325_v56 }
 0x98d   : > { %3989 = vmatprep.subr.bf16.mxu1 %v4326_v57  ;;  %2584 = vmatpush1.bf16.msra.mxu0 %v4340_v37 }
 0x98e   : > { %2585 = vmatprep.subr.bf16.mxu0 %v4345_v41 }
 0x990   : > { %3990 = vmatpush3.bf16.msra.mxu1 %v4326_v57 }
 0x991   : > { %3991 = vmatprep.subr.bf16.mxu1 %v4327_v58  ;;  %2586 = vmatpush1.bf16.msra.mxu0 %v4343_v38 }
 0x992   : > { %2587 = vmatprep.subr.bf16.mxu0 %v4348_v42 }
 0x994   : > { %3992 = vmatpush3.bf16.msra.mxu1 %v4327_v58 }
 0x995   : > { %2588 = vmatpush1.bf16.msra.mxu0 %v4346_v43  ;;  %3765 = vmatprep.subr.bf16.mxu1 %v4352_v46 }
 0x996   : > { %2589 = vmatprep.subr.bf16.mxu0 %v4351_v44 }
 0x999   : > { %2590 = vmatpush1.bf16.msra.mxu0 %v4349_v45 }
 0xa37   : > { %v2200_v59 = vpop.f32.mrf.mxu1 }
 0xa39   : > { %v3955_v60 = vpop.f32.mrf.mxu1 }
 0xa3b   : > { %v2203_v61 = vpop.f32.mrf.mxu1  ;;  %v2289_v62 = vpop.f32.mrf.mxu0 }
 0xa3c   : > { %v2296_v63 = vpack.c.bf16 %v2203_v61, %v2200_v59 }
 0xa3d   : > { %v3956_v0 = vpop.f32.mrf.mxu1  ;;  %v3975_v1 = vpop.f32.mrf.mxu0 }
 0xa3e   : > { %3993 = vmatprep.mubr.bf16.mxu1 %v2296_v63 }
 0xa3f   : > { %v2292_v2 = vpop.f32.mrf.mxu0 }
 0xa40   : > { %v2297_v3 = vpack.c.bf16 %v2292_v2, %v2289_v62 }
 0xa41   : > { %v3976_v4 = vpop.f32.mrf.mxu0 }
 0xa42   : > { %3994 = vmatmul.mubr.bf16.vlgmr.msra.gmra.mxu1 %v2297_v3 }
 0xa43   : > { %3766 = vmatpush3.bf16.msra.mxu1 %v4353_v47 }
 0xa44   : > { %3767 = vmatprep.subr.bf16.mxu1 %v4354_v48 }
 0xa47   : > { %3768 = vmatpush3.bf16.msra.mxu1 %v4355_v49 }
 0xa48   : > { %3769 = vmatprep.subr.bf16.mxu1 %v4356_v50 }
 0xa4b   : > { %3770 = vmatpush3.bf16.msra.mxu1 %v4357_v51 }
 0xa4c   : > { %3771 = vmatprep.subr.bf16.mxu1 %v4358_v52 }
 0xa4f   : > { %3772 = vmatpush3.bf16.msra.mxu1 %v4359_v53 }
 0xa50   : > { %3773 = vmatprep.subr.bf16.mxu1 %v4360_v54 }
 0xa53   : > { %3774 = vmatpush3.bf16.msra.mxu1 %v4361_v55 }
 0xb02   : > { %v3995_v5 = vpop.f32.mrf.mxu1 }
 0xb03   : > { %v2413_v11 = vadd.f32 %v3995_v5, %v5435_v29 }
 0xb04   : > { %v2396_v6 = vpop.f32.mrf.mxu1 }
 0xb05   : > { %v2411_v7 = vadd.f32 %v2396_v6, %v5429_v23  ;;  %v3608_v6 = vld [vmem:[%s5712_s14 + $0x1] ss:$0 sm:$0xff] }
 0xb06   : > { %v3996_v8 = vpop.f32.mrf.mxu1 }
 0xb07   : > { %2415 = vadd.xlane.f32.xlu0 %v2411_v7  ;;  %v2414_v13 = vadd.f32 %v3996_v8, %v5437_v30 }
 0xb08   : > { %v2399_v9 = vpop.f32.mrf.mxu1 }
 0xb09   : > { %v2412_v12 = vadd.f32 %v2399_v9, %v5431_v24 }
 0xb0b   : > { %2419 = vadd.xlane.f32.xlu0 %v2413_v11  ;;  %2417 = vadd.xlane.f32.xlu1 %v2412_v12 }
 0xb0f   : > { %2421 = vadd.xlane.f32.xlu1 %v2414_v13 }
 0xb90   : > { %v2416_v16 = vpop.xlane.xlu0 %2415 }
 0xb91   : > { %v2423_v17 = vmul.f32 0.0078125, %v2416_v16 }
 0xb93   : > { %v5475_v18 = vsub.f32 %v2411_v7, %v2423_v17 }
 0xb94   : > { %v2420_v23 = vpop.xlane.xlu0 %2419  ;;  %v2418_v19 = vpop.xlane.xlu1 %2417 }
 0xb95   : > { %v2425_v20 = vmul.f32 0.0078125, %v2420_v23  ;;  %v2424_v21 = vmul.f32 0.0078125, %v2418_v19  ;;  %v2431_v24 = vmul.f32 %v5475_v18, %v5475_v18 }
 0xb97   : > { %v5479_v29 = vsub.f32 %v2413_v11, %v2425_v20  ;;  %v5481_v22 = vsub.f32 %v2412_v12, %v2424_v21  ;;  %2435 = vadd.xlane.f32.xlu0 %v2431_v24  ;;  %v3609_v12 = vld [vmem:[%s5713_s15 + $0x1] ss:$0 sm:$0xff] }
 0xb98   : > { %v2422_v30 = vpop.xlane.xlu1 %2421 }
 0xb99   : > { %v2426_v25 = vmul.f32 0.0078125, %v2422_v30  ;;  %v2433_v26 = vmul.f32 %v5479_v29, %v5479_v29  ;;  %v2432_v31 = vmul.f32 %v5481_v22, %v5481_v22  ;;  %v4362_v30 = vld [vmem:[#allocation22 + $0x50] sm:$0xff]  }
 0xb9a   : > { %3775 = vmatprep.subr.bf16.mxu1 %v4362_v30  ;;  %v2984_v30 = vld [vmem:[%s5503_s28 + $0x48] sm:$0xff] }
 0xb9b   : > { %v5487_v32 = vsub.f32 %v2414_v13, %v2426_v25  ;;  %2439 = vadd.xlane.f32.xlu0 %v2433_v26  ;;  %2437 = vadd.xlane.f32.xlu1 %v2432_v31  ;;  %v4363_v25 = vld [vmem:[#allocation22 + $0x10] sm:$0xff]   ;;  %v4364_v26 = vld [vmem:[#allocation22 + $0x48] sm:$0xff]  }
 0xb9c   : > { %3776 = vmatpush3.bf16.msra.mxu1 %v4363_v25  ;;  %v4365_v31 = vld [vmem:[#allocation22 + $0x8] sm:$0xff]  }
 0xb9d   : > { %v2434_v33 = vmul.f32 %v5487_v32, %v5487_v32  ;;  %3777 = vmatprep.subr.bf16.mxu1 %v4364_v26  ;;  %v2983_v25 = vld [vmem:[%s5503_s28 + $0x40] sm:$0xff]  ;;  %v2982_v26 = vld [vmem:[%s5503_s28 + $0x38] sm:$0xff] }
 0xb9f   : > { %2441 = vadd.xlane.f32.xlu1 %v2434_v33 }
 0xba0   : > { %3778 = vmatpush3.bf16.msra.mxu1 %v4365_v31  ;;  %v2981_v31 = vld [vmem:[%s5503_s28 + $0x30] sm:$0xff] }
 0xc20   : > { %v2436_v56 = vpop.xlane.xlu0 %2435 }
 0xc21   : > { %v2443_v57 = vmul.f32 0.0078125, %v2436_v56 }
 0xc23   : > { %v2447_v58 = vadd.f32 1e-05, %v2443_v57 }
 0xc24   : > { %v2440_v59 = vpop.xlane.xlu0 %2439  ;;  %v2438_v60 = vpop.xlane.xlu1 %2437 }
 0xc25   : > { %4408 = vrsqrt.f32 %v2447_v58  ;;  %v2445_v61 = vmul.f32 0.0078125, %v2440_v59  ;;  %v2444_v62 = vmul.f32 0.0078125, %v2438_v60 }
 0xc27   : > { %v2448_v63 = vadd.f32 1e-05, %v2444_v62  ;;  %v2449_v0 = vadd.f32 1e-05, %v2445_v61 }
 0xc28   : > { %v2442_v1 = vpop.xlane.xlu1 %2441 }
 0xc29   : > { %v2446_v2 = vmul.f32 0.0078125, %v2442_v1  ;;  %4410 = vrsqrt.f32 %v2448_v63 }
 0xc2a   : > { %4412 = vrsqrt.f32 %v2449_v0 }
 0xc2b   : > { %v2450_v3 = vadd.f32 1e-05, %v2446_v2  ;;  %v2990_v2 = vld [vmem:[%s5503_s28 + $0x78] sm:$0xff] }
 0xc2c   : > { %3997 = vmatprep.subr.mxu0 %v2990_v2 }
 0xc2d   : > { %4414 = vrsqrt.f32 %v2450_v3  ;;  %v2989_v3 = vld [vmem:[%s5503_s28 + $0x70] sm:$0xff] }
 0xc32   : > { %v4409_v4 = vpop.eup %4408 }
 0xc33   : > { %v2455_v5 = vmul.f32 %v4409_v4, %v5475_v18 }
 0xc35   : > { %v2464_v9 = vmul.f32 %v3608_v6, %v2455_v5 }
 0xc36   : > { %v4411_v7 = vpop.eup %4410 }
 0xc37   : > { %v2456_v8 = vmul.f32 %v4411_v7, %v5481_v22  ;;  %v4413_v11 = vpop.eup %4412  ;;  %v2473_v16 = vadd.f32 %v3609_v12, %v2464_v9 }
 0xc38   : > { %v2457_v18 = vmul.f32 %v4413_v11, %v5479_v29  ;;  %v4367_v29 = vld [vmem:[#allocation22] sm:$0xff]  }
 0xc39   : > { %v2465_v14 = vmul.f32 %v3608_v6, %v2456_v8 }
 0xc3a   : > { %v4415_v13 = vpop.eup %4414  ;;  %v2466_v20 = vmul.f32 %v3608_v6, %v2457_v18 }
 0xc3b   : > { %v2458_v15 = vmul.f32 %v4415_v13, %v5487_v32  ;;  %v2474_v17 = vadd.f32 %v3609_v12, %v2465_v14  ;;  %v4366_v32 = vld [vmem:[#allocation22 + $0x40] sm:$0xff]  }
 0xc3c   : > { %v2475_v24 = vadd.f32 %v3609_v12, %v2466_v20  ;;  %3779 = vmatprep.subr.bf16.mxu1 %v4366_v32  ;;  %v2980_v32 = vld [vmem:[%s5503_s28 + $0x28] sm:$0xff] }
 0xc3d   : > { %v2477_v23 = vpack.c.bf16 %v2474_v17, %v2473_v16  ;;  %v2467_v19 = vmul.f32 %v3608_v6, %v2458_v15  ;;  %3780 = vmatpush3.bf16.msra.mxu1 %v4367_v29  ;;  %v2979_v29 = vld [vmem:[%s5503_s28 + $0x20] sm:$0xff] }
 0xc3f   : > { %2608 = vmatmul.mubr.bf16.vlgmr.msra.gmra.mxu0 %v2477_v23  ;;  %v2476_v21 = vadd.f32 %v3609_v12, %v2467_v19  ;;  %v2988_v19 = vld [vmem:[%s5503_s28 + $0x68] sm:$0xff] }
 0xc40   : > { %2617 = vmatprep.mubr.bf16.mxu0 %v4957_v10  ;;  %3998 = vmatpush3.msra.mxu0 %v2990_v2  ;;  %v965_v2 = vld [vmem:[#allocation3 + $0x10] sm:$0xff] }
 0xc41   : > { %v2478_v22 = vpack.c.bf16 %v2476_v21, %v2475_v24  ;;  %3999 = vmatprep.subr.mxu0 %v2989_v3 }
 0xc42   : > { %4000 = vmatpush3.msra.mxu0 %v2989_v3  ;;  %v966_v3 = vld [vmem:[#allocation3 + $0x18] sm:$0xff] }
 0xc43   : > { %4001 = vmatprep.subr.mxu0 %v2988_v19 }
 0xc44   : > { %4002 = vmatpush3.msra.mxu0 %v2988_v19 }
 0xc47   : > { %2618 = vmatmul.mubr.bf16.gmra.mxu0 %v2478_v22  ;;  %v2985_v22 = vld [vmem:[%s5503_s28 + $0x50] sm:$0xff] }
 0xcff   : > { %v2609_v33 = vpop.f32.mrf.mxu0 }
 0xd00   : > { %v2628_v40 = vmax.f32 %v2609_v33, 0.0  ;;  %v2978_v33 = vld [vmem:[%s5503_s28 + $0x18] sm:$0xff] }
 0xd01   : > { %v2611_v34 = vpop.f32.mrf.mxu0 }
 0xd02   : > { %v2629_v27 = vmax.f32 %v2611_v34, 0.0  ;;  %v2977_v34 = vld [vmem:[%s5503_s28 + $0x10] sm:$0xff] }
 0xd03   : > { %v2613_v35 = vpop.f32.mrf.mxu0 }
 0xd04   : > { %v2630_v10 = vmax.f32 %v2613_v35, 0.0  ;;  %v2976_v35 = vld [vmem:[%s5503_s28 + $0x8] sm:$0xff] }
 0xd05   : > { %v2615_v36 = vpop.f32.mrf.mxu0 }
 0xd06   : > { %v2631_v39 = vmax.f32 %v2615_v36, 0.0  ;;  %v2636_v41 = vpack.c.bf16 %v2630_v10, %v2628_v40  ;;  %v2975_v10 = vld [vmem:[%s5503_s28] sm:$0xff] }
 0xd07   : > { %v2619_v37 = vpop.f32.mrf.mxu0 }
 0xd08   : > { %v2637_v28 = vpack.c.bf16 %v2631_v39, %v2629_v27  ;;  %v2632_v47 = vmax.f32 %v2619_v37, 0.0 }
 0xd09   : > { %v2621_v38 = vpop.f32.mrf.mxu0 }
 0xd0a   : > { %2800 = vmatprep.mubr.bf16.mxu1 %v2637_v28  ;;  %v2633_v45 = vmax.f32 %v2621_v38, 0.0 }
 0xd0b   : > { %v2623_v42 = vpop.f32.mrf.mxu0  ;;  %2801 = vmatmul.mubr.bf16.vlgmr.msra.gmra.mxu1 %v2636_v41 }
 0xd0c   : > { %v2634_v43 = vmax.f32 %v2623_v42, 0.0 }
 0xd0d   : > { %v2625_v44 = vpop.f32.mrf.mxu0 }
 0xd0e   : > { %v2635_v46 = vmax.f32 %v2625_v44, 0.0  ;;  %v2638_v49 = vpack.c.bf16 %v2634_v43, %v2632_v47  ;;  %v3642_v47 = vld [vmem:[%s5712_s14 + $0x2] ss:$0 sm:$0xff] }
 0xd10   : > { %v2639_v48 = vpack.c.bf16 %v2635_v46, %v2633_v45 }
 0xd12   : > { %2808 = vmatprep.mubr.bf16.mxu1 %v2639_v48 }
 0xd13   : > { %2809 = vmatmul.mubr.bf16.gmra.mxu1 %v2638_v49  ;;  %v3643_v49 = vld [vmem:[%s5713_s15 + $0x2] ss:$0 sm:$0xff] }
 0xdcb   : > { %v3781_v50 = vpop.f32.mrf.mxu1 }
 0xdcd   : > { %v3782_v51 = vpop.f32.mrf.mxu1 }
 0xdce   : > { %v3783_v52 = vadd.f32 %v3782_v51, %v3781_v50 }
 0xdcf   : > { %v3784_v53 = vpop.f32.mrf.mxu1 }
 0xdd0   : > { %v2817_v54 = vadd.f32 %v3783_v52, %v2473_v16 }
 0xdd1   : > { %v3785_v55 = vpop.f32.mrf.mxu1 }
 0xdd2   : > { %v3786_v56 = vadd.f32 %v3785_v55, %v3784_v53  ;;  %2821 = vadd.xlane.f32.xlu0 %v2817_v54 }
 0xdd3   : > { %v3787_v57 = vpop.f32.mrf.mxu1 }
 0xdd4   : > { %v2818_v58 = vadd.f32 %v3786_v56, %v2474_v17 }
 0xdd5   : > { %v3788_v59 = vpop.f32.mrf.mxu1 }
 0xdd6   : > { %v3789_v60 = vadd.f32 %v3788_v59, %v3787_v57  ;;  %2823 = vadd.xlane.f32.xlu1 %v2818_v58 }
 0xdd7   : > { %v3790_v61 = vpop.f32.mrf.mxu1 }
 0xdd8   : > { %v2819_v62 = vadd.f32 %v3789_v60, %v2475_v24  ;;  %v2986_v24 = vld [vmem:[%s5503_s28 + $0x58] sm:$0xff] }
 0xdd9   : > { %v3791_v63 = vpop.f32.mrf.mxu1 }
 0xdda   : > { %v3792_v0 = vadd.f32 %v3791_v63, %v3790_v61  ;;  %2825 = vadd.xlane.f32.xlu0 %v2819_v62 }
 0xddc   : > { %v2820_v1 = vadd.f32 %v3792_v0, %v2476_v21  ;;  %v2987_v21 = vld [vmem:[%s5503_s28 + $0x60] sm:$0xff]  ;;  %v964_v0 = vld [vmem:[#allocation3 + $0x8] sm:$0xff]  ;;  %s5599_s28 = scalar_lea.hbm %s5719_s21, %s3669_s26 }
 0xddd   : > { %4003 = vmatprep.subr.mxu0 %v2987_v21 }
 0xdde   : > { %2827 = vadd.xlane.f32.xlu1 %v2820_v1  ;;  %4004 = vmatpush3.msra.mxu0 %v2987_v21 }
 0xddf   : > { %4005 = vmatprep.subr.mxu0 %v2986_v24 }
 0xde0   : > { %4006 = vmatpush3.msra.mxu0 %v2986_v24 }
 0xde1   : > { %4007 = vmatprep.subr.mxu0 %v2985_v22 }
 0xde2   : > { %4008 = vmatpush3.msra.mxu0 %v2985_v22  ;;  %v3087_v22 = vmax.f32 %v966_v3, 0.0 }
 0xde3   : > { %4009 = vmatprep.subr.mxu0 %v2984_v30 }
 0xde4   : > { %4010 = vmatpush3.msra.mxu0 %v2984_v30 }
 0xde5   : > { %4011 = vmatprep.subr.mxu0 %v2983_v25 }
 0xde6   : > { %4012 = vmatpush3.msra.mxu0 %v2983_v25  ;;  %v3086_v25 = vmax.f32 %v965_v2, 0.0 }
 0xde7   : > { %4013 = vmatprep.subr.mxu0 %v2982_v26 }
 0xde8   : > { %4014 = vmatpush3.msra.mxu0 %v2982_v26 }
 0xde9   : > { %4015 = vmatprep.subr.mxu0 %v2981_v31 }
 0xdea   : > { %4016 = vmatpush3.msra.mxu0 %v2981_v31 }
 0xdeb   : > { %4017 = vmatprep.subr.mxu0 %v2980_v32 }
 0xdec   : > { %4018 = vmatpush3.msra.mxu0 %v2980_v32 }
 0xded   : > { %4019 = vmatprep.subr.mxu0 %v2979_v29 }
 0xdee   : > { %4020 = vmatpush3.msra.mxu0 %v2979_v29 }
 0xdef   : > { %4021 = vmatprep.subr.mxu0 %v2978_v33 }
 0xdf0   : > { %4022 = vmatpush3.msra.mxu0 %v2978_v33  ;;  %v3091_v33 = vmin.f32 %v3087_v22, 1.0 }
 0xdf1   : > { %4023 = vmatprep.subr.mxu0 %v2977_v34 }
 0xdf2   : > { %4024 = vmatpush3.msra.mxu0 %v2977_v34  ;;  %v3090_v34 = vmin.f32 %v3086_v25, 1.0 }
 0xdf3   : > { %4025 = vmatprep.subr.mxu0 %v2976_v35 }
 0xdf4   : > { %4026 = vmatpush3.msra.mxu0 %v2976_v35 }
 0xdf5   : > { %4027 = vmatprep.subr.mxu0 %v2975_v10 }
 0xdf6   : > { %4028 = vmatpush3.msra.mxu0 %v2975_v10 }
 0xe5b   : > { %v2822_v4 = vpop.xlane.xlu0 %2821 }
 0xe5c   : > { %v2829_v5 = vmul.f32 0.0078125, %v2822_v4 }
 0xe5e   : > { %v5507_v6 = vsub.f32 %v2817_v54, %v2829_v5 }
 0xe5f   : > { %v2824_v7 = vpop.xlane.xlu1 %2823 }
 0xe60   : > { %v2830_v8 = vmul.f32 0.0078125, %v2824_v7  ;;  %v2837_v9 = vmul.f32 %v5507_v6, %v5507_v6 }
 0xe62   : > { %v5511_v11 = vsub.f32 %v2818_v58, %v2830_v8  ;;  %2841 = vadd.xlane.f32.xlu0 %v2837_v9 }
 0xe63   : > { %v2826_v12 = vpop.xlane.xlu0 %2825 }
 0xe64   : > { %v2831_v13 = vmul.f32 0.0078125, %v2826_v12  ;;  %v2838_v14 = vmul.f32 %v5511_v11, %v5511_v11 }
 0xe66   : > { %v5515_v15 = vsub.f32 %v2819_v62, %v2831_v13  ;;  %2843 = vadd.xlane.f32.xlu1 %v2838_v14 }
 0xe67   : > { %v2828_v16 = vpop.xlane.xlu1 %2827 }
 0xe68   : > { %v2832_v17 = vmul.f32 0.0078125, %v2828_v16  ;;  %v2839_v18 = vmul.f32 %v5515_v15, %v5515_v15 }
 0xe6a   : > { %v5519_v23 = vsub.f32 %v2820_v1, %v2832_v17  ;;  %2845 = vadd.xlane.f32.xlu0 %v2839_v18  ;;  %v5547_v1 = vld [vmem:[#allocation3] sm:$0xff] }
 0xe6b   : > { %v3084_v13 = vmax.f32 %v5547_v1, 0.0 }
 0xe6c   : > { %v2840_v20 = vmul.f32 %v5519_v23, %v5519_v23 }
 0xe6e   : > { %2847 = vadd.xlane.f32.xlu1 %v2840_v20 }
 0xeeb   : > { %v2842_v36 = vpop.xlane.xlu0 %2841 }
 0xeec   : > { %v2849_v27 = vmul.f32 0.0078125, %v2842_v36  ;;  %v3520_v36 = vld [vmem:[#allocation10] ss:$0 sm:$0xff] }
 0xeee   : > { %v2853_v39 = vadd.f32 1e-05, %v2849_v27 }
 0xeef   : > { %v2844_v40 = vpop.xlane.xlu1 %2843 }
 0xef0   : > { %4416 = vrsqrt.f32 %v2853_v39  ;;  %v2850_v37 = vmul.f32 0.0078125, %v2844_v40  ;;  %v3099_v39 = vsub.f32 1.0, %v3091_v33  ;;  %v3098_v40 = vsub.f32 1.0, %v3090_v34 }
 0xef2   : > { %v2854_v28 = vadd.f32 1e-05, %v2850_v37 }
 0xef3   : > { %v2846_v41 = vpop.xlane.xlu0 %2845 }
 0xef4   : > { %4418 = vrsqrt.f32 %v2854_v28  ;;  %v2851_v38 = vmul.f32 0.0078125, %v2846_v41  ;;  %v3521_v28 = vld [vmem:[#allocation10 + $0x1] ss:$0 sm:$0xff] }
 0xef6   : > { %v2855_v42 = vadd.f32 1e-05, %v2851_v38  ;;  %v3103_v38 = vmax.f32 %v3099_v39, 1e-05 }
 0xef7   : > { %v2848_v43 = vpop.xlane.xlu1 %2847 }
 0xef8   : > { %4420 = vrsqrt.f32 %v2855_v42  ;;  %v2852_v44 = vmul.f32 0.0078125, %v2848_v43  ;;  %v3102_v43 = vmax.f32 %v3098_v40, 1e-05 }
 0xefa   : > { %v2856_v45 = vadd.f32 1e-05, %v2852_v44 }
 0xefc   : > { %4422 = vrsqrt.f32 %v2856_v45 }
 0xefd   : > { %v4417_v46 = vpop.eup %4416 }
 0xefe   : > { %v2861_v48 = vmul.f32 %v4417_v46, %v5507_v6 }
 0xf00   : > { %v2870_v50 = vmul.f32 %v3642_v47, %v2861_v48 }
 0xf01   : > { %v4419_v51 = vpop.eup %4418 }
 0xf02   : > { %v2879_v52 = vadd.f32 %v3643_v49, %v2870_v50  ;;  %v2862_v53 = vmul.f32 %v4419_v51, %v5511_v11  ;;  %v3085_v11 = vmax.f32 %v964_v0, 0.0 }
 0xf04   : > { %2887 = vadd.xlane.f32.xlu0 %v2879_v52  ;;  %2883 = vst [vmem:[#allocation2 + $0x10] sm:$0xff] %v2879_v52  ;;  %4029 = vmatprep.mubr.f32.mxu0 %v2879_v52  ;;  %v2871_v54 = vmul.f32 %v3642_v47, %v2862_v53  ;;  %v3089_v17 = vmin.f32 %v3085_v11, 1.0 }
 0xf05   : > { %v4421_v55 = vpop.eup %4420 }
 0xf06   : > { %v2880_v56 = vadd.f32 %v3643_v49, %v2871_v54  ;;  %v2863_v57 = vmul.f32 %v4421_v55, %v5515_v15  ;;  %v3097_v24 = vsub.f32 1.0, %v3089_v17  ;;  %v3093_v48 = vmax.f32 %v3089_v17, 1e-05 }
 0xf08   : > { %2889 = vadd.xlane.f32.xlu1 %v2880_v56  ;;  %2884 = vst [vmem:[#allocation2] sm:$0xff] %v2880_v56  ;;  %4030 = vmatmul.mubr.f32.vlgmr.msra.gmra.mxu0 %v2880_v56  ;;  %v2872_v58 = vmul.f32 %v3642_v47, %v2863_v57  ;;  %v3101_v29 = vmax.f32 %v3097_v24, 1e-05 }
 0xf09   : > { %v4423_v59 = vpop.eup %4422 }
 0xf0a   : > { %v2881_v60 = vadd.f32 %v3643_v49, %v2872_v58  ;;  %v2864_v61 = vmul.f32 %v4423_v59, %v5519_v23  ;;  %v3088_v23 = vmin.f32 %v3084_v13, 1.0  ;;  %4424 = vrcp.f32 %v3101_v29 }
 0xf0b   : > { %v3094_v58 = vmax.f32 %v3090_v34, 1e-05 }
 0xf0c   : > { %2891 = vadd.xlane.f32.xlu0 %v2881_v60  ;;  %2885 = vst [vmem:[#allocation2 + $0x18] sm:$0xff] %v2881_v60  ;;  %4032 = vmatprep.mubr.f32.mxu0 %v2881_v60  ;;  %v2873_v62 = vmul.f32 %v3642_v47, %v2864_v61  ;;  %v3096_v26 = vsub.f32 1.0, %v3088_v23  ;;  %v3092_v51 = vmax.f32 %v3088_v23, 1e-05 }
 0xf0e   : > { %v2882_v63 = vadd.f32 %v3643_v49, %v2873_v62  ;;  %v3100_v35 = vmax.f32 %v3096_v26, 1e-05 }
 0xf10   : > { %2893 = vadd.xlane.f32.xlu1 %v2882_v63  ;;  %2886 = vst [vmem:[#allocation2 + $0x8] sm:$0xff] %v2882_v63  ;;  %4033 = vmatmul.mubr.f32.gmra.mxu0 %v2882_v63  ;;  %4426 = vrcp.f32 %v3100_v35 }
 0xf11   : > { %4428 = vrcp.f32 %v3103_v38 }
 0xf12   : > { %4430 = vrcp.f32 %v3102_v43 }
 0xf17   : > { %v4425_v50 = vpop.eup %4424 }
 0xf18   : > { %v3107_v54 = vmul.f32 %v4425_v50, %v3093_v48 }
 0xf1a   : > { %4432 = vlog2.f32 %v3107_v54 }
 0xf21   : > { %973 = vrot.lane.b32.xlu1 %v964_v0, %s4960_s22 }
 0xf22   : > { %971 = vrot.lane.b32.xlu0 %v5547_v1, %s4960_s22 }
 0xf25   : > { %975 = vrot.lane.b32.xlu1 %v965_v2, %s4960_s22 }
 0xf29   : > { %977 = vrot.lane.b32.xlu1 %v966_v3, %s4960_s22 }
 0xf8d   : > { %v2888_v4 = vpop.xlane.xlu0 %2887 }
 0xf8e   : > { %v2895_v5 = vmul.f32 0.0078125, %v2888_v4 }
 0xf90   : > { %v5554_v6 = vsub.f32 %v2879_v52, %v2895_v5  ;;  %v4427_v52 = vpop.eup %4426 }
 0xf91   : > { %v2890_v7 = vpop.xlane.xlu1 %2889  ;;  %v3105_v55 = vmul.f32 %v4427_v52, %v3092_v51  ;;  %v4429_v57 = vpop.eup %4428 }
 0xf92   : > { %v2896_v8 = vmul.f32 0.0078125, %v2890_v7  ;;  %v2903_v9 = vmul.f32 %v5554_v6, %v5554_v6  ;;  %v4431_v59 = vpop.eup %4430 }
 0xf93   : > { %4434 = vlog2.f32 %v3105_v55  ;;  %v3109_v61 = vmul.f32 %v4431_v59, %v3094_v58  ;;  %v4433_v62 = vpop.eup %4432 }
 0xf94   : > { %v5558_v12 = vsub.f32 %v2880_v56, %v2896_v8  ;;  %2907 = vadd.xlane.f32.xlu0 %v2903_v9  ;;  %v3095_v56 = vmax.f32 %v3091_v33, 1e-05 }
 0xf95   : > { %v2892_v14 = vpop.xlane.xlu0 %2891 }
 0xf96   : > { %v2897_v15 = vmul.f32 0.0078125, %v2892_v14  ;;  %v2904_v16 = vmul.f32 %v5558_v12, %v5558_v12 }
 0xf98   : > { %v5563_v18 = vsub.f32 %v2881_v60, %v2897_v15  ;;  %2909 = vadd.xlane.f32.xlu1 %v2904_v16  ;;  %v3111_v60 = vmul.f32 %v4429_v57, %v3095_v56 }
 0xf99   : > { %v2894_v19 = vpop.xlane.xlu1 %2893  ;;  %v972_v46 = vpop.permute.xlu0 %971 }
 0xf9a   : > { %v2898_v20 = vmul.f32 0.0078125, %v2894_v19  ;;  %v2905_v21 = vmul.f32 %v5563_v18, %v5563_v18  ;;  %v984_v49 = vsel %vm983_vm3, %v5547_v1, %v972_v46  ;;  %4436 = vlog2.f32 %v3111_v60 }
 0xf9b   : > { %v1002_v53 = vmul.f32 %v3520_v36, %v984_v49  ;;  %4438 = vlog2.f32 %v3109_v61  ;;  %v3115_v1 = vmul.f32 0.6931472, %v4433_v62 }
 0xf9c   : > { %v5567_v30 = vsub.f32 %v2882_v63, %v2898_v20  ;;  %2911 = vadd.xlane.f32.xlu0 %v2905_v21 }
 0xf9d   : > { %v974_v31 = vpop.permute.xlu1 %973 }
 0xf9e   : > { %v2906_v32 = vmul.f32 %v5567_v30, %v5567_v30  ;;  %v985_v27 = vsel %vm983_vm3, %v964_v0, %v974_v31  ;;  %v3651_v0 = vld [vmem:[%s2991_s9] ss:$0 sm:$0xff]  ;;  %s4808_s9 = scalar_lea.vmem %s4807_s11, 1024 }
 0xf9f   : > { %v1003_v37 = vmul.f32 %v3520_v36, %v985_v27 }
 0xfa0   : > { %2913 = vadd.xlane.f32.xlu0 %v2906_v32  ;;  %v4435_v63 = vpop.eup %4434 }
 0xfa1   : > { %v976_v10 = vpop.permute.xlu1 %975  ;;  %v3113_v4 = vmul.f32 0.6931472, %v4435_v63 }
 0xfa2   : > { %v986_v41 = vsel %vm983_vm3, %v965_v2, %v976_v10 }
 0xfa3   : > { %v1004_v44 = vmul.f32 %v3521_v28, %v986_v41 }
 0xfa5   : > { %v978_v42 = vpop.permute.xlu1 %977 }
 0xfa6   : > { %v987_v45 = vsel %vm983_vm3, %v966_v3, %v978_v42 }
 0xfa7   : > { %v1005_v47 = vmul.f32 %v3521_v28, %v987_v45  ;;  %v4437_v9 = vpop.eup %4436 }
 0xfa8   : > { %v4439_v14 = vpop.eup %4438  ;;  %v3119_v16 = vmul.f32 0.6931472, %v4437_v9 }
 0xfa9   : > { %3158 = vrot.lane.b32.xlu1 %v1003_v37, %s4960_s22  ;;  %v3117_v19 = vmul.f32 0.6931472, %v4439_v14 }
 0xfad   : > { %3160 = vrot.lane.b32.xlu1 %v1004_v44, %s4960_s22 }
 0xfb1   : > { %3162 = vrot.lane.b32.xlu1 %v1005_v47, %s4960_s22 }
 0xfb6   : > { %3156 = vrot.lane.b32.xlu0 %v1002_v53, %s4960_s22  ;;  %s4802_s22 = scalar_lea.vmem %s5601_s3, 512 }
 0xfb7   : > { %p4803_p11 = scmp.ne.s32.totalorder %s5601_s3, %s4802_s22  ;;  %p4810_p1 = scmp.lt.s32.totalorder %s4808_s9, %s4802_s22 }
 0xfb9   : > { %p4804_p13 = pnand %p4803_p11, %p5117_p4  ;;  %p4811_p8 = por %p4810_p1, %p4809_p6 }
 0xfbb   : > { %p4805_p0 = pneg %p4804_p13 }
 0xfbd   : > { %p4812_p2 = pnand %p4811_p8, %p4805_p0 }
 0xfc8   : > { %v4031_v2 = vpop.f32.mrf.mxu0 }
 0xfc9   : > { %v3071_v3 = vadd.f32 %v4031_v2, %v3651_v0 }
 0xfca   : > { %v3065_v5 = vpop.f32.mrf.mxu0 }
 0xfcb   : > { %v3121_v7 = vadd.f32 %v3115_v1, %v3071_v3  ;;  %v3066_v8 = vadd.f32 %v3651_v0, %v3065_v5  ;;  %v3644_v1 = vld [vmem:[%s5781_s1] ss:$0 sm:$0xff] }
 0xfcd   : > { %v3653_v11 = vmul.f32 -1.442695, %v3121_v7  ;;  %v3120_v13 = vadd.f32 %v3113_v4, %v3066_v8 }
 0xfcf   : > { %4440 = vpow2.f32 %v3653_v11  ;;  %v3652_v15 = vmul.f32 -1.442695, %v3120_v13 }
 0xfd0   : > { %v4034_v17 = vpop.f32.mrf.mxu0 }
 0xfd1   : > { %4442 = vpow2.f32 %v3652_v15  ;;  %v3081_v23 = vadd.f32 %v4034_v17, %v3651_v0 }
 0xfd2   : > { %v3075_v20 = vpop.f32.mrf.mxu0 }
 0xfd3   : > { %v3123_v21 = vadd.f32 %v3119_v16, %v3081_v23  ;;  %v3076_v24 = vadd.f32 %v3651_v0, %v3075_v20 }
 0xfd5   : > { %v3655_v22 = vmul.f32 -1.442695, %v3123_v21  ;;  %v3122_v25 = vadd.f32 %v3117_v19, %v3076_v24 }
 0xfd7   : > { %4444 = vpow2.f32 %v3655_v22  ;;  %v3654_v26 = vmul.f32 -1.442695, %v3122_v25 }
 0xfd9   : > { %4446 = vpow2.f32 %v3654_v26 }
 0xfdc   : > { %v4441_v31 = vpop.eup %4440 }
 0xfdd   : > { %v3137_v32 = vadd.f32 1.0, %v4441_v31 }
 0xfde   : > { %v4443_v29 = vpop.eup %4442 }
 0xfdf   : > { %4448 = vrcp.f32 %v3137_v32  ;;  %v3136_v33 = vadd.f32 1.0, %v4443_v29 }
 0xfe1   : > { %4450 = vrcp.f32 %v3136_v33 }
 0xfe4   : > { %v4445_v34 = vpop.eup %4444 }
 0xfe5   : > { %v3139_v35 = vadd.f32 1.0, %v4445_v34 }
 0xfe6   : > { %v4447_v10 = vpop.eup %4446 }
 0xfe7   : > { %4452 = vrcp.f32 %v3139_v35  ;;  %v3138_v36 = vadd.f32 1.0, %v4447_v10 }
 0xfe9   : > { %4454 = vrcp.f32 %v3138_v36 }
 0xfec   : > { %v4449_v27 = vpop.eup %4448 }
 0xfed   : > { %3149 = vst.msk [vmem:[#allocation3 + $0x8] sm:$0xff] %vm983_vm3, %v4449_v27 }
 0xfee   : > { %v4451_v39 = vpop.eup %4450 }
 0xfef   : > { %3148 = vst.msk [vmem:[#allocation3] sm:$0xff] %vm983_vm3, %v4451_v39 }
 0xff4   : > { %v4453_v40 = vpop.eup %4452 }
 0xff5   : > { %3151 = vst.msk [vmem:[#allocation3 + $0x18] sm:$0xff] %vm983_vm3, %v4453_v40 }
 0xff6   : > { %v4455_v37 = vpop.eup %4454 }
 0xff7   : > { %3150 = vst.msk [vmem:[#allocation3 + $0x10] sm:$0xff] %vm983_vm3, %v4455_v37 }
0x101d   : > { %v2908_v28 = vpop.xlane.xlu0 %2907 }
0x101e   : > { %v2915_v41 = vmul.f32 0.0078125, %v2908_v28 }
0x1020   : > { %v2919_v38 = vadd.f32 1e-05, %v2915_v41 }
0x1021   : > { %v2910_v42 = vpop.xlane.xlu1 %2909 }
0x1022   : > { %4456 = vrsqrt.f32 %v2919_v38  ;;  %v2916_v43 = vmul.f32 0.0078125, %v2910_v42 }
0x1024   : > { %v2920_v44 = vadd.f32 1e-05, %v2916_v43 }
0x1025   : > { %v3159_v45 = vpop.permute.xlu1 %3158  ;;  %v2912_v46 = vpop.xlane.xlu0 %2911 }
0x1026   : > { %4458 = vrsqrt.f32 %v2920_v44  ;;  %v3169_v47 = vsel %vm983_vm3, %v4449_v27, %v3159_v45  ;;  %v2917_v48 = vmul.f32 0.0078125, %v2912_v46 }
0x1027   : > { %v3174_v49 = vsel %vm3172_vm4, %v3169_v47, 0.0 }
0x1028   : > { %3178 = vst [vmem:[%s5321_s20 + $0x8] sm:$0xff] %v3174_v49  ;;  %v2921_v50 = vadd.f32 1e-05, %v2917_v48 }
0x1029   : > { %v3161_v51 = vpop.permute.xlu1 %3160  ;;  %v2914_v52 = vpop.xlane.xlu0 %2913 }
0x102a   : > { %4460 = vrsqrt.f32 %v2921_v50  ;;  %v3170_v53 = vsel %vm983_vm3, %v4455_v37, %v3161_v51  ;;  %v2918_v54 = vmul.f32 0.0078125, %v2914_v52 }
0x102b   : > { %v3175_v55 = vsel %vm3172_vm4, %v3170_v53, 0.0 }
0x102c   : > { %3179 = vst [vmem:[%s5321_s20 + $0x10] sm:$0xff] %v3175_v55  ;;  %v2922_v56 = vadd.f32 1e-05, %v2918_v54 }
0x102d   : > { %v3163_v57 = vpop.permute.xlu1 %3162  ;;  %v3157_v58 = vpop.permute.xlu0 %3156 }
0x102e   : > { %4462 = vrsqrt.f32 %v2922_v56  ;;  %v3171_v59 = vsel %vm983_vm3, %v4453_v40, %v3163_v57  ;;  %v3168_v60 = vsel %vm983_vm3, %v4451_v39, %v3157_v58 }
0x102f   : > { %v4457_v61 = vpop.eup %4456  ;;  %v3176_v62 = vsel %vm3172_vm4, %v3171_v59, 0.0  ;;  %v3173_v63 = vsel %vm3172_vm4, %v3168_v60, 0.0 }
0x1030   : > { %v2927_v0 = vmul.f32 %v4457_v61, %v5554_v6  ;;  %3180 = vst [vmem:[%s5321_s20 + $0x18] sm:$0xff] %v3176_v62  ;;  %3177 = vst [vmem:[%s5321_s20] sm:$0xff] %v3173_v63 }
0x1031   : > { %4815 = shalt.err (!%p4812_p2)
}
0x1032   : > { %s4816_s20 = scalar_lea.hbm %s5599_s28, 512  ;;  %s4820_s24 = scalar_lea.hbm %s5719_s21, 1536 }
0x1033   : > { %p4817_p12 = scmp.ne.s32.totalorder %s5599_s28, %s4816_s20  ;;  %p4821_p7 = scmp.lt.s32.totalorder %s5599_s28, %s5719_s21 }
0x1034   : > { %p4822_p9 = scmp.lt.s32.totalorder %s4820_s24, %s4816_s20 }
0x1035   : > { %p4818_p3 = pnand %p4817_p12, %p5117_p4 }
0x1036   : > { %p4823_p10 = por %p4822_p9, %p4821_p7 }
0x1037   : > { %p4819_p5 = pneg %p4818_p3 }
0x1039   : > { %p4824_p11 = pnand %p4823_p10, %p4819_p5 }
0x103b   : > { %4827 = shalt.err (!%p4824_p11)
}
0x103c   : > { %s4962_s1 = smov 128   ;;  %s4963_s22 = smov 8   ;;  %v4459_v6 = vpop.eup %4458  ;;  %v2938_v3 = vmul.f32 %v3644_v1, %v2927_v0 }
0x103d   : > { %4088 = dma.vmem_to_hbm [thread:$0]  (%p5117_p4), %s5601_s3, 512, %s5599_s28, %s3187_s17, %s4962_s1, %s4962_s1, %s4963_s22   ;;  %v2928_v2 = vmul.f32 %v4459_v6, %v5558_v12  ;;  %v4461_v7 = vpop.eup %4460 }
0x103e   : > { %s5782_s9 = sld [smem:[#allocation54_spill]]  ;;  %v2929_v8 = vmul.f32 %v4461_v7, %v5563_v18  ;;  %v4463_v14 = vpop.eup %4462  ;;  %s3668_s3 = sshll.u32 %s4928_s27, 8 }
0x103f   : > { %v2939_v5 = vmul.f32 %v3644_v1, %v2928_v2  ;;  %v2930_v15 = vmul.f32 %v4463_v14, %v5567_v30  ;;  %s3203_s28 = sshll.u32 %s5319_s29, 4  ;;  %s5783_s26 = sld [smem:[#allocation55_spill]]  ;;  %s5650_s28 = int_to_ptr.vmem [resolvable:$true] %s3203_s28 }
0x1040   : > { %v2940_v16 = vmul.f32 %v3644_v1, %v2929_v8  ;;  %s3182_s7 = scalar_lea.sflag [#allocation6], %s5315_s16  ;;  %s4828_s2 = scalar_lea.vmem %s5650_s28, 256 }
0x1041   : > { %v2941_v12 = vmul.f32 %v3644_v1, %v2930_v15  ;;  %p4829_p13 = scmp.ne.s32.totalorder %s5650_s28, %s4828_s2  ;;  %s4964_s27 = smov [#allocation25]  }
0x1042   : > { %s4832_s1 = sshll.u32 %s4964_s27, 4  ;;  %s4833_s1 = int_to_ptr.vmem [resolvable:$false] %s4832_s1 }
0x1043   : > { %p4830_p0 = pnand %p4829_p13, %p5117_p4  ;;  %s4834_s22 = scalar_lea.vmem %s4833_s1, 512 }
0x1044   : > { %v3645_v4 = vld [vmem:[%s5782_s9] ss:$0 sm:$0xff]  ;;  %p4835_p1 = scmp.lt.s32.totalorder %s5650_s28, %s4833_s1  ;;  %p4836_p8 = scmp.lt.s32.totalorder %s4834_s22, %s4828_s2 }
0x1045   : > { %v2949_v9 = vadd.f32 %v3645_v4, %v2938_v3  ;;  %v2950_v11 = vadd.f32 %v3645_v4, %v2939_v5  ;;  %v2951_v17 = vadd.f32 %v3645_v4, %v2940_v16  ;;  %v2952_v23 = vadd.f32 %v3645_v4, %v2941_v12  ;;  %s5784_s4 = smov %s5783_s26  ;;  %s5648_s24 = scalar_lea.hbm %s5783_s26, %s3668_s3 }
0x1046   : > { %p4831_p6 = pneg %p4830_p0  ;;  %p4837_p2 = por %p4836_p8, %p4835_p1 }
0x1047   : > { %v3673_v13 = vpack.c.bf16 %v2950_v11, %v2949_v9  ;;  %v3678_v18 = vpack.c.bf16 %v2952_v23, %v2951_v17 }
0x1048   : > { %p4838_p12 = pnand %p4837_p2, %p4831_p6 }
0x1049   : > { %3674 = vst [vmem:[%s5319_s29] sm:$0xff] %v3673_v13   ;;  %3680 = vst [vmem:[%s5319_s29 + $0x8] sm:$0xff] %v3678_v18  }
0x104a   : > { %4841 = shalt.err (!%p4838_p12)
}
0x104b   : > { %s4842_s29 = scalar_lea.hbm %s5648_s24, 256  ;;  %s4846_s9 = scalar_lea.hbm %s5784_s4, 768 }
0x104c   : > { %p4843_p3 = scmp.ne.s32.totalorder %s5648_s24, %s4842_s29  ;;  %p4847_p9 = scmp.lt.s32.totalorder %s5648_s24, %s5784_s4 }
0x104d   : > { %p4848_p10 = scmp.lt.s32.totalorder %s4846_s9, %s4842_s29 }
0x104e   : > { %p4844_p5 = pnand %p4843_p3, %p5117_p4 }
0x104f   : > { %p4849_p11 = por %p4848_p10, %p4847_p9 }
0x1050   : > { %p4845_p7 = pneg %p4844_p5 }
0x1052   : > { %p4850_p13 = pnand %p4849_p11, %p4845_p7 }
0x1054   : > { %4853 = shalt.err (!%p4850_p13)
}
0x1055   : > { %s4965_s20 = smov 64   ;;  %s4966_s26 = smov 4  }
0x1056   : > { %4087 = dma.vmem_to_hbm [thread:$0]  (%p5117_p4), %s5650_s28, 256, %s5648_s24, %s3182_s7, %s4965_s20, %s4965_s20, %s4966_s26  }
0x1057 PF: > { %s5785_s2 = sld [smem:[#allocation40_spill]] }
0x1058   : > { %s5786_s27 = sld [smem:[#allocation37_spill]] }
0x1059   : > { %s5787_s1 = sld [smem:[#allocation42_spill]] }
0x105d   : > { %p4164_p0 = scmp.ge.s32.totalorder %s5785_s2, 2 }
0x105e   : > { %s3237_s22 = sand.u32 1, %s5786_s27  }
0x105f   : > { %p5788_p6 = scmp.ne.s32.totalorder %s5787_s1, 0  ;;  %s3238_s29 = scalar_lea.sflag [#allocation6], %s3237_s22 }
0x1061   : > { %p4132_p1 = pnand %p4164_p0, %p5788_p6 }
0x1063   : > { %p4133_p8 = pneg %p4132_p1 }
0x1065   : > { %4907 = dma.done.wait (%p4133_p8), %s3238_s29, 256  }
0x1066   : > { %4909 = vsyncadd (%p4133_p8), %s3238_s29, 4294967040  ;;  %s3247_s23 = scalar_lea.sflag [#allocation27], %s3237_s22 }
0x1067   : > { %4911 = dma.done.wait (%p4133_p8), %s3247_s23, 512  }
0x1068   : > { %4913 = vsyncadd (%p4133_p8), %s3247_s23, 4294966784  ;;  %s45_s28 = sadd.s32 1, %s5785_s2   ;;  %s5789_s5 = sld [smem:[#allocation38_spill]] }
0x1069   : > { %p42_p2 = scmp.ge.s32.totalorder %s45_s28, 5   ;;  %s5790_s26 = sld [smem:[#allocation43_spill]] }
0x106a   : > { %s5791_s27 = sld [smem:[#allocation39_spill]]  ;;  %s5793_s2 = smov %s4920_s25 }
0x106b   : > { %s5792_s3 = sld [smem:[#allocation41_spill]]  ;;  %44 = sbr.rel (!%p42_p2) target bundleno = 26 (0x1a), region = 218 }
0x106e   : > { %s5794_s25 = smov %s5789_s5 }
0x1070   :  { %3252 = vsyncpa [#allocation5], 1 }
0x1071   :  { %3254 = vsyncpa [#allocation5 + $0x1], 1 }
0x1072   :  { %3255 = vsyncpa [#allocation8], 1 }
0x1073   :  { %3256 = vsyncpa [#allocation11], 1 }
0x1074   :  { %3257 = vsyncpa [#allocation14], 1 }
0x1075   :  { %3258 = vsyncpa [#allocation17], 1 }
0x1076   :  { %3259 = vsyncpa [#allocation20], 1 }
0x1077   :  { %3260 = vsyncpa [#allocation23], 1 }
0x1078   :  { %3261 = vsyncpa [#allocation6], 1 }
0x1079   :  { %3263 = vsyncpa [#allocation6 + $0x1], 1 }
0x107a   :  { %3264 = vsyncpa [#allocation27], 1 }
0x107b   :  { %3266 = vsyncpa [#allocation27 + $0x1], 1 }

</bundles_post_ra>
